<compile_context>
chip_gen: v7x
topology: tpu7x:2x2x1
jax: 0.10.0
libtpu: 0.0.40
codegen_flags: <defaults>
</compile_context>

<pallas_src>
import math
import functools

import jax
import jax.numpy as jnp
from jax import lax
from jax.experimental import pallas as pl
from jax.experimental.pallas import tpu as pltpu


_VMEM_LIMIT = 64 * 1024 * 1024  # generous ceiling; per-call residency is sized << this


# ----------------------------------------------------------------------------
# Tile helper: largest `align`-multiple tile <= preferred that divides dim.
# Falls back to the full dim only if no aligned divisor exists (rare; still correct).
# ----------------------------------------------------------------------------
def _tile(dim, preferred, align):
    if dim <= preferred:
        return dim
    t = (preferred // align) * align
    while t >= align:
        if dim % t == 0:
            return t
        t -= align
    return dim


# ----------------------------------------------------------------------------
# Kernel 1: tiled matmul + bias.  fp32 accumulator scratch, bf16 output.
# ----------------------------------------------------------------------------
def _matmul_bias_kernel(x_ref, w_ref, b_ref, o_ref, acc_ref):
    @pl.when(pl.program_id(2) == 0)
    def _():
        acc_ref[...] = jnp.zeros_like(acc_ref)

    acc_ref[...] += jnp.dot(
        x_ref[...].astype(jnp.bfloat16),
        w_ref[...],
        preferred_element_type=jnp.float32,
    )

    @pl.when(pl.program_id(2) == pl.num_programs(2) - 1)
    def _():
        y = acc_ref[...] + b_ref[...].astype(jnp.float32)
        o_ref[...] = y.astype(o_ref.dtype)


def matmul_bias(x, w, b, *, out_dtype=jnp.bfloat16, tm=256, tn=256, tk=512):
    """x: (M, K) bf16/fp32, w: (K, N) bf16, b: (1, N) fp32 -> (M, N) out_dtype."""
    M, K = x.shape
    N = w.shape[1]
    tm, tn, tk = _tile(M, tm, 16), _tile(N, tn, 128), _tile(K, tk, 128)
    grid = (M // tm, N // tn, K // tk)
    return pl.pallas_call(
        _matmul_bias_kernel,
        out_shape=jax.ShapeDtypeStruct((M, N), out_dtype),
        grid=grid,
        in_specs=[
            pl.BlockSpec((tm, tk), lambda i, j, k: (i, k)),
            pl.BlockSpec((tk, tn), lambda i, j, k: (k, j)),
            pl.BlockSpec((1, tn), lambda i, j, k: (0, j)),
        ],
        out_specs=pl.BlockSpec((tm, tn), lambda i, j, k: (i, j)),
        scratch_shapes=[pltpu.VMEM((tm, tn), jnp.float32)],
        compiler_params=pltpu.CompilerParams(
            dimension_semantics=("parallel", "parallel", "arbitrary"),
            vmem_limit_bytes=_VMEM_LIMIT),
    )(x, w, b)


# ----------------------------------------------------------------------------
# Kernel 2: tiled matmul + bias + residual + LayerNorm epilogue (full N = d kept
# in one block for the LN reduction).  bf16 output.
# ----------------------------------------------------------------------------
def _matmul_bias_res_ln_kernel(x_ref, w_ref, b_ref, res_ref, g_ref, be_ref,
                               o_ref, acc_ref, *, eps):
    @pl.when(pl.program_id(1) == 0)
    def _():
        acc_ref[...] = jnp.zeros_like(acc_ref)

    acc_ref[...] += jnp.dot(
        x_ref[...].astype(jnp.bfloat16),
        w_ref[...],
        preferred_element_type=jnp.float32,
    )

    @pl.when(pl.program_id(1) == pl.num_programs(1) - 1)
    def _():
        z = acc_ref[...] + b_ref[...] + res_ref[...].astype(jnp.float32)
        mu = jnp.mean(z, axis=-1, keepdims=True)
        var = jnp.mean((z - mu) ** 2, axis=-1, keepdims=True)
        zn = (z - mu) * lax.rsqrt(var + eps)
        o_ref[...] = (zn * g_ref[...] + be_ref[...]).astype(o_ref.dtype)


def matmul_bias_res_ln(x, w, b, res, gamma, beta, *, eps=1e-5, tm=256, tk=512):
    """LN(res + x @ w + b). x: (M, K) bf16, w: (K, N) bf16, res: (M, N) bf16."""
    M, K = x.shape
    N = w.shape[1]
    tm, tk = _tile(M, tm, 16), _tile(K, tk, 128)
    grid = (M // tm, K // tk)
    return pl.pallas_call(
        functools.partial(_matmul_bias_res_ln_kernel, eps=eps),
        out_shape=jax.ShapeDtypeStruct((M, N), jnp.bfloat16),
        grid=grid,
        in_specs=[
            pl.BlockSpec((tm, tk), lambda i, k: (i, k)),
            pl.BlockSpec((tk, N), lambda i, k: (k, 0)),
            pl.BlockSpec((1, N), lambda i, k: (0, 0)),
            pl.BlockSpec((tm, N), lambda i, k: (i, 0)),
            pl.BlockSpec((1, N), lambda i, k: (0, 0)),
            pl.BlockSpec((1, N), lambda i, k: (0, 0)),
        ],
        out_specs=pl.BlockSpec((tm, N), lambda i, k: (i, 0)),
        scratch_shapes=[pltpu.VMEM((tm, N), jnp.float32)],
        compiler_params=pltpu.CompilerParams(
            dimension_semantics=("parallel", "arbitrary"),
            vmem_limit_bytes=_VMEM_LIMIT),
    )(x, w, b, res, gamma, beta)


# ----------------------------------------------------------------------------
# Kernel 3: fused FFN block  LN(x + relu(x@w1+b1)@w2 + b2), dff axis tiled.
# The ReLU'd hidden chunk is produced and consumed per grid step; w1/w2 stream in
# tdff-wide chunks, so VMEM residency is bounded regardless of dff.
# ----------------------------------------------------------------------------
def _ffn_res_ln_kernel(x_ref, w1_ref, b1_ref, w2_ref, b2_ref, g_ref, be_ref,
                       o_ref, acc_ref, *, eps):
    @pl.when(pl.program_id(1) == 0)
    def _():
        acc_ref[...] = jnp.zeros_like(acc_ref)

    x_bf = x_ref[...].astype(jnp.bfloat16)
    h = jnp.dot(x_bf, w1_ref[...], preferred_element_type=jnp.float32) + b1_ref[...]
    h = jnp.maximum(h, 0.0)
    acc_ref[...] += jnp.dot(h.astype(jnp.bfloat16), w2_ref[...],
                            preferred_element_type=jnp.float32)

    @pl.when(pl.program_id(1) == pl.num_programs(1) - 1)
    def _():
        z = acc_ref[...] + b2_ref[...] + x_ref[...].astype(jnp.float32)
        mu = jnp.mean(z, axis=-1, keepdims=True)
        var = jnp.mean((z - mu) ** 2, axis=-1, keepdims=True)
        zn = (z - mu) * lax.rsqrt(var + eps)
        o_ref[...] = (zn * g_ref[...] + be_ref[...]).astype(o_ref.dtype)


def ffn_res_ln(x, w1, b1, w2, b2, gamma, beta, *, eps=1e-5, tm=256, tdff=512):
    M, d = x.shape
    dff = w1.shape[1]
    tm = _tile(M, tm, 16)
    tdff = _tile(dff, tdff, 128)
    grid = (M // tm, dff // tdff)
    return pl.pallas_call(
        functools.partial(_ffn_res_ln_kernel, eps=eps),
        out_shape=jax.ShapeDtypeStruct((M, d), jnp.bfloat16),
        grid=grid,
        in_specs=[
            pl.BlockSpec((tm, d), lambda i, j: (i, 0)),
            pl.BlockSpec((d, tdff), lambda i, j: (0, j)),
            pl.BlockSpec((1, tdff), lambda i, j: (0, j)),
            pl.BlockSpec((tdff, d), lambda i, j: (j, 0)),
            pl.BlockSpec((1, d), lambda i, j: (0, 0)),
            pl.BlockSpec((1, d), lambda i, j: (0, 0)),
            pl.BlockSpec((1, d), lambda i, j: (0, 0)),
        ],
        out_specs=pl.BlockSpec((tm, d), lambda i, j: (i, 0)),
        scratch_shapes=[pltpu.VMEM((tm, d), jnp.float32)],
        compiler_params=pltpu.CompilerParams(
            dimension_semantics=("parallel", "arbitrary"),
            vmem_limit_bytes=_VMEM_LIMIT),
    )(x, w1, b1, w2, b2, gamma, beta)


# ----------------------------------------------------------------------------
# Kernel 4: flash attention.  Inputs (B, H, L, dh); grid (B, H, q_blocks, k_blocks)
# with online softmax over the k axis.  Optional 0/1 mask (Lq, Lk) in bf16.
# ----------------------------------------------------------------------------
def _make_flash_kernel(scale, has_mask):
    def kernel(*refs):
        if has_mask:
            q_ref, k_ref, v_ref, m_ref, o_ref, m_sc, l_sc, acc_sc = refs
        else:
            q_ref, k_ref, v_ref, o_ref, m_sc, l_sc, acc_sc = refs
        ki = pl.program_id(3)

        @pl.when(ki == 0)
        def _():
            m_sc[...] = jnp.full_like(m_sc, -1e30)
            l_sc[...] = jnp.zeros_like(l_sc)
            acc_sc[...] = jnp.zeros_like(acc_sc)

        q = q_ref[0, 0]                      # (tq, dh) bf16
        k = k_ref[0, 0]                      # (tk, dh) bf16
        # NT matmul on the MXU (contract last dims), no explicit transpose.
        s = lax.dot_general(q, k, (((1,), (1,)), ((), ())),
                            preferred_element_type=jnp.float32) * scale
        if has_mask:
            s = jnp.where(m_ref[...] > 0, s, -1e9)

        m_prev = m_sc[...]
        m_new = jnp.maximum(m_prev, jnp.max(s, axis=-1, keepdims=True))
        alpha = jnp.exp(m_prev - m_new)
        p = jnp.exp(s - m_new)
        l_sc[...] = alpha * l_sc[...] + jnp.sum(p, axis=-1, keepdims=True)
        acc_sc[...] = alpha * acc_sc[...] + jnp.dot(
            p.astype(v_ref.dtype), v_ref[0, 0], preferred_element_type=jnp.float32)
        m_sc[...] = m_new

        @pl.when(ki == pl.num_programs(3) - 1)
        def _():
            o_ref[0, 0] = (acc_sc[...] *
                           pl.reciprocal(l_sc[...], approx=True)).astype(o_ref.dtype)

    return kernel


def flash_attention(q, k, v, mask, *, tq=256, tk=256):
    """q: (B, H, Lq, dh) bf16; k, v: (B, H, Lk, dh) bf16; mask: (Lq, Lk) bf16 0/1 or None."""
    B, H, Lq, dh = q.shape
    Lk = k.shape[2]
    scale = 1.0 / math.sqrt(dh)
    tq = _tile(Lq, tq, 16)
    tk = _tile(Lk, tk, 128)
    has_mask = mask is not None
    kern = _make_flash_kernel(scale, has_mask)
    grid = (B, H, Lq // tq, Lk // tk)
    in_specs = [
        pl.BlockSpec((1, 1, tq, dh), lambda b, h, qi, ki: (b, h, qi, 0)),
        pl.BlockSpec((1, 1, tk, dh), lambda b, h, qi, ki: (b, h, ki, 0)),
        pl.BlockSpec((1, 1, tk, dh), lambda b, h, qi, ki: (b, h, ki, 0)),
    ]
    args = [q, k, v]
    if has_mask:
        in_specs.append(pl.BlockSpec((tq, tk), lambda b, h, qi, ki: (qi, ki)))
        args.append(mask)
    return pl.pallas_call(
        kern,
        out_shape=jax.ShapeDtypeStruct((B, H, Lq, dh), jnp.bfloat16),
        grid=grid,
        in_specs=in_specs,
        out_specs=pl.BlockSpec((1, 1, tq, dh), lambda b, h, qi, ki: (b, h, qi, 0)),
        scratch_shapes=[pltpu.VMEM((tq, 1), jnp.float32),
                        pltpu.VMEM((tq, 1), jnp.float32),
                        pltpu.VMEM((tq, dh), jnp.float32)],
        compiler_params=pltpu.CompilerParams(
            dimension_semantics=("parallel", "parallel", "parallel", "arbitrary"),
            vmem_limit_bytes=_VMEM_LIMIT),
    )(*args)


# ----------------------------------------------------------------------------
# Transformer blocks built from the fused kernels
# ----------------------------------------------------------------------------
def _split_heads(x, B, L, H, dh):
    # (B, L, H, dh) -> (B, H, L, dh)
    return jnp.transpose(x.reshape(B, L, H, dh), (0, 2, 1, 3))


def attn_block_self(x, mask, p, ln_g, ln_b, nhead):
    """LN(x + SelfAttn(x)) — fused-QKV matmul, flash attention, O-proj+residual+LN."""
    B, L, d = x.shape
    dh = d // nhead
    x2 = x.reshape(B * L, d)
    qkv = matmul_bias(x2, p["wqkv"], p["bqkv"])              # (M, 3d) bf16
    qkv = qkv.reshape(B, L, 3, nhead, dh)
    q = jnp.transpose(qkv[:, :, 0], (0, 2, 1, 3))
    k = jnp.transpose(qkv[:, :, 1], (0, 2, 1, 3))
    v = jnp.transpose(qkv[:, :, 2], (0, 2, 1, 3))
    a = flash_attention(q, k, v, mask)                        # (B, H, L, dh) bf16
    a2 = jnp.transpose(a, (0, 2, 1, 3)).reshape(B * L, d)
    y2 = matmul_bias_res_ln(a2, p["wo"], p["bo"], x2, ln_g, ln_b)
    return y2.reshape(B, L, d)


def attn_block_cross(x, memory, mask, p, ln_g, ln_b, nhead):
    """LN(x + CrossAttn(x, memory))."""
    B, Lq, d = x.shape
    Lk = memory.shape[1]
    dh = d // nhead
    x2 = x.reshape(B * Lq, d)
    m2 = memory.reshape(B * Lk, d)
    q = _split_heads(matmul_bias(x2, p["wq"], p["bq"]), B, Lq, nhead, dh)
    kv = matmul_bias(m2, p["wkv"], p["bkv"]).reshape(B, Lk, 2, nhead, dh)
    k = jnp.transpose(kv[:, :, 0], (0, 2, 1, 3))
    v = jnp.transpose(kv[:, :, 1], (0, 2, 1, 3))
    a = flash_attention(q, k, v, mask)
    a2 = jnp.transpose(a, (0, 2, 1, 3)).reshape(B * Lq, d)
    y2 = matmul_bias_res_ln(a2, p["wo"], p["bo"], x2, ln_g, ln_b)
    return y2.reshape(B, Lq, d)


def ffn_block(x, p, ln_g, ln_b):
    """LN(x + FFN(x)) — single fused pallas_call (dff tiled)."""
    B, L, d = x.shape
    y2 = ffn_res_ln(x.reshape(B * L, d), p["w1"], p["b1"], p["w2"], p["b2"],
                    ln_g, ln_b)
    return y2.reshape(B, L, d)


def encoder_layer_fwd(x, src_mask, p, nhead):
    x = attn_block_self(x, src_mask, p["self_attn"], p["ln1_g"], p["ln1_b"], nhead)
    x = ffn_block(x, p, p["ln2_g"], p["ln2_b"])
    return x


def decoder_layer_fwd(x, memory, tgt_mask, mem_mask, p, nhead):
    x = attn_block_self(x, tgt_mask, p["self_attn"], p["ln1_g"], p["ln1_b"], nhead)
    x = attn_block_cross(x, memory, mem_mask, p["cross_attn"],
                         p["ln2_g"], p["ln2_b"], nhead)
    x = ffn_block(x, p, p["ln3_g"], p["ln3_b"])
    return x


def _prep_mask(mask):
    # 0/1 mask carried in bf16 (half the HBM traffic of an fp32 additive mask);
    # the select happens in-kernel on the VPU.
    return None if mask is None else mask.astype(jnp.bfloat16)


def transformer_forward(params, src, tgt, src_mask, tgt_mask, memory_mask, nhead):
    src_m = _prep_mask(src_mask)
    tgt_m = _prep_mask(tgt_mask)
    mem_m = _prep_mask(memory_mask)

    memory = src.astype(jnp.bfloat16)
    for p in params["encoder"]:
        memory = encoder_layer_fwd(memory, src_m, p, nhead)

    out = tgt.astype(jnp.bfloat16)
    for p in params["decoder"]:
        out = decoder_layer_fwd(out, memory, tgt_m, mem_m, p, nhead)
    return out.astype(jnp.float32)


# ----------------------------------------------------------------------------
# Deterministic parameter initialization (matmul weights stored bf16,
# biases / LayerNorm params fp32)
# ----------------------------------------------------------------------------
def _init_self_attn(key, d):
    ks = jax.random.split(key, 4)
    std = 0.02
    wq, wk, wv, wo = (std * jax.random.normal(k, (d, d), jnp.float32) for k in ks)
    return {
        "wqkv": jnp.concatenate([wq, wk, wv], axis=1).astype(jnp.bfloat16),
        "bqkv": jnp.zeros((1, 3 * d), jnp.float32),
        "wo": wo.astype(jnp.bfloat16),
        "bo": jnp.zeros((1, d), jnp.float32),
    }


def _init_cross_attn(key, d):
    ks = jax.random.split(key, 4)
    std = 0.02
    wq, wk, wv, wo = (std * jax.random.normal(k, (d, d), jnp.float32) for k in ks)
    return {
        "wq": wq.astype(jnp.bfloat16),
        "bq": jnp.zeros((1, d), jnp.float32),
        "wkv": jnp.concatenate([wk, wv], axis=1).astype(jnp.bfloat16),
        "bkv": jnp.zeros((1, 2 * d), jnp.float32),
        "wo": wo.astype(jnp.bfloat16),
        "bo": jnp.zeros((1, d), jnp.float32),
    }


def _init_ffn_ln(key, d, dff, n_ln):
    ks = jax.random.split(key, 2)
    std = 0.02
    p = {
        "w1": (std * jax.random.normal(ks[0], (d, dff), jnp.float32)).astype(jnp.bfloat16),
        "b1": jnp.zeros((1, dff), jnp.float32),
        "w2": (std * jax.random.normal(ks[1], (dff, d), jnp.float32)).astype(jnp.bfloat16),
        "b2": jnp.zeros((1, d), jnp.float32),
    }
    for i in range(1, n_ln + 1):
        p[f"ln{i}_g"] = jnp.ones((1, d), jnp.float32)
        p[f"ln{i}_b"] = jnp.zeros((1, d), jnp.float32)
    return p


def _init_encoder_layer(key, d, dff):
    ks = jax.random.split(key, 2)
    p = {"self_attn": _init_self_attn(ks[0], d)}
    p.update(_init_ffn_ln(ks[1], d, dff, n_ln=2))
    return p


def _init_decoder_layer(key, d, dff):
    ks = jax.random.split(key, 3)
    p = {"self_attn": _init_self_attn(ks[0], d),
         "cross_attn": _init_cross_attn(ks[1], d)}
    p.update(_init_ffn_ln(ks[2], d, dff, n_ln=3))
    return p


def init_transformer_params(key, d_model, dff, n_enc, n_dec):
    keys = jax.random.split(key, n_enc + n_dec)
    enc = [_init_encoder_layer(keys[i], d_model, dff) for i in range(n_enc)]
    dec = [_init_decoder_layer(keys[n_enc + i], d_model, dff) for i in range(n_dec)]
    return {"encoder": enc, "decoder": dec}


# ----------------------------------------------------------------------------
if __name__ == "__main__":
    B = 2
    L_SRC = 8          # lz
    L_TGT = 8          # lx
    D_MODEL = 32
    NHEAD = 4
    DFF = 64
    N_ENC = 2
    N_DEC = 2

    root = jax.random.PRNGKey(0)
    k_params, k_src, k_tgt = jax.random.split(root, 3)

    params = init_transformer_params(k_params, D_MODEL, DFF, N_ENC, N_DEC)

    src = jax.random.normal(k_src, (B, L_SRC, D_MODEL), jnp.float32)
    tgt = jax.random.normal(k_tgt, (B, L_TGT, D_MODEL), jnp.float32)

    # Masks (zero == masked): src/memory masks omitted (None -> mask-free kernel),
    # tgt_mask = causal lower-triangular.
    src_mask = None
    tgt_mask = jnp.tril(jnp.ones((L_TGT, L_TGT), jnp.float32))
    memory_mask = None

    fwd = jax.jit(functools.partial(transformer_forward, nhead=NHEAD))
    out = fwd(params, src, tgt, src_mask, tgt_mask, memory_mask)
    out = jax.block_until_ready(out)

    assert out.shape == (B, L_TGT, D_MODEL)
    assert bool(jnp.all(jnp.isfinite(out)))
    print("KERNEL_OK")
</pallas_src>

<mosaic_0001>
module attributes {stable_mosaic.version = 11 : i64} {
  func.func @_matmul_bias_kernel(%arg0: i32, %arg1: i32, %arg2: i32, %arg3: memref<16x32xbf16, #tpu.memory_space<vmem>>, %arg4: memref<32x96xbf16, #tpu.memory_space<vmem>>, %arg5: memref<1x96xf32, #tpu.memory_space<vmem>>, %arg6: memref<16x96xbf16, #tpu.memory_space<vmem>>, %arg7: memref<16x96xf32, #tpu.memory_space<vmem>>) attributes {dimension_semantics = [#tpu.dimension_semantics<parallel>, #tpu.dimension_semantics<parallel>, #tpu.dimension_semantics<arbitrary>], iteration_bounds = array<i64: 1, 1, 1>, scalar_prefetch = 0 : i64, scratch_operands = 1 : i64, tpu.core_type = #tpu.core_type<tc>, window_params = [{transform_indices = @transform_0, window_bounds = array<i64: 16, 32>}, {transform_indices = @transform_1, window_bounds = array<i64: 32, 96>}, {transform_indices = @transform_2, window_bounds = array<i64: 1, 96>}, {transform_indices = @transform_3, window_bounds = array<i64: 16, 96>}]} {
    %c0_i32 = arith.constant 0 : i32
    %0 = arith.cmpi eq, %arg2, %c0_i32 : i32
    %1 = arith.extui %0 : i1 to i32
    %c0_i32_0 = arith.constant 0 : i32
    %2 = arith.cmpi ne, %1, %c0_i32_0 : i32
    scf.if %2 {
      %cst_10 = arith.constant 0.000000e+00 : f32
      %12 = vector.broadcast %cst_10 : f32 to vector<16x96xf32>
      %c0_11 = arith.constant 0 : index
      %c0_12 = arith.constant 0 : index
      %13 = vector.load %arg7[%c0_11, %c0_12] : memref<16x96xf32, #tpu.memory_space<vmem>>, vector<16x96xf32>
      tpu.vector_store %arg7[%c0_11, %c0_12], %12 {strides = array<i32>} : memref<16x96xf32, #tpu.memory_space<vmem>>, vector<16x96xf32>,
    } else {
    }
    %c0 = arith.constant 0 : index
    %c0_1 = arith.constant 0 : index
    %3 = vector.load %arg7[%c0, %c0_1] : memref<16x96xf32, #tpu.memory_space<vmem>>, vector<16x96xf32>
    %c0_2 = arith.constant 0 : index
    %c0_3 = arith.constant 0 : index
    %4 = vector.load %arg3[%c0_2, %c0_3] : memref<16x32xbf16, #tpu.memory_space<vmem>>, vector<16x32xbf16>
    %c0_4 = arith.constant 0 : index
    %c0_5 = arith.constant 0 : index
    %5 = vector.load %arg4[%c0_4, %c0_5] : memref<32x96xbf16, #tpu.memory_space<vmem>>, vector<32x96xbf16>
    %cst = arith.constant dense<0.000000e+00> : vector<16x96xf32>
    %6 = tpu.matmul %4, %5, %cst {dimension_numbers = #tpu.dot_dimension_numbers<[1], [0], [0], [1], [0, 0, 1, 1], [], []>} : vector<16x32xbf16>, vector<32x96xbf16>, vector<16x96xf32> -> vector<16x96xf32>
    %7 = arith.addf %3, %6 : vector<16x96xf32>
    %c0_6 = arith.constant 0 : index
    %c0_7 = arith.constant 0 : index
    %8 = vector.load %arg7[%c0_6, %c0_7] : memref<16x96xf32, #tpu.memory_space<vmem>>, vector<16x96xf32>
    tpu.vector_store %arg7[%c0_6, %c0_7], %7 {strides = array<i32>} : memref<16x96xf32, #tpu.memory_space<vmem>>, vector<16x96xf32>,
    %c0_i32_8 = arith.constant 0 : i32
    %9 = arith.cmpi eq, %arg2, %c0_i32_8 : i32
    %10 = arith.extui %9 : i1 to i32
    %c0_i32_9 = arith.constant 0 : i32
    %11 = arith.cmpi ne, %10, %c0_i32_9 : i32
    scf.if %11 {
      %c0_10 = arith.constant 0 : index
      %c0_11 = arith.constant 0 : index
      %12 = vector.load %arg7[%c0_10, %c0_11] : memref<16x96xf32, #tpu.memory_space<vmem>>, vector<16x96xf32>
      %c0_12 = arith.constant 0 : index
      %c0_13 = arith.constant 0 : index
      %13 = vector.load %arg5[%c0_12, %c0_13] : memref<1x96xf32, #tpu.memory_space<vmem>>, vector<1x96xf32>
      %14 = vector.broadcast %13 : vector<1x96xf32> to vector<16x96xf32>
      %15 = arith.addf %12, %14 : vector<16x96xf32>
      %16 = arith.truncf %15 : vector<16x96xf32> to vector<16x96xbf16>
      %c0_14 = arith.constant 0 : index
      %c0_15 = arith.constant 0 : index
      %17 = vector.load %arg6[%c0_14, %c0_15] : memref<16x96xbf16, #tpu.memory_space<vmem>>, vector<16x96xbf16>
      tpu.vector_store %arg6[%c0_14, %c0_15], %16 {strides = array<i32>} : memref<16x96xbf16, #tpu.memory_space<vmem>>, vector<16x96xbf16>,
    } else {
    }
    return
  }
  func.func @transform_0(%arg0: i32, %arg1: i32, %arg2: i32) -> (i32, i32) {
    %c0_i32 = arith.constant 0 : i32
    return %arg0, %arg2 : i32, i32
  }
  func.func @transform_1(%arg0: i32, %arg1: i32, %arg2: i32) -> (i32, i32) {
    %c0_i32 = arith.constant 0 : i32
    return %arg2, %arg1 : i32, i32
  }
  func.func @transform_2(%arg0: i32, %arg1: i32, %arg2: i32) -> (i32, i32) {
    %c0_i32 = arith.constant 0 : i32
    %c0_i32_0 = arith.constant 0 : i32
    return %c0_i32, %arg1 : i32, i32
  }
  func.func @transform_3(%arg0: i32, %arg1: i32, %arg2: i32) -> (i32, i32) {
    %c0_i32 = arith.constant 0 : i32
    return %arg0, %arg1 : i32, i32
  }
}

module attributes {stable_mosaic.version = 11 : i64} {
  func.func @kernel(%arg0: i32, %arg1: i32, %arg2: i32, %arg3: i32, %arg4: memref<1x1x8x8xbf16, #tpu.memory_space<vmem>>, %arg5: memref<1x1x8x8xbf16, #tpu.memory_space<vmem>>, %arg6: memref<1x1x8x8xbf16, #tpu.memory_space<vmem>>, %arg7: memref<8x8xbf16, #tpu.memory_space<vmem>>, %arg8: memref<1x1x8x8xbf16, #tpu.memory_space<vmem>>, %arg9: memref<8x1xf32, #tpu.memory_space<vmem>>, %arg10: memref<8x1xf32, #tpu.memory_space<vmem>>, %arg11: memref<8x8xf32, #tpu.memory_space<vmem>>) attributes {dimension_semantics = [#tpu.dimension_semantics<parallel>, #tpu.dimension_semantics<parallel>, #tpu.dimension_semantics<parallel>, #tpu.dimension_semantics<arbitrary>], iteration_bounds = array<i64: 2, 4, 1, 1>, scalar_prefetch = 0 : i64, scratch_operands = 3 : i64, tpu.core_type = #tpu.core_type<tc>, window_params = [{transform_indices = @transform_0, window_bounds = array<i64: 1, 1, 8, 8>}, {transform_indices = @transform_1, window_bounds = array<i64: 1, 1, 8, 8>}, {transform_indices = @transform_2, window_bounds = array<i64: 1, 1, 8, 8>}, {transform_indices = @transform_3, window_bounds = array<i64: 8, 8>}, {transform_indices = @transform_4, window_bounds = array<i64: 1, 1, 8, 8>}]} {
    %c0_i32 = arith.constant 0 : i32
    %0 = arith.cmpi eq, %arg3, %c0_i32 : i32
    %1 = arith.extui %0 : i1 to i32
    %c0_i32_0 = arith.constant 0 : i32
    %2 = arith.cmpi ne, %1, %c0_i32_0 : i32
    scf.if %2 {
      %cst_34 = arith.constant -1.000000e+30 : f32
      %43 = vector.broadcast %cst_34 : f32 to vector<8x1xf32>
      %c0_35 = arith.constant 0 : index
      %c0_36 = arith.constant 0 : index
      %44 = vector.load %arg9[%c0_35, %c0_36] : memref<8x1xf32, #tpu.memory_space<vmem>>, vector<8x1xf32>
      tpu.vector_store %arg9[%c0_35, %c0_36], %43 {strides = array<i32>} : memref<8x1xf32, #tpu.memory_space<vmem>>, vector<8x1xf32>,
      %cst_37 = arith.constant 0.000000e+00 : f32
      %45 = vector.broadcast %cst_37 : f32 to vector<8x1xf32>
      %c0_38 = arith.constant 0 : index
      %c0_39 = arith.constant 0 : index
      %46 = vector.load %arg10[%c0_38, %c0_39] : memref<8x1xf32, #tpu.memory_space<vmem>>, vector<8x1xf32>
      tpu.vector_store %arg10[%c0_38, %c0_39], %45 {strides = array<i32>} : memref<8x1xf32, #tpu.memory_space<vmem>>, vector<8x1xf32>,
      %cst_40 = arith.constant 0.000000e+00 : f32
      %47 = vector.broadcast %cst_40 : f32 to vector<8x8xf32>
      %c0_41 = arith.constant 0 : index
      %c0_42 = arith.constant 0 : index
      %48 = vector.load %arg11[%c0_41, %c0_42] : memref<8x8xf32, #tpu.memory_space<vmem>>, vector<8x8xf32>
      tpu.vector_store %arg11[%c0_41, %c0_42], %47 {strides = array<i32>} : memref<8x8xf32, #tpu.memory_space<vmem>>, vector<8x8xf32>,
    } else {
    }
    %c0 = arith.constant 0 : index
    %c0_1 = arith.constant 0 : index
    %c0_2 = arith.constant 0 : index
    %c0_3 = arith.constant 0 : index
    %3 = vector.load %arg4[%c0, %c0_1, %c0_2, %c0_3] : memref<1x1x8x8xbf16, #tpu.memory_space<vmem>>, vector<1x1x8x8xbf16>
    %4 = vector.shape_cast %3 : vector<1x1x8x8xbf16> to vector<8x8xbf16>
    %c0_4 = arith.constant 0 : index
    %c0_5 = arith.constant 0 : index
    %c0_6 = arith.constant 0 : index
    %c0_7 = arith.constant 0 : index
    %5 = vector.load %arg5[%c0_4, %c0_5, %c0_6, %c0_7] : memref<1x1x8x8xbf16, #tpu.memory_space<vmem>>, vector<1x1x8x8xbf16>
    %6 = vector.shape_cast %5 : vector<1x1x8x8xbf16> to vector<8x8xbf16>
    %cst = arith.constant dense<0.000000e+00> : vector<8x8xf32>
    %7 = tpu.matmul %4, %6, %cst {dimension_numbers = #tpu.dot_dimension_numbers<[1], [1], [0], [0], [0, 0, 1, 0], [], []>} : vector<8x8xbf16>, vector<8x8xbf16>, vector<8x8xf32> -> vector<8x8xf32>
    %cst_8 = arith.constant 0.353553385 : f32
    %8 = vector.broadcast %cst_8 : f32 to vector<8x8xf32>
    %9 = arith.mulf %7, %8 : vector<8x8xf32>
    %c0_9 = arith.constant 0 : index
    %c0_10 = arith.constant 0 : index
    %10 = vector.load %arg7[%c0_9, %c0_10] : memref<8x8xbf16, #tpu.memory_space<vmem>>, vector<8x8xbf16>
    %cst_11 = arith.constant 0.000000e+00 : bf16
    %11 = vector.broadcast %cst_11 : bf16 to vector<8x8xbf16>
    %12 = arith.cmpf ogt, %10, %11 : vector<8x8xbf16>
    %cst_12 = arith.constant -1.000000e+09 : f32
    %13 = vector.broadcast %cst_12 : f32 to vector<8x8xf32>
    %14 = arith.select %12, %9, %13 : vector<8x8xi1>, vector<8x8xf32>
    %c0_13 = arith.constant 0 : index
    %c0_14 = arith.constant 0 : index
    %15 = vector.load %arg9[%c0_13, %c0_14] : memref<8x1xf32, #tpu.memory_space<vmem>>, vector<8x1xf32>
    %cst_15 = arith.constant dense<0xFF800000> : vector<8xf32>
    %16 = vector.multi_reduction <maximumf>, %14, %cst_15 [1] : vector<8x8xf32> to vector<8xf32>
    %17 = vector.shape_cast %16 : vector<8xf32> to vector<8x1xf32>
    %18 = arith.maximumf %15, %17 : vector<8x1xf32>
    %19 = arith.subf %15, %18 : vector<8x1xf32>
    %20 = math.exp %19 : vector<8x1xf32>
    %21 = vector.broadcast %18 : vector<8x1xf32> to vector<8x8xf32>
    %22 = arith.subf %14, %21 : vector<8x8xf32>
    %23 = math.exp %22 : vector<8x8xf32>
    %c0_16 = arith.constant 0 : index
    %c0_17 = arith.constant 0 : index
    %24 = vector.load %arg10[%c0_16, %c0_17] : memref<8x1xf32, #tpu.memory_space<vmem>>, vector<8x1xf32>
    %25 = arith.mulf %20, %24 : vector<8x1xf32>
    %cst_18 = arith.constant dense<0.000000e+00> : vector<8xf32>
    %26 = vector.multi_reduction <add>, %23, %cst_18 [1] : vector<8x8xf32> to vector<8xf32>
    %27 = vector.shape_cast %26 : vector<8xf32> to vector<8x1xf32>
    %28 = arith.addf %25, %27 : vector<8x1xf32>
    %c0_19 = arith.constant 0 : index
    %c0_20 = arith.constant 0 : index
    %29 = vector.load %arg10[%c0_19, %c0_20] : memref<8x1xf32, #tpu.memory_space<vmem>>, vector<8x1xf32>
    tpu.vector_store %arg10[%c0_19, %c0_20], %28 {strides = array<i32>} : memref<8x1xf32, #tpu.memory_space<vmem>>, vector<8x1xf32>,
    %c0_21 = arith.constant 0 : index
    %c0_22 = arith.constant 0 : index
    %30 = vector.load %arg11[%c0_21, %c0_22] : memref<8x8xf32, #tpu.memory_space<vmem>>, vector<8x8xf32>
    %31 = vector.broadcast %20 : vector<8x1xf32> to vector<8x8xf32>
    %32 = arith.mulf %31, %30 : vector<8x8xf32>
    %33 = arith.truncf %23 : vector<8x8xf32> to vector<8x8xbf16>
    %c0_23 = arith.constant 0 : index
    %c0_24 = arith.constant 0 : index
    %c0_25 = arith.constant 0 : index
    %c0_26 = arith.constant 0 : index
    %34 = vector.load %arg6[%c0_23, %c0_24, %c0_25, %c0_26] : memref<1x1x8x8xbf16, #tpu.memory_space<vmem>>, vector<1x1x8x8xbf16>
    %35 = vector.shape_cast %34 : vector<1x1x8x8xbf16> to vector<8x8xbf16>
    %cst_27 = arith.constant dense<0.000000e+00> : vector<8x8xf32>
    %36 = tpu.matmul %33, %35, %cst_27 {dimension_numbers = #tpu.dot_dimension_numbers<[1], [0], [0], [1], [0, 0, 1, 1], [], []>} : vector<8x8xbf16>, vector<8x8xbf16>, vector<8x8xf32> -> vector<8x8xf32>
    %37 = arith.addf %32, %36 : vector<8x8xf32>
    %c0_28 = arith.constant 0 : index
    %c0_29 = arith.constant 0 : index
    %38 = vector.load %arg11[%c0_28, %c0_29] : memref<8x8xf32, #tpu.memory_space<vmem>>, vector<8x8xf32>
    tpu.vector_store %arg11[%c0_28, %c0_29], %37 {strides = array<i32>} : memref<8x8xf32, #tpu.memory_space<vmem>>, vector<8x8xf32>,
    %c0_30 = arith.constant 0 : index
    %c0_31 = arith.constant 0 : index
    %39 = vector.load %arg9[%c0_30, %c0_31] : memref<8x1xf32, #tpu.memory_space<vmem>>, vector<8x1xf32>
    tpu.vector_store %arg9[%c0_30, %c0_31], %18 {strides = array<i32>} : memref<8x1xf32, #tpu.memory_space<vmem>>, vector<8x1xf32>,
    %c0_i32_32 = arith.constant 0 : i32
    %40 = arith.cmpi eq, %arg3, %c0_i32_32 : i32
    %41 = arith.extui %40 : i1 to i32
    %c0_i32_33 = arith.constant 0 : i32
    %42 = arith.cmpi ne, %41, %c0_i32_33 : i32
    scf.if %42 {
      %c0_34 = arith.constant 0 : index
      %c0_35 = arith.constant 0 : index
      %43 = vector.load %arg11[%c0_34, %c0_35] : memref<8x8xf32, #tpu.memory_space<vmem>>, vector<8x8xf32>
      %c0_36 = arith.constant 0 : index
      %c0_37 = arith.constant 0 : index
      %44 = vector.load %arg10[%c0_36, %c0_37] : memref<8x1xf32, #tpu.memory_space<vmem>>, vector<8x1xf32>
      %45 = tpu.reciprocal %44 {approx = true} : vector<8x1xf32> -> vector<8x1xf32>
      %46 = vector.broadcast %45 : vector<8x1xf32> to vector<8x8xf32>
      %47 = arith.mulf %43, %46 : vector<8x8xf32>
      %48 = arith.truncf %47 : vector<8x8xf32> to vector<8x8xbf16>
      %c0_38 = arith.constant 0 : index
      %c0_39 = arith.constant 0 : index
      %c0_40 = arith.constant 0 : index
      %c0_41 = arith.constant 0 : index
      %49 = vector.load %arg8[%c0_38, %c0_39, %c0_40, %c0_41] : memref<1x1x8x8xbf16, #tpu.memory_space<vmem>>, vector<1x1x8x8xbf16>
      %50 = vector.shape_cast %49 : vector<1x1x8x8xbf16> to vector<8x8xbf16>
      %51 = vector.shape_cast %48 : vector<8x8xbf16> to vector<1x1x8x8xbf16>
      tpu.vector_store %arg8[%c0_38, %c0_39, %c0_40, %c0_41], %51 {strides = array<i32>} : memref<1x1x8x8xbf16, #tpu.memory_space<vmem>>, vector<1x1x8x8xbf16>,
    } else {
    }
    return
  }
  func.func @transform_0(%arg0: i32, %arg1: i32, %arg2: i32, %arg3: i32) -> (i32, i32, i32, i32) {
    %c0_i32 = arith.constant 0 : i32
    %c0_i32_0 = arith.constant 0 : i32
    return %arg0, %arg1, %arg2, %c0_i32 : i32, i32, i32, i32
  }
  func.func @transform_1(%arg0: i32, %arg1: i32, %arg2: i32, %arg3: i32) -> (i32, i32, i32, i32) {
    %c0_i32 = arith.constant 0 : i32
    %c0_i32_0 = arith.constant 0 : i32
    return %arg0, %arg1, %arg3, %c0_i32 : i32, i32, i32, i32
  }
  func.func @transform_2(%arg0: i32, %arg1: i32, %arg2: i32, %arg3: i32) -> (i32, i32, i32, i32) {
    %c0_i32 = arith.constant 0 : i32
    %c0_i32_0 = arith.constant 0 : i32
    return %arg0, %arg1, %arg3, %c0_i32 : i32, i32, i32, i32
  }
  func.func @transform_3(%arg0: i32, %arg1: i32, %arg2: i32, %arg3: i32) -> (i32, i32) {
    %c0_i32 = arith.constant 0 : i32
    return %arg2, %arg3 : i32, i32
  }
  func.func @transform_4(%arg0: i32, %arg1: i32, %arg2: i32, %arg3: i32) -> (i32, i32, i32, i32) {
    %c0_i32 = arith.constant 0 : i32
    %c0_i32_0 = arith.constant 0 : i32
    return %arg0, %arg1, %arg2, %c0_i32 : i32, i32, i32, i32
  }
}

module attributes {stable_mosaic.version = 11 : i64} {
  func.func @_matmul_bias_kernel(%arg0: i32, %arg1: i32, %arg2: i32, %arg3: memref<16x32xbf16, #tpu.memory_space<vmem>>, %arg4: memref<32x32xbf16, #tpu.memory_space<vmem>>, %arg5: memref<1x32xf32, #tpu.memory_space<vmem>>, %arg6: memref<16x32xbf16, #tpu.memory_space<vmem>>, %arg7: memref<16x32xf32, #tpu.memory_space<vmem>>) attributes {dimension_semantics = [#tpu.dimension_semantics<parallel>, #tpu.dimension_semantics<parallel>, #tpu.dimension_semantics<arbitrary>], iteration_bounds = array<i64: 1, 1, 1>, scalar_prefetch = 0 : i64, scratch_operands = 1 : i64, tpu.core_type = #tpu.core_type<tc>, window_params = [{transform_indices = @transform_0, window_bounds = array<i64: 16, 32>}, {transform_indices = @transform_1, window_bounds = array<i64: 32, 32>}, {transform_indices = @transform_2, window_bounds = array<i64: 1, 32>}, {transform_indices = @transform_3, window_bounds = array<i64: 16, 32>}]} {
    %c0_i32 = arith.constant 0 : i32
    %0 = arith.cmpi eq, %arg2, %c0_i32 : i32
    %1 = arith.extui %0 : i1 to i32
    %c0_i32_0 = arith.constant 0 : i32
    %2 = arith.cmpi ne, %1, %c0_i32_0 : i32
    scf.if %2 {
      %cst_10 = arith.constant 0.000000e+00 : f32
      %12 = vector.broadcast %cst_10 : f32 to vector<16x32xf32>
      %c0_11 = arith.constant 0 : index
      %c0_12 = arith.constant 0 : index
      %13 = vector.load %arg7[%c0_11, %c0_12] : memref<16x32xf32, #tpu.memory_space<vmem>>, vector<16x32xf32>
      tpu.vector_store %arg7[%c0_11, %c0_12], %12 {strides = array<i32>} : memref<16x32xf32, #tpu.memory_space<vmem>>, vector<16x32xf32>,
    } else {
    }
    %c0 = arith.constant 0 : index
    %c0_1 = arith.constant 0 : index
    %3 = vector.load %arg7[%c0, %c0_1] : memref<16x32xf32, #tpu.memory_space<vmem>>, vector<16x32xf32>
    %c0_2 = arith.constant 0 : index
    %c0_3 = arith.constant 0 : index
    %4 = vector.load %arg3[%c0_2, %c0_3] : memref<16x32xbf16, #tpu.memory_space<vmem>>, vector<16x32xbf16>
    %c0_4 = arith.constant 0 : index
    %c0_5 = arith.constant 0 : index
    %5 = vector.load %arg4[%c0_4, %c0_5] : memref<32x32xbf16, #tpu.memory_space<vmem>>, vector<32x32xbf16>
    %cst = arith.constant dense<0.000000e+00> : vector<16x32xf32>
    %6 = tpu.matmul %4, %5, %cst {dimension_numbers = #tpu.dot_dimension_numbers<[1], [0], [0], [1], [0, 0, 1, 1], [], []>} : vector<16x32xbf16>, vector<32x32xbf16>, vector<16x32xf32> -> vector<16x32xf32>
    %7 = arith.addf %3, %6 : vector<16x32xf32>
    %c0_6 = arith.constant 0 : index
    %c0_7 = arith.constant 0 : index
    %8 = vector.load %arg7[%c0_6, %c0_7] : memref<16x32xf32, #tpu.memory_space<vmem>>, vector<16x32xf32>
    tpu.vector_store %arg7[%c0_6, %c0_7], %7 {strides = array<i32>} : memref<16x32xf32, #tpu.memory_space<vmem>>, vector<16x32xf32>,
    %c0_i32_8 = arith.constant 0 : i32
    %9 = arith.cmpi eq, %arg2, %c0_i32_8 : i32
    %10 = arith.extui %9 : i1 to i32
    %c0_i32_9 = arith.constant 0 : i32
    %11 = arith.cmpi ne, %10, %c0_i32_9 : i32
    scf.if %11 {
      %c0_10 = arith.constant 0 : index
      %c0_11 = arith.constant 0 : index
      %12 = vector.load %arg7[%c0_10, %c0_11] : memref<16x32xf32, #tpu.memory_space<vmem>>, vector<16x32xf32>
      %c0_12 = arith.constant 0 : index
      %c0_13 = arith.constant 0 : index
      %13 = vector.load %arg5[%c0_12, %c0_13] : memref<1x32xf32, #tpu.memory_space<vmem>>, vector<1x32xf32>
      %14 = vector.broadcast %13 : vector<1x32xf32> to vector<16x32xf32>
      %15 = arith.addf %12, %14 : vector<16x32xf32>
      %16 = arith.truncf %15 : vector<16x32xf32> to vector<16x32xbf16>
      %c0_14 = arith.constant 0 : index
      %c0_15 = arith.constant 0 : index
      %17 = vector.load %arg6[%c0_14, %c0_15] : memref<16x32xbf16, #tpu.memory_space<vmem>>, vector<16x32xbf16>
      tpu.vector_store %arg6[%c0_14, %c0_15], %16 {strides = array<i32>} : memref<16x32xbf16, #tpu.memory_space<vmem>>, vector<16x32xbf16>,
    } else {
    }
    return
  }
  func.func @transform_0(%arg0: i32, %arg1: i32, %arg2: i32) -> (i32, i32) {
    %c0_i32 = arith.constant 0 : i32
    return %arg0, %arg2 : i32, i32
  }
  func.func @transform_1(%arg0: i32, %arg1: i32, %arg2: i32) -> (i32, i32) {
    %c0_i32 = arith.constant 0 : i32
    return %arg2, %arg1 : i32, i32
  }
  func.func @transform_2(%arg0: i32, %arg1: i32, %arg2: i32) -> (i32, i32) {
    %c0_i32 = arith.constant 0 : i32
    %c0_i32_0 = arith.constant 0 : i32
    return %c0_i32, %arg1 : i32, i32
  }
  func.func @transform_3(%arg0: i32, %arg1: i32, %arg2: i32) -> (i32, i32) {
    %c0_i32 = arith.constant 0 : i32
    return %arg0, %arg1 : i32, i32
  }
}

module attributes {stable_mosaic.version = 11 : i64} {
  func.func @_matmul_bias_res_ln_kernel(%arg0: i32, %arg1: i32, %arg2: memref<16x32xbf16, #tpu.memory_space<vmem>>, %arg3: memref<32x32xbf16, #tpu.memory_space<vmem>>, %arg4: memref<1x32xf32, #tpu.memory_space<vmem>>, %arg5: memref<16x32xbf16, #tpu.memory_space<vmem>>, %arg6: memref<1x32xf32, #tpu.memory_space<vmem>>, %arg7: memref<1x32xf32, #tpu.memory_space<vmem>>, %arg8: memref<16x32xbf16, #tpu.memory_space<vmem>>, %arg9: memref<16x32xf32, #tpu.memory_space<vmem>>) attributes {dimension_semantics = [#tpu.dimension_semantics<parallel>, #tpu.dimension_semantics<arbitrary>], iteration_bounds = array<i64: 1, 1>, scalar_prefetch = 0 : i64, scratch_operands = 1 : i64, tpu.core_type = #tpu.core_type<tc>, window_params = [{transform_indices = @transform_0, window_bounds = array<i64: 16, 32>}, {transform_indices = @transform_1, window_bounds = array<i64: 32, 32>}, {pipeline_mode = #tpu.pipeline_mode<synchronous>, transform_indices = @transform_2, window_bounds = array<i64: 1, 32>}, {transform_indices = @transform_3, window_bounds = array<i64: 16, 32>}, {pipeline_mode = #tpu.pipeline_mode<synchronous>, transform_indices = @transform_4, window_bounds = array<i64: 1, 32>}, {pipeline_mode = #tpu.pipeline_mode<synchronous>, transform_indices = @transform_5, window_bounds = array<i64: 1, 32>}, {transform_indices = @transform_6, window_bounds = array<i64: 16, 32>}]} {
    %c0_i32 = arith.constant 0 : i32
    %0 = arith.cmpi eq, %arg1, %c0_i32 : i32
    %1 = arith.extui %0 : i1 to i32
    %c0_i32_0 = arith.constant 0 : i32
    %2 = arith.cmpi ne, %1, %c0_i32_0 : i32
    scf.if %2 {
      %cst_10 = arith.constant 0.000000e+00 : f32
      %12 = vector.broadcast %cst_10 : f32 to vector<16x32xf32>
      %c0_11 = arith.constant 0 : index
      %c0_12 = arith.constant 0 : index
      %13 = vector.load %arg9[%c0_11, %c0_12] : memref<16x32xf32, #tpu.memory_space<vmem>>, vector<16x32xf32>
      tpu.vector_store %arg9[%c0_11, %c0_12], %12 {strides = array<i32>} : memref<16x32xf32, #tpu.memory_space<vmem>>, vector<16x32xf32>,
    } else {
    }
    %c0 = arith.constant 0 : index
    %c0_1 = arith.constant 0 : index
    %3 = vector.load %arg9[%c0, %c0_1] : memref<16x32xf32, #tpu.memory_space<vmem>>, vector<16x32xf32>
    %c0_2 = arith.constant 0 : index
    %c0_3 = arith.constant 0 : index
    %4 = vector.load %arg2[%c0_2, %c0_3] : memref<16x32xbf16, #tpu.memory_space<vmem>>, vector<16x32xbf16>
    %c0_4 = arith.constant 0 : index
    %c0_5 = arith.constant 0 : index
    %5 = vector.load %arg3[%c0_4, %c0_5] : memref<32x32xbf16, #tpu.memory_space<vmem>>, vector<32x32xbf16>
    %cst = arith.constant dense<0.000000e+00> : vector<16x32xf32>
    %6 = tpu.matmul %4, %5, %cst {dimension_numbers = #tpu.dot_dimension_numbers<[1], [0], [0], [1], [0, 0, 1, 1], [], []>} : vector<16x32xbf16>, vector<32x32xbf16>, vector<16x32xf32> -> vector<16x32xf32>
    %7 = arith.addf %3, %6 : vector<16x32xf32>
    %c0_6 = arith.constant 0 : index
    %c0_7 = arith.constant 0 : index
    %8 = vector.load %arg9[%c0_6, %c0_7] : memref<16x32xf32, #tpu.memory_space<vmem>>, vector<16x32xf32>
    tpu.vector_store %arg9[%c0_6, %c0_7], %7 {strides = array<i32>} : memref<16x32xf32, #tpu.memory_space<vmem>>, vector<16x32xf32>,
    %c0_i32_8 = arith.constant 0 : i32
    %9 = arith.cmpi eq, %arg1, %c0_i32_8 : i32
    %10 = arith.extui %9 : i1 to i32
    %c0_i32_9 = arith.constant 0 : i32
    %11 = arith.cmpi ne, %10, %c0_i32_9 : i32
    scf.if %11 {
      %c0_10 = arith.constant 0 : index
      %c0_11 = arith.constant 0 : index
      %12 = vector.load %arg9[%c0_10, %c0_11] : memref<16x32xf32, #tpu.memory_space<vmem>>, vector<16x32xf32>
      %c0_12 = arith.constant 0 : index
      %c0_13 = arith.constant 0 : index
      %13 = vector.load %arg4[%c0_12, %c0_13] : memref<1x32xf32, #tpu.memory_space<vmem>>, vector<1x32xf32>
      %14 = vector.broadcast %13 : vector<1x32xf32> to vector<16x32xf32>
      %15 = arith.addf %12, %14 : vector<16x32xf32>
      %c0_14 = arith.constant 0 : index
      %c0_15 = arith.constant 0 : index
      %16 = vector.load %arg5[%c0_14, %c0_15] : memref<16x32xbf16, #tpu.memory_space<vmem>>, vector<16x32xbf16>
      %17 = arith.extf %16 : vector<16x32xbf16> to vector<16x32xf32>
      %18 = arith.addf %15, %17 : vector<16x32xf32>
      %cst_16 = arith.constant dense<0.000000e+00> : vector<16xf32>
      %19 = vector.multi_reduction <add>, %18, %cst_16 [1] : vector<16x32xf32> to vector<16xf32>
      %20 = vector.shape_cast %19 : vector<16xf32> to vector<16x1xf32>
      %cst_17 = arith.constant 3.200000e+01 : f32
      %21 = vector.broadcast %cst_17 : f32 to vector<16x1xf32>
      %22 = arith.divf %20, %21 : vector<16x1xf32>
      %23 = vector.broadcast %22 : vector<16x1xf32> to vector<16x32xf32>
      %24 = arith.subf %18, %23 : vector<16x32xf32>
      %25 = arith.mulf %24, %24 : vector<16x32xf32>
      %cst_18 = arith.constant dense<0.000000e+00> : vector<16xf32>
      %26 = vector.multi_reduction <add>, %25, %cst_18 [1] : vector<16x32xf32> to vector<16xf32>
      %27 = vector.shape_cast %26 : vector<16xf32> to vector<16x1xf32>
      %cst_19 = arith.constant 3.200000e+01 : f32
      %28 = vector.broadcast %cst_19 : f32 to vector<16x1xf32>
      %29 = arith.divf %27, %28 : vector<16x1xf32>
      %30 = vector.broadcast %22 : vector<16x1xf32> to vector<16x32xf32>
      %31 = arith.subf %18, %30 : vector<16x32xf32>
      %cst_20 = arith.constant 9.99999974E-6 : f32
      %32 = vector.broadcast %cst_20 : f32 to vector<16x1xf32>
      %33 = arith.addf %29, %32 : vector<16x1xf32>
      %34 = math.rsqrt %33 : vector<16x1xf32>
      %35 = vector.broadcast %34 : vector<16x1xf32> to vector<16x32xf32>
      %36 = arith.mulf %31, %35 : vector<16x32xf32>
      %c0_21 = arith.constant 0 : index
      %c0_22 = arith.constant 0 : index
      %37 = vector.load %arg6[%c0_21, %c0_22] : memref<1x32xf32, #tpu.memory_space<vmem>>, vector<1x32xf32>
      %38 = vector.broadcast %37 : vector<1x32xf32> to vector<16x32xf32>
      %39 = arith.mulf %36, %38 : vector<16x32xf32>
      %c0_23 = arith.constant 0 : index
      %c0_24 = arith.constant 0 : index
      %40 = vector.load %arg7[%c0_23, %c0_24] : memref<1x32xf32, #tpu.memory_space<vmem>>, vector<1x32xf32>
      %41 = vector.broadcast %40 : vector<1x32xf32> to vector<16x32xf32>
      %42 = arith.addf %39, %41 : vector<16x32xf32>
      %43 = arith.truncf %42 : vector<16x32xf32> to vector<16x32xbf16>
      %c0_25 = arith.constant 0 : index
      %c0_26 = arith.constant 0 : index
      %44 = vector.load %arg8[%c0_25, %c0_26] : memref<16x32xbf16, #tpu.memory_space<vmem>>, vector<16x32xbf16>
      tpu.vector_store %arg8[%c0_25, %c0_26], %43 {strides = array<i32>} : memref<16x32xbf16, #tpu.memory_space<vmem>>, vector<16x32xbf16>,
    } else {
    }
    return
  }
  func.func @transform_0(%arg0: i32, %arg1: i32) -> (i32, i32) {
    %c0_i32 = arith.constant 0 : i32
    return %arg0, %arg1 : i32, i32
  }
  func.func @transform_1(%arg0: i32, %arg1: i32) -> (i32, i32) {
    %c0_i32 = arith.constant 0 : i32
    %c0_i32_0 = arith.constant 0 : i32
    return %arg1, %c0_i32 : i32, i32
  }
  func.func @transform_2(%arg0: i32, %arg1: i32) -> (i32, i32) {
    %c0_i32 = arith.constant 0 : i32
    %c0_i32_0 = arith.constant 0 : i32
    %c0_i32_1 = arith.constant 0 : i32
    return %c0_i32, %c0_i32_0 : i32, i32
  }
  func.func @transform_3(%arg0: i32, %arg1: i32) -> (i32, i32) {
    %c0_i32 = arith.constant 0 : i32
    %c0_i32_0 = arith.constant 0 : i32
    return %arg0, %c0_i32 : i32, i32
  }
  func.func @transform_4(%arg0: i32, %arg1: i32) -> (i32, i32) {
    %c0_i32 = arith.constant 0 : i32
    %c0_i32_0 = arith.constant 0 : i32
    %c0_i32_1 = arith.constant 0 : i32
    return %c0_i32, %c0_i32_0 : i32, i32
  }
  func.func @transform_5(%arg0: i32, %arg1: i32) -> (i32, i32) {
    %c0_i32 = arith.constant 0 : i32
    %c0_i32_0 = arith.constant 0 : i32
    %c0_i32_1 = arith.constant 0 : i32
    return %c0_i32, %c0_i32_0 : i32, i32
  }
  func.func @transform_6(%arg0: i32, %arg1: i32) -> (i32, i32) {
    %c0_i32 = arith.constant 0 : i32
    %c0_i32_0 = arith.constant 0 : i32
    return %arg0, %c0_i32 : i32, i32
  }
}

module attributes {stable_mosaic.version = 11 : i64} {
  func.func @kernel(%arg0: i32, %arg1: i32, %arg2: i32, %arg3: i32, %arg4: memref<1x1x8x8xbf16, #tpu.memory_space<vmem>>, %arg5: memref<1x1x8x8xbf16, #tpu.memory_space<vmem>>, %arg6: memref<1x1x8x8xbf16, #tpu.memory_space<vmem>>, %arg7: memref<1x1x8x8xbf16, #tpu.memory_space<vmem>>, %arg8: memref<8x1xf32, #tpu.memory_space<vmem>>, %arg9: memref<8x1xf32, #tpu.memory_space<vmem>>, %arg10: memref<8x8xf32, #tpu.memory_space<vmem>>) attributes {dimension_semantics = [#tpu.dimension_semantics<parallel>, #tpu.dimension_semantics<parallel>, #tpu.dimension_semantics<parallel>, #tpu.dimension_semantics<arbitrary>], iteration_bounds = array<i64: 2, 4, 1, 1>, scalar_prefetch = 0 : i64, scratch_operands = 3 : i64, tpu.core_type = #tpu.core_type<tc>, window_params = [{transform_indices = @transform_0, window_bounds = array<i64: 1, 1, 8, 8>}, {transform_indices = @transform_1, window_bounds = array<i64: 1, 1, 8, 8>}, {transform_indices = @transform_2, window_bounds = array<i64: 1, 1, 8, 8>}, {transform_indices = @transform_3, window_bounds = array<i64: 1, 1, 8, 8>}]} {
    %c0_i32 = arith.constant 0 : i32
    %0 = arith.cmpi eq, %arg3, %c0_i32 : i32
    %1 = arith.extui %0 : i1 to i32
    %c0_i32_0 = arith.constant 0 : i32
    %2 = arith.cmpi ne, %1, %c0_i32_0 : i32
    scf.if %2 {
      %cst_30 = arith.constant -1.000000e+30 : f32
      %38 = vector.broadcast %cst_30 : f32 to vector<8x1xf32>
      %c0_31 = arith.constant 0 : index
      %c0_32 = arith.constant 0 : index
      %39 = vector.load %arg8[%c0_31, %c0_32] : memref<8x1xf32, #tpu.memory_space<vmem>>, vector<8x1xf32>
      tpu.vector_store %arg8[%c0_31, %c0_32], %38 {strides = array<i32>} : memref<8x1xf32, #tpu.memory_space<vmem>>, vector<8x1xf32>,
      %cst_33 = arith.constant 0.000000e+00 : f32
      %40 = vector.broadcast %cst_33 : f32 to vector<8x1xf32>
      %c0_34 = arith.constant 0 : index
      %c0_35 = arith.constant 0 : index
      %41 = vector.load %arg9[%c0_34, %c0_35] : memref<8x1xf32, #tpu.memory_space<vmem>>, vector<8x1xf32>
      tpu.vector_store %arg9[%c0_34, %c0_35], %40 {strides = array<i32>} : memref<8x1xf32, #tpu.memory_space<vmem>>, vector<8x1xf32>,
      %cst_36 = arith.constant 0.000000e+00 : f32
      %42 = vector.broadcast %cst_36 : f32 to vector<8x8xf32>
      %c0_37 = arith.constant 0 : index
      %c0_38 = arith.constant 0 : index
      %43 = vector.load %arg10[%c0_37, %c0_38] : memref<8x8xf32, #tpu.memory_space<vmem>>, vector<8x8xf32>
      tpu.vector_store %arg10[%c0_37, %c0_38], %42 {strides = array<i32>} : memref<8x8xf32, #tpu.memory_space<vmem>>, vector<8x8xf32>,
    } else {
    }
    %c0 = arith.constant 0 : index
    %c0_1 = arith.constant 0 : index
    %c0_2 = arith.constant 0 : index
    %c0_3 = arith.constant 0 : index
    %3 = vector.load %arg4[%c0, %c0_1, %c0_2, %c0_3] : memref<1x1x8x8xbf16, #tpu.memory_space<vmem>>, vector<1x1x8x8xbf16>
    %4 = vector.shape_cast %3 : vector<1x1x8x8xbf16> to vector<8x8xbf16>
    %c0_4 = arith.constant 0 : index
    %c0_5 = arith.constant 0 : index
    %c0_6 = arith.constant 0 : index
    %c0_7 = arith.constant 0 : index
    %5 = vector.load %arg5[%c0_4, %c0_5, %c0_6, %c0_7] : memref<1x1x8x8xbf16, #tpu.memory_space<vmem>>, vector<1x1x8x8xbf16>
    %6 = vector.shape_cast %5 : vector<1x1x8x8xbf16> to vector<8x8xbf16>
    %cst = arith.constant dense<0.000000e+00> : vector<8x8xf32>
    %7 = tpu.matmul %4, %6, %cst {dimension_numbers = #tpu.dot_dimension_numbers<[1], [1], [0], [0], [0, 0, 1, 0], [], []>} : vector<8x8xbf16>, vector<8x8xbf16>, vector<8x8xf32> -> vector<8x8xf32>
    %cst_8 = arith.constant 0.353553385 : f32
    %8 = vector.broadcast %cst_8 : f32 to vector<8x8xf32>
    %9 = arith.mulf %7, %8 : vector<8x8xf32>
    %c0_9 = arith.constant 0 : index
    %c0_10 = arith.constant 0 : index
    %10 = vector.load %arg8[%c0_9, %c0_10] : memref<8x1xf32, #tpu.memory_space<vmem>>, vector<8x1xf32>
    %cst_11 = arith.constant dense<0xFF800000> : vector<8xf32>
    %11 = vector.multi_reduction <maximumf>, %9, %cst_11 [1] : vector<8x8xf32> to vector<8xf32>
    %12 = vector.shape_cast %11 : vector<8xf32> to vector<8x1xf32>
    %13 = arith.maximumf %10, %12 : vector<8x1xf32>
    %14 = arith.subf %10, %13 : vector<8x1xf32>
    %15 = math.exp %14 : vector<8x1xf32>
    %16 = vector.broadcast %13 : vector<8x1xf32> to vector<8x8xf32>
    %17 = arith.subf %9, %16 : vector<8x8xf32>
    %18 = math.exp %17 : vector<8x8xf32>
    %c0_12 = arith.constant 0 : index
    %c0_13 = arith.constant 0 : index
    %19 = vector.load %arg9[%c0_12, %c0_13] : memref<8x1xf32, #tpu.memory_space<vmem>>, vector<8x1xf32>
    %20 = arith.mulf %15, %19 : vector<8x1xf32>
    %cst_14 = arith.constant dense<0.000000e+00> : vector<8xf32>
    %21 = vector.multi_reduction <add>, %18, %cst_14 [1] : vector<8x8xf32> to vector<8xf32>
    %22 = vector.shape_cast %21 : vector<8xf32> to vector<8x1xf32>
    %23 = arith.addf %20, %22 : vector<8x1xf32>
    %c0_15 = arith.constant 0 : index
    %c0_16 = arith.constant 0 : index
    %24 = vector.load %arg9[%c0_15, %c0_16] : memref<8x1xf32, #tpu.memory_space<vmem>>, vector<8x1xf32>
    tpu.vector_store %arg9[%c0_15, %c0_16], %23 {strides = array<i32>} : memref<8x1xf32, #tpu.memory_space<vmem>>, vector<8x1xf32>,
    %c0_17 = arith.constant 0 : index
    %c0_18 = arith.constant 0 : index
    %25 = vector.load %arg10[%c0_17, %c0_18] : memref<8x8xf32, #tpu.memory_space<vmem>>, vector<8x8xf32>
    %26 = vector.broadcast %15 : vector<8x1xf32> to vector<8x8xf32>
    %27 = arith.mulf %26, %25 : vector<8x8xf32>
    %28 = arith.truncf %18 : vector<8x8xf32> to vector<8x8xbf16>
    %c0_19 = arith.constant 0 : index
    %c0_20 = arith.constant 0 : index
    %c0_21 = arith.constant 0 : index
    %c0_22 = arith.constant 0 : index
    %29 = vector.load %arg6[%c0_19, %c0_20, %c0_21, %c0_22] : memref<1x1x8x8xbf16, #tpu.memory_space<vmem>>, vector<1x1x8x8xbf16>
    %30 = vector.shape_cast %29 : vector<1x1x8x8xbf16> to vector<8x8xbf16>
    %cst_23 = arith.constant dense<0.000000e+00> : vector<8x8xf32>
    %31 = tpu.matmul %28, %30, %cst_23 {dimension_numbers = #tpu.dot_dimension_numbers<[1], [0], [0], [1], [0, 0, 1, 1], [], []>} : vector<8x8xbf16>, vector<8x8xbf16>, vector<8x8xf32> -> vector<8x8xf32>
    %32 = arith.addf %27, %31 : vector<8x8xf32>
    %c0_24 = arith.constant 0 : index
    %c0_25 = arith.constant 0 : index
    %33 = vector.load %arg10[%c0_24, %c0_25] : memref<8x8xf32, #tpu.memory_space<vmem>>, vector<8x8xf32>
    tpu.vector_store %arg10[%c0_24, %c0_25], %32 {strides = array<i32>} : memref<8x8xf32, #tpu.memory_space<vmem>>, vector<8x8xf32>,
    %c0_26 = arith.constant 0 : index
    %c0_27 = arith.constant 0 : index
    %34 = vector.load %arg8[%c0_26, %c0_27] : memref<8x1xf32, #tpu.memory_space<vmem>>, vector<8x1xf32>
    tpu.vector_store %arg8[%c0_26, %c0_27], %13 {strides = array<i32>} : memref<8x1xf32, #tpu.memory_space<vmem>>, vector<8x1xf32>,
    %c0_i32_28 = arith.constant 0 : i32
    %35 = arith.cmpi eq, %arg3, %c0_i32_28 : i32
    %36 = arith.extui %35 : i1 to i32
    %c0_i32_29 = arith.constant 0 : i32
    %37 = arith.cmpi ne, %36, %c0_i32_29 : i32
    scf.if %37 {
      %c0_30 = arith.constant 0 : index
      %c0_31 = arith.constant 0 : index
      %38 = vector.load %arg10[%c0_30, %c0_31] : memref<8x8xf32, #tpu.memory_space<vmem>>, vector<8x8xf32>
      %c0_32 = arith.constant 0 : index
      %c0_33 = arith.constant 0 : index
      %39 = vector.load %arg9[%c0_32, %c0_33] : memref<8x1xf32, #tpu.memory_space<vmem>>, vector<8x1xf32>
      %40 = tpu.reciprocal %39 {approx = true} : vector<8x1xf32> -> vector<8x1xf32>
      %41 = vector.broadcast %40 : vector<8x1xf32> to vector<8x8xf32>
      %42 = arith.mulf %38, %41 : vector<8x8xf32>
      %43 = arith.truncf %42 : vector<8x8xf32> to vector<8x8xbf16>
      %c0_34 = arith.constant 0 : index
      %c0_35 = arith.constant 0 : index
      %c0_36 = arith.constant 0 : index
      %c0_37 = arith.constant 0 : index
      %44 = vector.load %arg7[%c0_34, %c0_35, %c0_36, %c0_37] : memref<1x1x8x8xbf16, #tpu.memory_space<vmem>>, vector<1x1x8x8xbf16>
      %45 = vector.shape_cast %44 : vector<1x1x8x8xbf16> to vector<8x8xbf16>
      %46 = vector.shape_cast %43 : vector<8x8xbf16> to vector<1x1x8x8xbf16>
      tpu.vector_store %arg7[%c0_34, %c0_35, %c0_36, %c0_37], %46 {strides = array<i32>} : memref<1x1x8x8xbf16, #tpu.memory_space<vmem>>, vector<1x1x8x8xbf16>,
    } else {
    }
    return
  }
  func.func @transform_0(%arg0: i32, %arg1: i32, %arg2: i32, %arg3: i32) -> (i32, i32, i32, i32) {
    %c0_i32 = arith.constant 0 : i32
    %c0_i32_0 = arith.constant 0 : i32
    return %arg0, %arg1, %arg2, %c0_i32 : i32, i32, i32, i32
  }
  func.func @transform_1(%arg0: i32, %arg1: i32, %arg2: i32, %arg3: i32) -> (i32, i32, i32, i32) {
    %c0_i32 = arith.constant 0 : i32
    %c0_i32_0 = arith.constant 0 : i32
    return %arg0, %arg1, %arg3, %c0_i32 : i32, i32, i32, i32
  }
  func.func @transform_2(%arg0: i32, %arg1: i32, %arg2: i32, %arg3: i32) -> (i32, i32, i32, i32) {
    %c0_i32 = arith.constant 0 : i32
    %c0_i32_0 = arith.constant 0 : i32
    return %arg0, %arg1, %arg3, %c0_i32 : i32, i32, i32, i32
  }
  func.func @transform_3(%arg0: i32, %arg1: i32, %arg2: i32, %arg3: i32) -> (i32, i32, i32, i32) {
    %c0_i32 = arith.constant 0 : i32
    %c0_i32_0 = arith.constant 0 : i32
    return %arg0, %arg1, %arg2, %c0_i32 : i32, i32, i32, i32
  }
}

module attributes {stable_mosaic.version = 11 : i64} {
  func.func @_matmul_bias_kernel(%arg0: i32, %arg1: i32, %arg2: i32, %arg3: memref<16x32xbf16, #tpu.memory_space<vmem>>, %arg4: memref<32x64xbf16, #tpu.memory_space<vmem>>, %arg5: memref<1x64xf32, #tpu.memory_space<vmem>>, %arg6: memref<16x64xbf16, #tpu.memory_space<vmem>>, %arg7: memref<16x64xf32, #tpu.memory_space<vmem>>) attributes {dimension_semantics = [#tpu.dimension_semantics<parallel>, #tpu.dimension_semantics<parallel>, #tpu.dimension_semantics<arbitrary>], iteration_bounds = array<i64: 1, 1, 1>, scalar_prefetch = 0 : i64, scratch_operands = 1 : i64, tpu.core_type = #tpu.core_type<tc>, window_params = [{transform_indices = @transform_0, window_bounds = array<i64: 16, 32>}, {transform_indices = @transform_1, window_bounds = array<i64: 32, 64>}, {transform_indices = @transform_2, window_bounds = array<i64: 1, 64>}, {transform_indices = @transform_3, window_bounds = array<i64: 16, 64>}]} {
    %c0_i32 = arith.constant 0 : i32
    %0 = arith.cmpi eq, %arg2, %c0_i32 : i32
    %1 = arith.extui %0 : i1 to i32
    %c0_i32_0 = arith.constant 0 : i32
    %2 = arith.cmpi ne, %1, %c0_i32_0 : i32
    scf.if %2 {
      %cst_10 = arith.constant 0.000000e+00 : f32
      %12 = vector.broadcast %cst_10 : f32 to vector<16x64xf32>
      %c0_11 = arith.constant 0 : index
      %c0_12 = arith.constant 0 : index
      %13 = vector.load %arg7[%c0_11, %c0_12] : memref<16x64xf32, #tpu.memory_space<vmem>>, vector<16x64xf32>
      tpu.vector_store %arg7[%c0_11, %c0_12], %12 {strides = array<i32>} : memref<16x64xf32, #tpu.memory_space<vmem>>, vector<16x64xf32>,
    } else {
    }
    %c0 = arith.constant 0 : index
    %c0_1 = arith.constant 0 : index
    %3 = vector.load %arg7[%c0, %c0_1] : memref<16x64xf32, #tpu.memory_space<vmem>>, vector<16x64xf32>
    %c0_2 = arith.constant 0 : index
    %c0_3 = arith.constant 0 : index
    %4 = vector.load %arg3[%c0_2, %c0_3] : memref<16x32xbf16, #tpu.memory_space<vmem>>, vector<16x32xbf16>
    %c0_4 = arith.constant 0 : index
    %c0_5 = arith.constant 0 : index
    %5 = vector.load %arg4[%c0_4, %c0_5] : memref<32x64xbf16, #tpu.memory_space<vmem>>, vector<32x64xbf16>
    %cst = arith.constant dense<0.000000e+00> : vector<16x64xf32>
    %6 = tpu.matmul %4, %5, %cst {dimension_numbers = #tpu.dot_dimension_numbers<[1], [0], [0], [1], [0, 0, 1, 1], [], []>} : vector<16x32xbf16>, vector<32x64xbf16>, vector<16x64xf32> -> vector<16x64xf32>
    %7 = arith.addf %3, %6 : vector<16x64xf32>
    %c0_6 = arith.constant 0 : index
    %c0_7 = arith.constant 0 : index
    %8 = vector.load %arg7[%c0_6, %c0_7] : memref<16x64xf32, #tpu.memory_space<vmem>>, vector<16x64xf32>
    tpu.vector_store %arg7[%c0_6, %c0_7], %7 {strides = array<i32>} : memref<16x64xf32, #tpu.memory_space<vmem>>, vector<16x64xf32>,
    %c0_i32_8 = arith.constant 0 : i32
    %9 = arith.cmpi eq, %arg2, %c0_i32_8 : i32
    %10 = arith.extui %9 : i1 to i32
    %c0_i32_9 = arith.constant 0 : i32
    %11 = arith.cmpi ne, %10, %c0_i32_9 : i32
    scf.if %11 {
      %c0_10 = arith.constant 0 : index
      %c0_11 = arith.constant 0 : index
      %12 = vector.load %arg7[%c0_10, %c0_11] : memref<16x64xf32, #tpu.memory_space<vmem>>, vector<16x64xf32>
      %c0_12 = arith.constant 0 : index
      %c0_13 = arith.constant 0 : index
      %13 = vector.load %arg5[%c0_12, %c0_13] : memref<1x64xf32, #tpu.memory_space<vmem>>, vector<1x64xf32>
      %14 = vector.broadcast %13 : vector<1x64xf32> to vector<16x64xf32>
      %15 = arith.addf %12, %14 : vector<16x64xf32>
      %16 = arith.truncf %15 : vector<16x64xf32> to vector<16x64xbf16>
      %c0_14 = arith.constant 0 : index
      %c0_15 = arith.constant 0 : index
      %17 = vector.load %arg6[%c0_14, %c0_15] : memref<16x64xbf16, #tpu.memory_space<vmem>>, vector<16x64xbf16>
      tpu.vector_store %arg6[%c0_14, %c0_15], %16 {strides = array<i32>} : memref<16x64xbf16, #tpu.memory_space<vmem>>, vector<16x64xbf16>,
    } else {
    }
    return
  }
  func.func @transform_0(%arg0: i32, %arg1: i32, %arg2: i32) -> (i32, i32) {
    %c0_i32 = arith.constant 0 : i32
    return %arg0, %arg2 : i32, i32
  }
  func.func @transform_1(%arg0: i32, %arg1: i32, %arg2: i32) -> (i32, i32) {
    %c0_i32 = arith.constant 0 : i32
    return %arg2, %arg1 : i32, i32
  }
  func.func @transform_2(%arg0: i32, %arg1: i32, %arg2: i32) -> (i32, i32) {
    %c0_i32 = arith.constant 0 : i32
    %c0_i32_0 = arith.constant 0 : i32
    return %c0_i32, %arg1 : i32, i32
  }
  func.func @transform_3(%arg0: i32, %arg1: i32, %arg2: i32) -> (i32, i32) {
    %c0_i32 = arith.constant 0 : i32
    return %arg0, %arg1 : i32, i32
  }
}

module attributes {stable_mosaic.version = 11 : i64} {
  func.func @_ffn_res_ln_kernel(%arg0: i32, %arg1: i32, %arg2: memref<16x32xbf16, #tpu.memory_space<vmem>>, %arg3: memref<32x64xbf16, #tpu.memory_space<vmem>>, %arg4: memref<1x64xf32, #tpu.memory_space<vmem>>, %arg5: memref<64x32xbf16, #tpu.memory_space<vmem>>, %arg6: memref<1x32xf32, #tpu.memory_space<vmem>>, %arg7: memref<1x32xf32, #tpu.memory_space<vmem>>, %arg8: memref<1x32xf32, #tpu.memory_space<vmem>>, %arg9: memref<16x32xbf16, #tpu.memory_space<vmem>>, %arg10: memref<16x32xf32, #tpu.memory_space<vmem>>) attributes {dimension_semantics = [#tpu.dimension_semantics<parallel>, #tpu.dimension_semantics<arbitrary>], iteration_bounds = array<i64: 1, 1>, scalar_prefetch = 0 : i64, scratch_operands = 1 : i64, tpu.core_type = #tpu.core_type<tc>, window_params = [{transform_indices = @transform_0, window_bounds = array<i64: 16, 32>}, {transform_indices = @transform_1, window_bounds = array<i64: 32, 64>}, {transform_indices = @transform_2, window_bounds = array<i64: 1, 64>}, {transform_indices = @transform_3, window_bounds = array<i64: 64, 32>}, {pipeline_mode = #tpu.pipeline_mode<synchronous>, transform_indices = @transform_4, window_bounds = array<i64: 1, 32>}, {pipeline_mode = #tpu.pipeline_mode<synchronous>, transform_indices = @transform_5, window_bounds = array<i64: 1, 32>}, {pipeline_mode = #tpu.pipeline_mode<synchronous>, transform_indices = @transform_6, window_bounds = array<i64: 1, 32>}, {transform_indices = @transform_7, window_bounds = array<i64: 16, 32>}]} {
    %c0_i32 = arith.constant 0 : i32
    %0 = arith.cmpi eq, %arg1, %c0_i32 : i32
    %1 = arith.extui %0 : i1 to i32
    %c0_i32_0 = arith.constant 0 : i32
    %2 = arith.cmpi ne, %1, %c0_i32_0 : i32
    scf.if %2 {
      %cst_16 = arith.constant 0.000000e+00 : f32
      %20 = vector.broadcast %cst_16 : f32 to vector<16x32xf32>
      %c0_17 = arith.constant 0 : index
      %c0_18 = arith.constant 0 : index
      %21 = vector.load %arg10[%c0_17, %c0_18] : memref<16x32xf32, #tpu.memory_space<vmem>>, vector<16x32xf32>
      tpu.vector_store %arg10[%c0_17, %c0_18], %20 {strides = array<i32>} : memref<16x32xf32, #tpu.memory_space<vmem>>, vector<16x32xf32>,
    } else {
    }
    %c0 = arith.constant 0 : index
    %c0_1 = arith.constant 0 : index
    %3 = vector.load %arg2[%c0, %c0_1] : memref<16x32xbf16, #tpu.memory_space<vmem>>, vector<16x32xbf16>
    %c0_2 = arith.constant 0 : index
    %c0_3 = arith.constant 0 : index
    %4 = vector.load %arg3[%c0_2, %c0_3] : memref<32x64xbf16, #tpu.memory_space<vmem>>, vector<32x64xbf16>
    %cst = arith.constant dense<0.000000e+00> : vector<16x64xf32>
    %5 = tpu.matmul %3, %4, %cst {dimension_numbers = #tpu.dot_dimension_numbers<[1], [0], [0], [1], [0, 0, 1, 1], [], []>} : vector<16x32xbf16>, vector<32x64xbf16>, vector<16x64xf32> -> vector<16x64xf32>
    %c0_4 = arith.constant 0 : index
    %c0_5 = arith.constant 0 : index
    %6 = vector.load %arg4[%c0_4, %c0_5] : memref<1x64xf32, #tpu.memory_space<vmem>>, vector<1x64xf32>
    %7 = vector.broadcast %6 : vector<1x64xf32> to vector<16x64xf32>
    %8 = arith.addf %5, %7 : vector<16x64xf32>
    %cst_6 = arith.constant 0.000000e+00 : f32
    %9 = vector.broadcast %cst_6 : f32 to vector<16x64xf32>
    %10 = arith.maximumf %8, %9 : vector<16x64xf32>
    %c0_7 = arith.constant 0 : index
    %c0_8 = arith.constant 0 : index
    %11 = vector.load %arg10[%c0_7, %c0_8] : memref<16x32xf32, #tpu.memory_space<vmem>>, vector<16x32xf32>
    %12 = arith.truncf %10 : vector<16x64xf32> to vector<16x64xbf16>
    %c0_9 = arith.constant 0 : index
    %c0_10 = arith.constant 0 : index
    %13 = vector.load %arg5[%c0_9, %c0_10] : memref<64x32xbf16, #tpu.memory_space<vmem>>, vector<64x32xbf16>
    %cst_11 = arith.constant dense<0.000000e+00> : vector<16x32xf32>
    %14 = tpu.matmul %12, %13, %cst_11 {dimension_numbers = #tpu.dot_dimension_numbers<[1], [0], [0], [1], [0, 0, 1, 1], [], []>} : vector<16x64xbf16>, vector<64x32xbf16>, vector<16x32xf32> -> vector<16x32xf32>
    %15 = arith.addf %11, %14 : vector<16x32xf32>
    %c0_12 = arith.constant 0 : index
    %c0_13 = arith.constant 0 : index
    %16 = vector.load %arg10[%c0_12, %c0_13] : memref<16x32xf32, #tpu.memory_space<vmem>>, vector<16x32xf32>
    tpu.vector_store %arg10[%c0_12, %c0_13], %15 {strides = array<i32>} : memref<16x32xf32, #tpu.memory_space<vmem>>, vector<16x32xf32>,
    %c0_i32_14 = arith.constant 0 : i32
    %17 = arith.cmpi eq, %arg1, %c0_i32_14 : i32
    %18 = arith.extui %17 : i1 to i32
    %c0_i32_15 = arith.constant 0 : i32
    %19 = arith.cmpi ne, %18, %c0_i32_15 : i32
    scf.if %19 {
      %c0_16 = arith.constant 0 : index
      %c0_17 = arith.constant 0 : index
      %20 = vector.load %arg10[%c0_16, %c0_17] : memref<16x32xf32, #tpu.memory_space<vmem>>, vector<16x32xf32>
      %c0_18 = arith.constant 0 : index
      %c0_19 = arith.constant 0 : index
      %21 = vector.load %arg6[%c0_18, %c0_19] : memref<1x32xf32, #tpu.memory_space<vmem>>, vector<1x32xf32>
      %22 = vector.broadcast %21 : vector<1x32xf32> to vector<16x32xf32>
      %23 = arith.addf %20, %22 : vector<16x32xf32>
      %c0_20 = arith.constant 0 : index
      %c0_21 = arith.constant 0 : index
      %24 = vector.load %arg2[%c0_20, %c0_21] : memref<16x32xbf16, #tpu.memory_space<vmem>>, vector<16x32xbf16>
      %25 = arith.extf %24 : vector<16x32xbf16> to vector<16x32xf32>
      %26 = arith.addf %23, %25 : vector<16x32xf32>
      %cst_22 = arith.constant dense<0.000000e+00> : vector<16xf32>
      %27 = vector.multi_reduction <add>, %26, %cst_22 [1] : vector<16x32xf32> to vector<16xf32>
      %28 = vector.shape_cast %27 : vector<16xf32> to vector<16x1xf32>
      %cst_23 = arith.constant 3.200000e+01 : f32
      %29 = vector.broadcast %cst_23 : f32 to vector<16x1xf32>
      %30 = arith.divf %28, %29 : vector<16x1xf32>
      %31 = vector.broadcast %30 : vector<16x1xf32> to vector<16x32xf32>
      %32 = arith.subf %26, %31 : vector<16x32xf32>
      %33 = arith.mulf %32, %32 : vector<16x32xf32>
      %cst_24 = arith.constant dense<0.000000e+00> : vector<16xf32>
      %34 = vector.multi_reduction <add>, %33, %cst_24 [1] : vector<16x32xf32> to vector<16xf32>
      %35 = vector.shape_cast %34 : vector<16xf32> to vector<16x1xf32>
      %cst_25 = arith.constant 3.200000e+01 : f32
      %36 = vector.broadcast %cst_25 : f32 to vector<16x1xf32>
      %37 = arith.divf %35, %36 : vector<16x1xf32>
      %38 = vector.broadcast %30 : vector<16x1xf32> to vector<16x32xf32>
      %39 = arith.subf %26, %38 : vector<16x32xf32>
      %cst_26 = arith.constant 9.99999974E-6 : f32
      %40 = vector.broadcast %cst_26 : f32 to vector<16x1xf32>
      %41 = arith.addf %37, %40 : vector<16x1xf32>
      %42 = math.rsqrt %41 : vector<16x1xf32>
      %43 = vector.broadcast %42 : vector<16x1xf32> to vector<16x32xf32>
      %44 = arith.mulf %39, %43 : vector<16x32xf32>
      %c0_27 = arith.constant 0 : index
      %c0_28 = arith.constant 0 : index
      %45 = vector.load %arg7[%c0_27, %c0_28] : memref<1x32xf32, #tpu.memory_space<vmem>>, vector<1x32xf32>
      %46 = vector.broadcast %45 : vector<1x32xf32> to vector<16x32xf32>
      %47 = arith.mulf %44, %46 : vector<16x32xf32>
      %c0_29 = arith.constant 0 : index
      %c0_30 = arith.constant 0 : index
      %48 = vector.load %arg8[%c0_29, %c0_30] : memref<1x32xf32, #tpu.memory_space<vmem>>, vector<1x32xf32>
      %49 = vector.broadcast %48 : vector<1x32xf32> to vector<16x32xf32>
      %50 = arith.addf %47, %49 : vector<16x32xf32>
      %51 = arith.truncf %50 : vector<16x32xf32> to vector<16x32xbf16>
      %c0_31 = arith.constant 0 : index
      %c0_32 = arith.constant 0 : index
      %52 = vector.load %arg9[%c0_31, %c0_32] : memref<16x32xbf16, #tpu.memory_space<vmem>>, vector<16x32xbf16>
      tpu.vector_store %arg9[%c0_31, %c0_32], %51 {strides = array<i32>} : memref<16x32xbf16, #tpu.memory_space<vmem>>, vector<16x32xbf16>,
    } else {
    }
    return
  }
  func.func @transform_0(%arg0: i32, %arg1: i32) -> (i32, i32) {
    %c0_i32 = arith.constant 0 : i32
    %c0_i32_0 = arith.constant 0 : i32
    return %arg0, %c0_i32 : i32, i32
  }
  func.func @transform_1(%arg0: i32, %arg1: i32) -> (i32, i32) {
    %c0_i32 = arith.constant 0 : i32
    %c0_i32_0 = arith.constant 0 : i32
    return %c0_i32, %arg1 : i32, i32
  }
  func.func @transform_2(%arg0: i32, %arg1: i32) -> (i32, i32) {
    %c0_i32 = arith.constant 0 : i32
    %c0_i32_0 = arith.constant 0 : i32
    return %c0_i32, %arg1 : i32, i32
  }
  func.func @transform_3(%arg0: i32, %arg1: i32) -> (i32, i32) {
    %c0_i32 = arith.constant 0 : i32
    %c0_i32_0 = arith.constant 0 : i32
    return %arg1, %c0_i32 : i32, i32
  }
  func.func @transform_4(%arg0: i32, %arg1: i32) -> (i32, i32) {
    %c0_i32 = arith.constant 0 : i32
    %c0_i32_0 = arith.constant 0 : i32
    %c0_i32_1 = arith.constant 0 : i32
    return %c0_i32, %c0_i32_0 : i32, i32
  }
  func.func @transform_5(%arg0: i32, %arg1: i32) -> (i32, i32) {
    %c0_i32 = arith.constant 0 : i32
    %c0_i32_0 = arith.constant 0 : i32
    %c0_i32_1 = arith.constant 0 : i32
    return %c0_i32, %c0_i32_0 : i32, i32
  }
  func.func @transform_6(%arg0: i32, %arg1: i32) -> (i32, i32) {
    %c0_i32 = arith.constant 0 : i32
    %c0_i32_0 = arith.constant 0 : i32
    %c0_i32_1 = arith.constant 0 : i32
    return %c0_i32, %c0_i32_0 : i32, i32
  }
  func.func @transform_7(%arg0: i32, %arg1: i32) -> (i32, i32) {
    %c0_i32 = arith.constant 0 : i32
    %c0_i32_0 = arith.constant 0 : i32
    return %arg0, %c0_i32 : i32, i32
  }
}

</mosaic_0001>

<bundles_post_ra>
// kernel: transformer_forward.32
= control target key start
LH: loop header
LB: loop body
LE: loop exit
PB: predicated region body
PF: predicated region fallthrough
CT: control target
= control target key end

     0   :  { %8 = vsyncpa [#allocation4], 0  ;;  %s401_s0 = inlined_call_operand.hbm [shape: bf16[16,32], index: 0, kind: input, shape index: {}]   ;;  %s402_s1 = inlined_call_operand.hbm [shape: bf16[32,96], index: 1, kind: input, shape index: {}]   ;;  %s403_s2 = inlined_call_operand.hbm [shape: f32[1,96], index: 2, kind: input, shape index: {}]   ;;  %s404_s3 = inlined_call_operand.hbm [shape: bf16[16,96], index: 3, kind: output, shape index: {}]  }
   0x1   :  { %9 = vsyncpa [#allocation7], 0 }
   0x2   :  { %10 = vsyncpa [#allocation5], 0  ;;  %s305_s12 = smov [#allocation6]   ;;  %s306_s14 = smov [#allocation3]  }
   0x3   :  { %s28_s13 = sshll.u32 %s305_s12, 4  ;;  %s16_s15 = sshll.u32 %s306_s14, 4  ;;  %s29_s13 = int_to_ptr.vmem [resolvable:$true] %s28_s13  ;;  %s333_s15 = int_to_ptr.vmem [resolvable:$true] %s16_s15 }
   0x4   :  { %s211_s18 = scalar_lea.hbm %s402_s1, 256 }
   0x5   :  { %p212_p0 = scmp.ne.s32.totalorder %s402_s1, %s211_s18  ;;  %p215_p1 = scmp.lt.u32.totalorder %s211_s18, %s402_s1 }
   0x7   :  { %p217_p2 = pnand %p215_p1, %p212_p0 }
   0x9   :  { %220 = shalt.err (!%p217_p2)
}
   0xa   :  { %s221_s23 = scalar_lea.vmem %s29_s13, 256  ;;  %p226_p4 = scmp.lt.s32.totalorder %s29_s13, %s29_s13 }
   0xb   :  { %p222_p3 = scmp.ne.s32.totalorder %s29_s13, %s221_s23  ;;  %p227_p5 = scmp.lt.s32.totalorder %s221_s23, %s221_s23 }
   0xd   :  { %p228_p6 = por %p227_p5, %p226_p4 }
   0xf   :  { %p229_p7 = pnand %p228_p6, %p222_p3 }
  0x11   :  { %232 = shalt.err (!%p229_p7)
}
  0x12   :  { %s307_s24 = smov 64   ;;  %s308_s25 = smov 4  }
  0x13   :  { %34 = dma.hbm_to_vmem [thread:$0]  %s402_s1, 256, %s29_s13, [#allocation7], %s307_s24, %s307_s24, %s308_s25  }
  0x14   :  { %s233_s30 = scalar_lea.hbm %s401_s0, 128 }
  0x15   :  { %p234_p8 = scmp.ne.s32.totalorder %s401_s0, %s233_s30  ;;  %p237_p9 = scmp.lt.u32.totalorder %s233_s30, %s401_s0 }
  0x17   :  { %p239_p10 = pnand %p237_p9, %p234_p8 }
  0x19   :  { %242 = shalt.err (!%p239_p10)
}
  0x1a   :  { %s243_s8 = scalar_lea.vmem %s333_s15, 128  ;;  %p248_p12 = scmp.lt.s32.totalorder %s333_s15, %s333_s15 }
  0x1b   :  { %p244_p11 = scmp.ne.s32.totalorder %s333_s15, %s243_s8  ;;  %p249_p13 = scmp.lt.s32.totalorder %s243_s8, %s243_s8 }
  0x1d   :  { %p250_p0 = por %p249_p13, %p248_p12 }
  0x1f   :  { %p251_p1 = pnand %p250_p0, %p244_p11 }
  0x21   :  { %254 = shalt.err (!%p251_p1)
}
  0x22   :  { %22 = dma.hbm_to_vmem [thread:$0]  %s401_s0, 128, %s333_s15, [#allocation4], %s307_s24, %s307_s24, %s308_s25  }
  0x23   :  { %s309_s10 = smov [#allocation8]   ;;  %s255_s14 = scalar_lea.hbm %s403_s2, 16 }
  0x24   :  { %s41_s11 = sshll.u32 %s309_s10, 4  ;;  %p256_p2 = scmp.ne.s32.totalorder %s403_s2, %s255_s14  ;;  %s42_s11 = int_to_ptr.vmem [resolvable:$true] %s41_s11 }
  0x25   :  { %p259_p3 = scmp.lt.u32.totalorder %s255_s14, %s403_s2 }
  0x27   :  { %p261_p4 = pnand %p259_p3, %p256_p2 }
  0x29   :  { %264 = shalt.err (!%p261_p4)
}
  0x2a   :  { %s265_s20 = scalar_lea.vmem %s42_s11, 16  ;;  %s269_s0 = scalar_lea.vmem %s42_s11, 32 }
  0x2b   :  { %p266_p5 = scmp.ne.s32.totalorder %s42_s11, %s265_s20  ;;  %p270_p6 = scmp.lt.s32.totalorder %s42_s11, %s42_s11 }
  0x2c   :  { %p271_p7 = scmp.lt.s32.totalorder %s269_s0, %s265_s20 }
  0x2e   :  { %p272_p8 = por %p271_p7, %p270_p6 }
  0x30   :  { %p273_p9 = pnand %p272_p8, %p266_p5 }
  0x32   :  { %276 = shalt.err (!%p273_p9)
}
  0x33   :  { %44 = dma.hbm_to_vmem [thread:$0]  %s403_s2, 16, %s42_s11, [#allocation7]  }
  0x34   :  { %299 = dma.done.wait [#allocation4], 128  }
  0x35   :  { %300 = vsyncadd [#allocation4], 4294967168 }
  0x36   :  { %301 = dma.done.wait [#allocation7], 272  }
  0x37   :  { %302 = vsyncadd [#allocation7], 4294967024  ;;  %vm59_vm0 = vcmask 785408   ;;  %v310_v0 = vmov 0.0   ;;  %vm311_vm1 = vmmov 0   ;;  %v208_v1 = vld [vmem:[#allocation6] sm:$0xff]  }
  0x38   :  { %60 = vst.msk [vmem:[#allocation2] sm:$0xff] %vm59_vm0, %v310_v0  ;;  %61 = vst.msk [vmem:[#allocation2 + $0x8] sm:$0xff] %vm59_vm0, %v310_v0  ;;  %192 = vmatprep.subr.bf16.mxu0 %v310_v0  ;;  %196 = vmatprep.mubr.msk.bf16.mxu0 %vm311_vm1, %v310_v0  ;;  %v209_v2 = vld [vmem:[#allocation6 + $0x8] sm:$0xff]   ;;  %v210_v3 = vld [vmem:[#allocation3] sm:$0xff]   ;;  %vm87_vm2 = vcmask 261120   ;;  %vm159_vm3 = vcmask 781312  }
  0x39   :  { %193 = vmatpush3.bf16.msra.mxu0 %v208_v1  ;;  %v184_v12 = vld [vmem:[#allocation8] ss:$0 sm:$0xff]  ;;  %s312_s2 = smov [#allocation9]  }
  0x3a   :  { %194 = vmatprep.subr.bf16.mxu0 %v310_v0  ;;  %s167_s22 = sshll.u32 %s312_s2, 4  ;;  %s168_s22 = int_to_ptr.vmem [resolvable:$true] %s167_s22 }
  0x3b   :  { %s277_s23 = scalar_lea.vmem %s168_s22, 128  ;;  %p282_p11 = scmp.lt.s32.totalorder %s168_s22, %s168_s22 }
  0x3c   :  { %p278_p10 = scmp.ne.s32.totalorder %s168_s22, %s277_s23  ;;  %p283_p12 = scmp.lt.s32.totalorder %s277_s23, %s277_s23 }
  0x3d   :  { %195 = vmatpush3.bf16.msra.mxu0 %v209_v2 }
  0x3e   :  { %p284_p13 = por %p283_p12, %p282_p11 }
  0x3f   :  { %v62_v4 = vld [vmem:[#allocation2] sm:$0xff]  ;;  %v63_v6 = vld [vmem:[#allocation2 + $0x8] sm:$0xff] }
  0x40   :  { %197 = vmatmul.mubr.msk.bf16.vlgmr.msra.gmra.mrb[0].mxu0 %vm87_vm2, %v210_v3  ;;  %p285_p0 = pnand %p284_p13, %p278_p10 }
 0x113   :  { %v125_v5 = vpop.f32.mrb[0].mxu0 }
 0x114   :  { %v132_v7 = vadd.f32 %v125_v5, %v62_v4  ;;  %v198_v8 = vpop.f32.mrb[1].mxu0 }
 0x115   :  { %v128_v9 = vpop.f32.mrb[2].mxu0 }
 0x116   :  { %135 = vst.msk [vmem:[#allocation2] sm:$0xff] %vm59_vm0, %v132_v7  ;;  %v133_v10 = vadd.f32 %v128_v9, %v63_v6  ;;  %v199_v11 = vpop.f32.mrb[3].mxu0 }
 0x118   :  { %136 = vst.msk [vmem:[#allocation2 + $0x8] sm:$0xff] %vm59_vm0, %v133_v10 }
 0x11d   :  { %v140_v13 = vld [vmem:[#allocation2] sm:$0xff] }
 0x11e   :  { %v149_v14 = vadd.f32 %v184_v12, %v140_v13 }
 0x11f   :  { %v141_v15 = vld [vmem:[#allocation2 + $0x8] sm:$0xff] }
 0x120   :  { %v150_v16 = vadd.f32 %v184_v12, %v141_v15  ;;  %v187_v17 = vpack.c.bf16 %v149_v14, %v149_v14 }
 0x122   :  { %v188_v18 = vpack.c.bf16 %v150_v16, %v150_v16  ;;  %160 = vst.msk [vmem:[#allocation9] sm:$0xf] %vm159_vm3, %v187_v17 }
 0x124   :  { %161 = vst.msk [vmem:[#allocation9 + $0x4] sm:$0xf] %vm159_vm3, %v188_v18 }
 0x125   :  { %288 = shalt.err (!%p285_p0)
}
 0x126   :  { %s289_s28 = scalar_lea.hbm %s404_s3, 128 }
 0x127   :  { %p290_p1 = scmp.ne.s32.totalorder %s404_s3, %s289_s28  ;;  %p293_p2 = scmp.lt.u32.totalorder %s289_s28, %s404_s3 }
 0x129   :  { %p295_p3 = pnand %p293_p2, %p290_p1 }
 0x12b   :  { %298 = shalt.err (!%p295_p3)
}
 0x12c   :  { %173 = dma.vmem_to_hbm [thread:$0]  %s168_s22, 128, %s404_s3, [#allocation5], %s307_s24, %s307_s24, %s308_s25  }
 0x12d   :  { %303 = dma.done.wait [#allocation5], 128  }
 0x12e   :  { %304 = vsyncadd [#allocation5], 4294967168 }
 0x12f   :  { %177 = vsyncpa [#allocation4], 1 }
 0x130   :  { %178 = vsyncpa [#allocation7], 1 }
 0x131   :  { %179 = vsyncpa [#allocation5], 1 }

// kernel: transformer_forward.33
= control target key start
LH: loop header
LB: loop body
LE: loop exit
PB: predicated region body
PF: predicated region fallthrough
CT: control target
= control target key end

     0   :  { %s1436_s0 = inlined_call_operand.hbm [shape: bf16[2,4,8,8], index: 0, kind: input, shape index: {}]   ;;  %s1437_s1 = inlined_call_operand.hbm [shape: bf16[2,4,8,8], index: 1, kind: input, shape index: {}]   ;;  %s1438_s2 = inlined_call_operand.hbm [shape: bf16[2,4,8,8], index: 2, kind: input, shape index: {}]   ;;  %s1439_s3 = inlined_call_operand.hbm [shape: bf16[8,8], index: 3, kind: input, shape index: {}]   ;;  %s1440_s4 = inlined_call_operand.hbm [shape: bf16[2,4,8,8], index: 4, kind: output, shape index: {}]  }
   0x1   :  { %1459 = sst [smem:[#allocation26_spill]] %s1437_s1 }
   0x2   :  { %9 = vsyncpa [#allocation6], 0 }
   0x3   :  { %11 = vsyncpa [#allocation6 + $0x1], 0 }
   0x4   :  { %12 = vsyncpa [#allocation9], 0 }
   0x5   :  { %14 = vsyncpa [#allocation9 + $0x1], 0 }
   0x6   :  { %15 = vsyncpa [#allocation12], 0 }
   0x7   :  { %16 = vsyncpa [#allocation7], 0 }
   0x8   :  { %18 = vsyncpa [#allocation7 + $0x1], 0  ;;  %s1110_s15 = smov 0   ;;  %s1112_s16 = smov 0  }
   0x9   :  { %s1114_s17 = smov 0   ;;  %s1116_s18 = smov 0  }
   0xa   :  { %s1118_s19 = smov 0   ;;  %s1120_s20 = smov 0  }
   0xb   :  { %s1122_s21 = smov 0   ;;  %s1124_s22 = smov 0  }
   0xc LB: > { %1460 = sst [smem:[#allocation18_spill]] %s1046_s15  ;;  %s46_s23 = sadd.s32 1, %s1066_s20  ;;  %s1074_s22 = sphi %s1124_s22, %s24_s22   ;;  %s1070_s21 = sphi %s1122_s21, %s1495_s21   ;;  %s1066_s20 = sphi %s1120_s20, %s1494_s20   ;;  %s1062_s19 = sphi %s1118_s19, %s1493_s19   ;;  %s1058_s18 = sphi %s1116_s18, %s1492_s18   ;;  %s1054_s17 = sphi %s1114_s17, %s1491_s17   ;;  %s1050_s16 = sphi %s1112_s16, %s1497_s16   ;;  %s1046_s15 = sphi %s1110_s15, %s1496_s15  }
   0xd   : > { %1461 = sst [smem:[#allocation19_spill]] %s1054_s17  ;;  %s50_s24 = sadd.s32 1, %s1070_s21 }
   0xe   : > { %1462 = sst [smem:[#allocation20_spill]] %s1066_s20  ;;  %p48_p0 = scmp.ge.s32.totalorder %s46_s23, 4 }
   0xf   : > { %1463 = sst [smem:[#allocation21_spill]] %s1070_s21  ;;  %s61_s25 = sadd.s32 1, %s1054_s17 }
  0x10   : > { %p1441_p1 = scmp.ne.s32.totalorder %s1054_s17, %s1050_s16  ;;  %p69_p2 = scmp.eq.s32.totalorder %s1074_s22, 0 }
  0x11   : > { %s1499_s23 = smov (%p48_p0, %s46_s23), 0  ;;  %s1501_s24 = smov (!%p48_p0, %s50_s24), %s1070_s21 }
  0x12   : > { %1464 = sst [smem:[#allocation22_spill]] %s1499_s23  ;;  %s55_s26 = ssub.s32 %s1066_s20, %s1499_s23 }
  0x13   : > { %p70_p3 = por %p69_p2, %p1441_p1  ;;  %p52_p4 = scmp.ge.s32.totalorder %s1501_s24, 2 }
  0x14   : > { %p770_p5 = scmp.lt.s32.totalorder %s1074_s22, 8  ;;  %s1442_s27 = sand.u32 1, %s1054_s17  }
  0x15   : > { %s1503_s24 = smov (%p52_p4, %s1501_s24), 0  ;;  %s1170_s28 = sshll.u32 %s1442_s27, 2 }
  0x16   : > { %1465 = sst [smem:[#allocation23_spill]] %s1503_s24  ;;  %s702_s29 = sshll.u32 %s1070_s21, 2 }
  0x17   : > { %s54_s30 = ssub.s32 %s1070_s21, %s1503_s24  ;;  %s240_s5 = sadd.s32 %s1066_s20, %s702_s29 }
  0x18   : > { %s56_s6 = sor.u32 %s55_s26, %s54_s30  ;;  %s1176_s7 = sshll.u32 %s240_s5, 6 }
  0x19   : > { %p59_p6 = scmp.eq.s32.totalorder %s56_s6, 0  ;;  %p1178_p7 = pnand %p770_p5, %p70_p3 }
  0x1a   : > { %s251_s9 = sand.u32 1, %s1074_s22   ;;  %s1468_s1 = sld [smem:[#allocation26_spill]] }
  0x1b   : > { %s1466_s8 = scalar_select %p1178_p7, 1, 0 }
  0x1c   : > { %s1184_s10 = scalar_select %p59_p6, %s1054_s17, %s61_s25  }
  0x1d   : > { %s255_s14 = scalar_lea.vmem [#allocation8], %s1170_s28  ;;  %s1195_s29 = scalar_lea.sflag [#allocation9], %s251_s9 }
  0x1e   : > { %1467 = sst [smem:[#allocation24_spill]] %s1184_s10  ;;  %s265_s26 = sshll.u32 %s255_s14, 4  ;;  %s1193_s26 = int_to_ptr.vmem [resolvable:$true] %s265_s26 }
  0x1f   : > { %p1201_p9 = pneg %p1178_p7 }
  0x20   : > { %s1190_s13 = scalar_lea.hbm %s1468_s1, %s1176_s7  ;;  %s855_s11 = scalar_lea.hbm %s1468_s1, 512 }
  0x21   : > { %s850_s30 = scalar_lea.hbm %s1190_s13, 64  ;;  %p856_p12 = scmp.lt.u32.totalorder %s1190_s13, %s1468_s1 }
  0x22   : > { %p851_p8 = scmp.ne.s32.totalorder %s1190_s13, %s850_s30  ;;  %p857_p13 = scmp.lt.u32.totalorder %s855_s11, %s850_s30 }
  0x23   : > { %s1469_s25 = scalar_select %p1201_p9, 1, 0 }
  0x24   : > { %p853_p10 = pnand %p1201_p9, %p851_p8  ;;  %p858_p0 = por %p857_p13, %p856_p12 }
  0x25   : > { %p859_p2 = scmp.lt.u32.totalorder %s850_s30, %s1190_s13 }
  0x26   : > { %p854_p11 = pneg %p853_p10 }
  0x27   : > { %p860_p3 = por %p859_p2, %p858_p0 }
  0x29   : > { %p861_p4 = pnand %p860_p3, %p854_p11 }
  0x2b   : > { %864 = shalt.err (!%p861_p4)
}
  0x2c   : > { %s865_s9 = scalar_lea.vmem %s1193_s26, 64  ;;  %s1076_s5 = smov [#allocation8]  }
  0x2d   : > { %p866_p5 = scmp.ne.s32.totalorder %s1193_s26, %s865_s9  ;;  %s870_s6 = sshll.u32 %s1076_s5, 4  ;;  %s871_s6 = int_to_ptr.vmem [resolvable:$false] %s870_s6 }
  0x2e   : > { %s872_s12 = scalar_lea.vmem %s871_s6, 128  ;;  %p873_p10 = scmp.lt.s32.totalorder %s1193_s26, %s871_s6 }
  0x2f   : > { %p868_p6 = pnand %p866_p5, %p1201_p9  ;;  %p874_p1 = scmp.lt.s32.totalorder %s872_s12, %s865_s9 }
  0x31   : > { %p869_p8 = pneg %p868_p6  ;;  %p875_p12 = por %p874_p1, %p873_p10 }
  0x33   : > { %p876_p13 = pnand %p875_p12, %p869_p8 }
  0x35   : > { %879 = shalt.err (!%p876_p13)
}
  0x36   : > { %761 = dma.hbm_to_vmem [thread:$0]  (!%p1178_p7), %s1190_s13, 64, %s1193_s26, %s1195_s29  }
  0x37   : > { %s1226_s30 = sadd.s32 4294967295, %s1074_s22   ;;  %s697_s11 = sadd.s32 4294967294, %s1074_s22  }
  0x38   : > { %p74_p1 = scmp.ne.s32.totalorder %s1050_s16, %s1046_s15  ;;  %p1449_p11 = scmp.eq.s32.totalorder %s1226_s30, 0 }
  0x39   : > { %p190_p0 = scmp.eq.s32.totalorder %s1226_s30, 7  ;;  %p196_p2 = scmp.eq.s32.totalorder %s697_s11, 7 }
  0x3a   : > { %p698_p3 = scmp.ge.s32.totalorder %s1074_s22, 1  ;;  %p1236_p4 = por %p1449_p11, %p74_p1 }
  0x3b   : > { %p1471_p5 = scmp.ne.s32.totalorder %s1054_s17, %s1050_s16  ;;  %p1247_p8 = por %p196_p2, %p74_p1 }
  0x3c   : > { %s1470_s14 = scalar_select %p1236_p4, 1, 0 }
  0x3d   : > { %p1243_p6 = por %p190_p0, %p1471_p5  ;;  %p203_p10 = scmp.lt.s32.totalorder %s1074_s22, 9 }
  0x3e   : > { %s1473_s26 = scalar_select %p1247_p8, 1, 0 }
  0x3f   : > { %s1472_s13 = scalar_select %p1243_p6, 1, 0 }
  0x40   : > { %1474 = sst [smem:[#allocation25_spill]] %s1473_s26  ;;  %p1252_p12 = pnand %p698_p3, %p203_p10 }
  0x41   : > { %s1077_s5 = smov [#allocation11]   ;;  %s1264_s27 = scalar_lea.hbm %s1436_s0, %s1176_s7 }
  0x42   : > { %s1475_s9 = scalar_select %p1252_p12, 1, 0 }
  0x43   : > { %s219_s6 = sshll.u32 %s1077_s5, 4  ;;  %p751_p13 = pneg %p1252_p12  ;;  %s1256_s6 = int_to_ptr.vmem [resolvable:$true] %s219_s6 }
  0x44   : > { %s234_s1 = scalar_lea.vmem [#allocation5], %s1170_s28  ;;  %s1477_s5 = sand.u32 1, %s1054_s17  }
  0x45   : > { %s244_s24 = sshll.u32 %s234_s1, 4  ;;  %p1269_p1 = pnand %p751_p13, %p1449_p11  ;;  %s245_s24 = int_to_ptr.vmem [resolvable:$true] %s244_s24 }
  0x46   : > { %s231_s21 = scalar_lea.sflag [#allocation6], %s1477_s5  ;;  %s880_s20 = scalar_lea.hbm %s1264_s27, 64 }
  0x47   : > { %s1476_s23 = scalar_select %p1269_p1, 1, 0 }
  0x48   : > { %p881_p0 = scmp.ne.s32.totalorder %s1264_s27, %s880_s20  ;;  %s885_s10 = scalar_lea.hbm %s1436_s0, 512 }
  0x49   : > { %p886_p5 = scmp.lt.u32.totalorder %s1264_s27, %s1436_s0  ;;  %p887_p10 = scmp.lt.u32.totalorder %s885_s10, %s880_s20 }
  0x4a   : > { %p883_p2 = pnand %p881_p0, %p1201_p9  ;;  %p889_p11 = scmp.lt.u32.totalorder %s880_s20, %s1264_s27 }
  0x4b   : > { %p888_p13 = por %p887_p10, %p886_p5 }
  0x4c   : > { %p884_p3 = pneg %p883_p2 }
  0x4d   : > { %p890_p8 = por %p889_p11, %p888_p13 }
  0x4f   : > { %p891_p6 = pnand %p890_p8, %p884_p3 }
  0x51   : > { %894 = shalt.err (!%p891_p6)
}
  0x52   : > { %s895_s1 = scalar_lea.vmem %s245_s24, 64  ;;  %s1078_s5 = smov [#allocation5]  }
  0x53   : > { %p896_p4 = scmp.ne.s32.totalorder %s245_s24, %s895_s1  ;;  %s900_s17 = sshll.u32 %s1078_s5, 4  ;;  %s901_s17 = int_to_ptr.vmem [resolvable:$false] %s900_s17 }
  0x54   : > { %s902_s12 = scalar_lea.vmem %s901_s17, 128  ;;  %p903_p12 = scmp.lt.s32.totalorder %s245_s24, %s901_s17 }
  0x55   : > { %p898_p0 = pnand %p896_p4, %p1201_p9  ;;  %p904_p1 = scmp.lt.s32.totalorder %s902_s12, %s895_s1 }
  0x57   : > { %p899_p2 = pneg %p898_p0  ;;  %p905_p7 = por %p904_p1, %p903_p12 }
  0x59   : > { %p906_p5 = pnand %p905_p7, %p899_p2 }
  0x5b   : > { %909 = shalt.err (!%p906_p5)
}
  0x5c   : > { %p1478_p10 = scmp.ne.s32.totalorder %s1466_s8, 0  ;;  %s910_s10 = scalar_lea.hbm %s1439_s3, 64 }
  0x5d   : > { %p911_p11 = scmp.ne.s32.totalorder %s1439_s3, %s910_s10  ;;  %p1479_p4 = scmp.ne.s32.totalorder %s1476_s23, 0 }
  0x5e   : > { %758 = dma.hbm_to_vmem [thread:$0]  (!%p1478_p10), %s1264_s27, 64, %s245_s24, %s231_s21  }
  0x5f   : > { %p912_p6 = pneg %p1479_p4  ;;  %p917_p7 = scmp.lt.u32.totalorder %s910_s10, %s1439_s3 }
  0x61   : > { %p913_p8 = pnand %p912_p6, %p911_p11 }
  0x63   : > { %p914_p3 = pneg %p913_p8 }
  0x65   : > { %p919_p12 = pnand %p917_p7, %p914_p3 }
  0x67   : > { %922 = shalt.err (!%p919_p12)
}
  0x68   : > { %s923_s21 = scalar_lea.vmem %s1256_s6, 64  ;;  %p931_p2 = scmp.lt.s32.totalorder %s1256_s6, %s1256_s6 }
  0x69   : > { %p924_p1 = scmp.ne.s32.totalorder %s1256_s6, %s923_s21  ;;  %p932_p5 = scmp.lt.s32.totalorder %s923_s21, %s923_s21 }
  0x6b   : > { %p926_p13 = pnand %p924_p1, %p912_p6  ;;  %p933_p10 = por %p932_p5, %p931_p2 }
  0x6d   : > { %p927_p0 = pneg %p926_p13 }
  0x6f   : > { %p934_p9 = pnand %p933_p10, %p927_p0 }
  0x71   : > { %937 = shalt.err (!%p934_p9)
}
  0x72   : > { %754 = dma.hbm_to_vmem [thread:$0]  (!%p1479_p4), %s1439_s3, 64, %s1256_s6, [#allocation12]  }
  0x73   : > { %s1317_s15 = scalar_lea.hbm %s1438_s2, %s1176_s7  ;;  %s276_s20 = scalar_lea.vmem [#allocation10], %s1170_s28 }
  0x74   : > { %s286_s10 = sshll.u32 %s276_s20, 4  ;;  %s938_s23 = scalar_lea.hbm %s1317_s15, 64  ;;  %s287_s10 = int_to_ptr.vmem [resolvable:$true] %s286_s10 }
  0x75   : > { %p939_p9 = scmp.ne.s32.totalorder %s1317_s15, %s938_s23  ;;  %p1480_p10 = scmp.ne.s32.totalorder %s1469_s25, 0 }
  0x76   : > { %s943_s6 = scalar_lea.hbm %s1438_s2, 512  ;;  %p944_p4 = scmp.lt.u32.totalorder %s1317_s15, %s1438_s2 }
  0x77   : > { %p941_p11 = pnand %p939_p9, %p1480_p10  ;;  %p945_p8 = scmp.lt.u32.totalorder %s943_s6, %s938_s23 }
  0x78   : > { %p947_p7 = scmp.lt.u32.totalorder %s938_s23, %s1317_s15 }
  0x79   : > { %p942_p6 = pneg %p941_p11  ;;  %p946_p3 = por %p945_p8, %p944_p4 }
  0x7b   : > { %p948_p12 = por %p947_p7, %p946_p3 }
  0x7d   : > { %p949_p1 = pnand %p948_p12, %p942_p6 }
  0x7f   : > { %952 = shalt.err (!%p949_p1)
}
  0x80   : > { %s953_s28 = scalar_lea.vmem %s287_s10, 64  ;;  %s1079_s7 = smov [#allocation10]  }
  0x81   : > { %p954_p13 = scmp.ne.s32.totalorder %s287_s10, %s953_s28  ;;  %s958_s21 = sshll.u32 %s1079_s7, 4  ;;  %s959_s21 = int_to_ptr.vmem [resolvable:$false] %s958_s21 }
  0x82   : > { %s960_s24 = scalar_lea.vmem %s959_s21, 128  ;;  %p961_p5 = scmp.lt.s32.totalorder %s287_s10, %s959_s21 }
  0x83   : > { %p956_p0 = pnand %p954_p13, %p1480_p10  ;;  %p962_p9 = scmp.lt.s32.totalorder %s960_s24, %s953_s28 }
  0x85   : > { %p957_p2 = pneg %p956_p0  ;;  %p963_p11 = por %p962_p9, %p961_p5 }
  0x87   : > { %p964_p4 = pnand %p963_p11, %p957_p2 }
  0x89   : > { %967 = shalt.err (!%p964_p4)
}
  0x8a   : > { %p1481_p8 = scmp.ne.s32.totalorder %s1466_s8, 0  ;;  %p1482_p6 = scmp.ne.s32.totalorder %s1475_s9, 0 }
  0x8b   : > { %s1341_s25 = sand.u32 (!%p1482_p6), 1, %s1050_s16   ;;  %p1483_p10 = scmp.ne.s32.totalorder (!%p1482_p6), %s1470_s14, 0 }
  0x8c   : > { %764 = dma.hbm_to_vmem [thread:$0]  (!%p1481_p8), %s1317_s15, 64, %s287_s10, %s1195_s29  }
  0x8d   : > { %295 = sbr.rel (%p1482_p6) target bundleno = 978 (0x3d2), region = 36  ;;  %s1344_s27 = sshll.u32 (!%p1482_p6), %s1341_s25, 2 }
  0x8e   : > { %s298_s5 = scalar_lea.sflag (!%p1482_p6), [#allocation6], %s1341_s25  ;;  %s301_s12 = scalar_lea.vmem (!%p1482_p6), [#allocation5], %s1344_s27 }
  0x94   : > { %1029 = dma.done.wait (%p1483_p10), %s298_s5, 64  }
  0x95   : > { %1031 = vsyncadd (%p1483_p10), %s298_s5, 4294967232  ;;  %s306_s8 = sand.u32 1, %s1226_s30   ;;  %s310_s9 = scalar_lea.vmem [#allocation8], %s1344_s27 }
  0x96   : > { %s307_s29 = scalar_lea.sflag [#allocation9], %s306_s8 }
  0x97   : > { %1033 = dma.done.wait (%p1483_p10), %s307_s29, 128  }
  0x98   : > { %1035 = vsyncadd (%p1483_p10), %s307_s29, 4294967168  ;;  %s319_s15 = scalar_lea.vmem [#allocation10], %s1344_s27  ;;  %p1484_p3 = scmp.eq.s32.totalorder %s1226_s30, 0 }
  0x9a   : > { %1037 = dma.done.wait (%p1484_p3), [#allocation12], 64   ;;  %p1485_p7 = pmov %p1484_p3 }
  0x9b   : > { %vm368_vm0 = vcmask 64512   ;;  %v1080_v0 = vmov 0.0   ;;  %vm1081_vm1 = vmmov 0   ;;  %v371_v1 = vld [vmem:[%s310_s9] sm:$0xf]  ;;  %v1082_v4 = vmov 0  }
  0x9c   : > { %1039 = vsyncadd (%p1485_p7), [#allocation12], 4294967232  ;;  %727 = vmatprep.subr.bf16.mxu0 %v1080_v0  ;;  %369 = vst.msk [vmem:[#allocation4] sm:$0xff] %vm368_vm0, %v1080_v0  ;;  %729 = vmatprep.mubr.msk.bf16.mxu0 %vm1081_vm1, %v1080_v0  ;;  %v377_v2 = vsel %vm368_vm0, %v371_v1, 0  ;;  %v370_v3 = vld [vmem:[%s301_s12] sm:$0xf] }
  0x9d   : > { %733 = vmatprep.subr.bf16.mxu1 %v1080_v0  ;;  %735 = vmatprep.mubr.msk.bf16.mxu1 %vm1081_vm1, %v1080_v0  ;;  %vm365_vm2 = vcmask 7168   ;;  %v1083_v5 = vmov -1e+30   ;;  %v420_v6 = vld [vmem:[#allocation11] sm:$0xf]  ;;  %vm462_vm5 = vcmask 1043456  }
  0x9e   : > { %728 = vmatpush3.bf16.xpose.msra.mxu0 %v377_v2  ;;  %842 = vset.pattern.permute.xlu0 %v1082_v4  ;;  %366 = vst.msk [vmem:[#allocation2] sm:$0xff] %vm365_vm2, %v1083_v5  ;;  %367 = vst.msk [vmem:[#allocation3] sm:$0xff] %vm365_vm2, %v1080_v0  ;;  %vm421_vm3 = vcmp.gt.bf16.partialorder %v420_v6, 0  ;;  %v458_v20 = vld [vmem:[%s319_s15] sm:$0xf]  ;;  %s719_s30 = sshll.u32 %s1062_s19, 2 }
  0x9f   : > { %843 = vset.pattern.permute.xlu1 %v1082_v4  ;;  %v422_v7 = vsel %vm421_vm3, 65537, %v1082_v4  ;;  %v464_v21 = vsel %vm462_vm5, %v458_v20, 0  ;;  %s537_s14 = sadd.s32 %s1058_s18, %s719_s30  ;;  %s357_s10 = scalar_lea.vmem [#allocation13], %s1344_s27  ;;  %vm522_vm6 = vcmask 60416  }
  0xa0   : > { %v423_v8 = vunpack.c.l.b16 %v422_v7  ;;  %734 = vmatpush3.bf16.msra.mxu1 %v464_v21  ;;  %s720_s20 = sshll.u32 %s537_s14, 6  ;;  %s541_s23 = sshll.u32 %s357_s10, 4  ;;  %s1384_s23 = int_to_ptr.vmem [resolvable:$true] %s541_s23 }
  0xa1   : > { %s1382_s6 = scalar_lea.hbm %s1440_s4, %s720_s20  ;;  %s525_s18 = scalar_lea.sflag [#allocation7], %s1341_s25 }
  0xa2   : > { %vm424_vm4 = vcmp.ne.s32.totalorder %v423_v8, 0  ;;  %s968_s19 = scalar_lea.vmem %s1384_s23, 64  ;;  %p1486_p1 = scmp.ne.s32.totalorder %s1472_s13, 0 }
  0xa3   : > { %v450_v36 = vld [vmem:[#allocation4] sm:$0xff]  ;;  %p969_p12 = scmp.ne.s32.totalorder %s1384_s23, %s968_s19  ;;  %s1084_s17 = smov [#allocation13]  }
  0xa4   : > { %s972_s1 = sshll.u32 %s1084_s17, 4  ;;  %s973_s1 = int_to_ptr.vmem [resolvable:$false] %s972_s1 }
  0xa5   : > { %730 = vmatmul.mubr.msk.bf16.vlgmr.msra.gmra.mrb[0].mxu0 %vm368_vm0, %v370_v3  ;;  %v426_v16 = vld [vmem:[#allocation2] sm:$0xff]  ;;  %v442_v30 = vld [vmem:[#allocation3] sm:$0xff]  ;;  %p970_p13 = pnand %p969_p12, %p1486_p1  ;;  %s974_s28 = scalar_lea.vmem %s973_s1, 128 }
  0xa6   : > { %p975_p2 = scmp.lt.s32.totalorder %s1384_s23, %s973_s1  ;;  %p976_p5 = scmp.lt.s32.totalorder %s974_s28, %s968_s19 }
  0xa7   : > { %p971_p0 = pneg %p970_p13 }
  0xa8   : > { %p977_p9 = por %p976_p5, %p975_p2 }
  0xaa   : > { %p978_p11 = pnand %p977_p9, %p971_p0 }
 0x178   : > { %v413_v9 = vpop.f32.mrb[0].mxu0 }
 0x179   : > { %v419_v10 = vmul.f32 0.35355338, %v413_v9  ;;  %v731_v11 = vpop.f32.mrb[1].mxu0 }
 0x17a   : > { %v416_v12 = vpop.f32.mrb[2].mxu0 }
 0x17b   : > { %v732_v13 = vpop.f32.mrb[3].mxu0  ;;  %v425_v14 = vsel %vm424_vm4, %v419_v10, -1e+09 }
 0x17c   : > { %v427_v15 = vsel %vm368_vm0, %v425_v14, -inf }
 0x17d   : > { %428 = vmax.xlane.f32.xlu0 %v427_v15 }
 0x20a   : > { %v429_v17 = vpop.xlane.xlu0 %428 }
 0x20b   : > { %v430_v18 = vmax.f32 %v426_v16, %v429_v17 }
 0x20d   : > { %v431_v19 = vsub.f32 %v426_v16, %v430_v18  ;;  %508 = vst.msk [vmem:[#allocation2] sm:$0xff] %vm365_vm2, %v430_v18  ;;  %436 = vperm.xlu0 %842, %v430_v18  }
 0x20f   : > { %v432_v28 = vmul.f32 1.442695, %v431_v19 }
 0x28c   : > { %v437_v22 = vpop.permute.xlu0 %436 }
 0x28d   : > { %v439_v23 = vsub.f32 %v425_v14, %v437_v22 }
 0x28f   : > { %v440_v24 = vmul.f32 1.442695, %v439_v23 }
 0x291   : > { %844 = vpow2.f32 %v440_v24 }
 0x292   : > { %846 = vpow2.f32 %v432_v28 }
 0x29b   : > { %v845_v25 = vpop.eup %844 }
 0x29c   : > { %v444_v26 = vsel %vm368_vm0, %v845_v25, 0.0  ;;  %v457_v27 = vpack.c.bf16 %v845_v25, %v845_v25  ;;  %v847_v29 = vpop.eup %846 }
 0x29d   : > { %445 = vadd.xlane.f32.xlu1 %v444_v26  ;;  %v443_v31 = vmul.f32 %v847_v29, %v442_v30 }
 0x29e   : > { %736 = vmatmul.mubr.msk.bf16.vlgmr.msra.gmra.mrb[0].mxu1 %vm368_vm0, %v457_v27 }
 0x2ae   : > { %453 = vperm.xlu1 %843, %v847_v29  }
 0x32a   : > { %v446_v32 = vpop.xlane.xlu1 %445 }
 0x32b   : > { %v447_v33 = vadd.f32 %v446_v32, %v443_v31 }
 0x32d   : > { %449 = vst.msk [vmem:[#allocation3] sm:$0xff] %vm365_vm2, %v447_v33 }
 0x32e   : > { %v454_v37 = vpop.permute.xlu1 %453 }
 0x32f   : > { %v456_v38 = vmul.f32 %v454_v37, %v450_v36 }
 0x334   : > { %v513_v34 = vld [vmem:[#allocation3] sm:$0xff] }
 0x335   : > { %848 = vrcp.f32 %v513_v34 }
 0x33f   : > { %v849_v35 = vpop.eup %848 }
 0x340   : > { %517 = vperm.xlu1 %843, %v849_v35  }
 0x371   : > { %v500_v39 = vpop.f32.mrb[0].mxu1 }
 0x372   : > { %v506_v40 = vadd.f32 %v500_v39, %v456_v38  ;;  %v737_v41 = vpop.f32.mrb[1].mxu1 }
 0x373   : > { %v503_v42 = vpop.f32.mrb[2].mxu1 }
 0x374   : > { %507 = vst.msk [vmem:[#allocation4] sm:$0xff] %vm368_vm0, %v506_v40  ;;  %v738_v43 = vpop.f32.mrb[3].mxu1 }
 0x37b   : > { %v512_v44 = vld [vmem:[#allocation4] sm:$0xff] }
 0x3bf   : > { %v518_v45 = vpop.permute.xlu1 %517 }
 0x3c0   : > { %v520_v46 = vmul.f32 %v518_v45, %v512_v44 }
 0x3c2   : > { %v521_v47 = vpack.c.bf16 %v520_v46, %v520_v46 }
 0x3c4   : > { %523 = vst.msk [vmem:[%s357_s10] sm:$0xf] %vm522_vm6, %v521_v47 }
 0x3c5   : > { %981 = shalt.err (!%p978_p11)
}
 0x3c6   : > { %s982_s7 = scalar_lea.hbm %s1382_s6, 64  ;;  %s986_s25 = scalar_lea.hbm %s1440_s4, 512 }
 0x3c7   : > { %p983_p4 = scmp.ne.s32.totalorder %s1382_s6, %s982_s7  ;;  %p987_p10 = scmp.lt.u32.totalorder %s1382_s6, %s1440_s4 }
 0x3c8   : > { %p988_p3 = scmp.lt.u32.totalorder %s986_s25, %s982_s7  ;;  %p990_p12 = scmp.lt.u32.totalorder %s982_s7, %s1382_s6 }
 0x3c9   : > { %p984_p8 = pnand %p983_p4, %p1486_p1 }
 0x3ca   : > { %p989_p7 = por %p988_p3, %p987_p10 }
 0x3cb   : > { %p985_p6 = pneg %p984_p8 }
 0x3cc   : > { %p991_p13 = por %p990_p12, %p989_p7 }
 0x3ce   : > { %p992_p0 = pnand %p991_p13, %p985_p6 }
 0x3d0   : > { %995 = shalt.err (!%p992_p0)
}
 0x3d1   : > { %749 = dma.vmem_to_hbm [thread:$0]  (%p1486_p1), %s1384_s23, 64, %s1382_s6, %s525_s18  }
 0x3d2 PF: > { %s1487_s12 = sld [smem:[#allocation18_spill]]  ;;  %s1488_s8 = sld [smem:[#allocation25_spill]] }
 0x3d3   : > { %p772_p2 = scmp.ge.s32.totalorder %s1074_s22, 2 }
 0x3d8   : > { %s553_s29 = sand.u32 1, %s1487_s12   ;;  %p1489_p5 = scmp.ne.s32.totalorder %s1488_s8, 0 }
 0x3d9   : > { %s554_s9 = scalar_lea.sflag [#allocation7], %s553_s29 }
 0x3da   : > { %p766_p9 = pnand %p772_p2, %p1489_p5 }
 0x3dc   : > { %1041 = dma.done.wait (!%p766_p9), %s554_s9, 64  }
 0x3dd   : > { %1043 = vsyncadd (!%p766_p9), %s554_s9, 4294967232  ;;  %s24_s22 = sadd.s32 1, %s1074_s22   ;;  %s1490_s30 = sld [smem:[#allocation19_spill]] }
 0x3de   : > { %p21_p11 = scmp.ge.s32.totalorder %s24_s22, 10   ;;  %s1491_s17 = sld [smem:[#allocation24_spill]] }
 0x3df   : > { %s1492_s18 = sld [smem:[#allocation20_spill]]  ;;  %s1493_s19 = sld [smem:[#allocation21_spill]] }
 0x3e0   : > { %s1494_s20 = sld [smem:[#allocation22_spill]]  ;;  %s1495_s21 = sld [smem:[#allocation23_spill]] }
 0x3e1   : > { %s1496_s15 = smov %s1050_s16  ;;  %23 = sbr.rel (!%p21_p11) target bundleno = 12 (0xc), region = 118 }
 0x3e3   : > { %s1497_s16 = smov %s1490_s30 }
 0x3e8   :  { %559 = vsyncpa [#allocation6], 1 }
 0x3e9   :  { %561 = vsyncpa [#allocation6 + $0x1], 1 }
 0x3ea   :  { %562 = vsyncpa [#allocation9], 1 }
 0x3eb   :  { %564 = vsyncpa [#allocation9 + $0x1], 1 }
 0x3ec   :  { %565 = vsyncpa [#allocation12], 1 }
 0x3ed   :  { %566 = vsyncpa [#allocation7], 1 }
 0x3ee   :  { %568 = vsyncpa [#allocation7 + $0x1], 1 }

// kernel: transformer_forward.35
= control target key start
LH: loop header
LB: loop body
LE: loop exit
PB: predicated region body
PF: predicated region fallthrough
CT: control target
= control target key end

     0   :  { %8 = vsyncpa [#allocation4], 0  ;;  %s401_s0 = inlined_call_operand.hbm [shape: bf16[16,32], index: 0, kind: input, shape index: {}]   ;;  %s402_s1 = inlined_call_operand.hbm [shape: bf16[32,32], index: 1, kind: input, shape index: {}]   ;;  %s403_s2 = inlined_call_operand.hbm [shape: f32[1,32], index: 2, kind: input, shape index: {}]   ;;  %s404_s3 = inlined_call_operand.hbm [shape: bf16[16,32], index: 3, kind: output, shape index: {}]  }
   0x1   :  { %9 = vsyncpa [#allocation7], 0 }
   0x2   :  { %10 = vsyncpa [#allocation5], 0  ;;  %s304_s12 = smov [#allocation6]   ;;  %s305_s14 = smov [#allocation3]  }
   0x3   :  { %s28_s13 = sshll.u32 %s304_s12, 4  ;;  %s16_s15 = sshll.u32 %s305_s14, 4  ;;  %s29_s13 = int_to_ptr.vmem [resolvable:$true] %s28_s13  ;;  %s332_s15 = int_to_ptr.vmem [resolvable:$true] %s16_s15 }
   0x4   :  { %s210_s18 = scalar_lea.hbm %s402_s1, 256 }
   0x5   :  { %p211_p0 = scmp.ne.s32.totalorder %s402_s1, %s210_s18  ;;  %p214_p1 = scmp.lt.u32.totalorder %s210_s18, %s402_s1 }
   0x7   :  { %p216_p2 = pnand %p214_p1, %p211_p0 }
   0x9   :  { %219 = shalt.err (!%p216_p2)
}
   0xa   :  { %s220_s23 = scalar_lea.vmem %s29_s13, 256  ;;  %p225_p4 = scmp.lt.s32.totalorder %s29_s13, %s29_s13 }
   0xb   :  { %p221_p3 = scmp.ne.s32.totalorder %s29_s13, %s220_s23  ;;  %p226_p5 = scmp.lt.s32.totalorder %s220_s23, %s220_s23 }
   0xd   :  { %p227_p6 = por %p226_p5, %p225_p4 }
   0xf   :  { %p228_p7 = pnand %p227_p6, %p221_p3 }
  0x11   :  { %231 = shalt.err (!%p228_p7)
}
  0x12   :  { %s306_s24 = smov 64   ;;  %s307_s25 = smov 4  }
  0x13   :  { %34 = dma.hbm_to_vmem [thread:$0]  %s402_s1, 256, %s29_s13, [#allocation7], %s306_s24, %s306_s24, %s307_s25  }
  0x14   :  { %s232_s30 = scalar_lea.hbm %s401_s0, 128 }
  0x15   :  { %p233_p8 = scmp.ne.s32.totalorder %s401_s0, %s232_s30  ;;  %p236_p9 = scmp.lt.u32.totalorder %s232_s30, %s401_s0 }
  0x17   :  { %p238_p10 = pnand %p236_p9, %p233_p8 }
  0x19   :  { %241 = shalt.err (!%p238_p10)
}
  0x1a   :  { %s242_s8 = scalar_lea.vmem %s332_s15, 128  ;;  %p247_p12 = scmp.lt.s32.totalorder %s332_s15, %s332_s15 }
  0x1b   :  { %p243_p11 = scmp.ne.s32.totalorder %s332_s15, %s242_s8  ;;  %p248_p13 = scmp.lt.s32.totalorder %s242_s8, %s242_s8 }
  0x1d   :  { %p249_p0 = por %p248_p13, %p247_p12 }
  0x1f   :  { %p250_p1 = pnand %p249_p0, %p243_p11 }
  0x21   :  { %253 = shalt.err (!%p250_p1)
}
  0x22   :  { %22 = dma.hbm_to_vmem [thread:$0]  %s401_s0, 128, %s332_s15, [#allocation4], %s306_s24, %s306_s24, %s307_s25  }
  0x23   :  { %s308_s10 = smov [#allocation8]   ;;  %s254_s14 = scalar_lea.hbm %s403_s2, 16 }
  0x24   :  { %s41_s11 = sshll.u32 %s308_s10, 4  ;;  %p255_p2 = scmp.ne.s32.totalorder %s403_s2, %s254_s14  ;;  %s42_s11 = int_to_ptr.vmem [resolvable:$true] %s41_s11 }
  0x25   :  { %p258_p3 = scmp.lt.u32.totalorder %s254_s14, %s403_s2 }
  0x27   :  { %p260_p4 = pnand %p258_p3, %p255_p2 }
  0x29   :  { %263 = shalt.err (!%p260_p4)
}
  0x2a   :  { %s264_s20 = scalar_lea.vmem %s42_s11, 16  ;;  %s268_s0 = scalar_lea.vmem %s42_s11, 32 }
  0x2b   :  { %p265_p5 = scmp.ne.s32.totalorder %s42_s11, %s264_s20  ;;  %p269_p6 = scmp.lt.s32.totalorder %s42_s11, %s42_s11 }
  0x2c   :  { %p270_p7 = scmp.lt.s32.totalorder %s268_s0, %s264_s20 }
  0x2e   :  { %p271_p8 = por %p270_p7, %p269_p6 }
  0x30   :  { %p272_p9 = pnand %p271_p8, %p265_p5 }
  0x32   :  { %275 = shalt.err (!%p272_p9)
}
  0x33   :  { %44 = dma.hbm_to_vmem [thread:$0]  %s403_s2, 16, %s42_s11, [#allocation7]  }
  0x34   :  { %298 = dma.done.wait [#allocation4], 128  }
  0x35   :  { %299 = vsyncadd [#allocation4], 4294967168 }
  0x36   :  { %300 = dma.done.wait [#allocation7], 272  }
  0x37   :  { %301 = vsyncadd [#allocation7], 4294967024  ;;  %vm59_vm0 = vcmask 261120   ;;  %v309_v0 = vmov 0.0   ;;  %vm310_vm1 = vmmov 0   ;;  %v207_v1 = vld [vmem:[#allocation6] sm:$0xff]  }
  0x38   :  { %191 = vmatprep.subr.bf16.mxu0 %v309_v0  ;;  %195 = vmatprep.mubr.msk.bf16.mxu0 %vm310_vm1, %v309_v0  ;;  %60 = vst.msk [vmem:[#allocation2] sm:$0xff] %vm59_vm0, %v309_v0  ;;  %61 = vst.msk [vmem:[#allocation2 + $0x8] sm:$0xff] %vm59_vm0, %v309_v0  ;;  %v208_v2 = vld [vmem:[#allocation6 + $0x8] sm:$0xff]   ;;  %v209_v3 = vld [vmem:[#allocation3] sm:$0xff]   ;;  %vm158_vm2 = vcmask 257024   ;;  %s311_s2 = smov [#allocation9]  }
  0x39   :  { %192 = vmatpush3.bf16.msra.mxu0 %v207_v1  ;;  %v183_v12 = vld [vmem:[#allocation8] ss:$0 sm:$0xff]  ;;  %s166_s22 = sshll.u32 %s311_s2, 4  ;;  %s167_s22 = int_to_ptr.vmem [resolvable:$true] %s166_s22 }
  0x3a   :  { %193 = vmatprep.subr.bf16.mxu0 %v309_v0  ;;  %s276_s23 = scalar_lea.vmem %s167_s22, 128  ;;  %p281_p11 = scmp.lt.s32.totalorder %s167_s22, %s167_s22 }
  0x3b   :  { %p277_p10 = scmp.ne.s32.totalorder %s167_s22, %s276_s23  ;;  %p282_p12 = scmp.lt.s32.totalorder %s276_s23, %s276_s23 }
  0x3d   :  { %194 = vmatpush3.bf16.msra.mxu0 %v208_v2  ;;  %p283_p13 = por %p282_p12, %p281_p11 }
  0x3f   :  { %v62_v4 = vld [vmem:[#allocation2] sm:$0xff]  ;;  %v63_v6 = vld [vmem:[#allocation2 + $0x8] sm:$0xff]  ;;  %p284_p0 = pnand %p283_p13, %p277_p10 }
  0x40   :  { %196 = vmatmul.mubr.msk.bf16.vlgmr.msra.gmra.mrb[0].mxu0 %vm59_vm0, %v209_v3 }
 0x113   :  { %v125_v5 = vpop.f32.mrb[0].mxu0 }
 0x114   :  { %v132_v7 = vadd.f32 %v125_v5, %v62_v4  ;;  %v197_v8 = vpop.f32.mrb[1].mxu0 }
 0x115   :  { %v128_v9 = vpop.f32.mrb[2].mxu0 }
 0x116   :  { %134 = vst.msk [vmem:[#allocation2] sm:$0xff] %vm59_vm0, %v132_v7  ;;  %v133_v10 = vadd.f32 %v128_v9, %v63_v6  ;;  %v198_v11 = vpop.f32.mrb[3].mxu0 }
 0x118   :  { %135 = vst.msk [vmem:[#allocation2 + $0x8] sm:$0xff] %vm59_vm0, %v133_v10 }
 0x11d   :  { %v139_v13 = vld [vmem:[#allocation2] sm:$0xff] }
 0x11e   :  { %v148_v14 = vadd.f32 %v183_v12, %v139_v13 }
 0x11f   :  { %v140_v15 = vld [vmem:[#allocation2 + $0x8] sm:$0xff] }
 0x120   :  { %v149_v16 = vadd.f32 %v183_v12, %v140_v15  ;;  %v186_v17 = vpack.c.bf16 %v148_v14, %v148_v14 }
 0x122   :  { %v187_v18 = vpack.c.bf16 %v149_v16, %v149_v16  ;;  %159 = vst.msk [vmem:[#allocation9] sm:$0xf] %vm158_vm2, %v186_v17 }
 0x124   :  { %160 = vst.msk [vmem:[#allocation9 + $0x4] sm:$0xf] %vm158_vm2, %v187_v18 }
 0x125   :  { %287 = shalt.err (!%p284_p0)
}
 0x126   :  { %s288_s28 = scalar_lea.hbm %s404_s3, 128 }
 0x127   :  { %p289_p1 = scmp.ne.s32.totalorder %s404_s3, %s288_s28  ;;  %p292_p2 = scmp.lt.u32.totalorder %s288_s28, %s404_s3 }
 0x129   :  { %p294_p3 = pnand %p292_p2, %p289_p1 }
 0x12b   :  { %297 = shalt.err (!%p294_p3)
}
 0x12c   :  { %172 = dma.vmem_to_hbm [thread:$0]  %s167_s22, 128, %s404_s3, [#allocation5], %s306_s24, %s306_s24, %s307_s25  }
 0x12d   :  { %302 = dma.done.wait [#allocation5], 128  }
 0x12e   :  { %303 = vsyncadd [#allocation5], 4294967168 }
 0x12f   :  { %176 = vsyncpa [#allocation4], 1 }
 0x130   :  { %177 = vsyncpa [#allocation7], 1 }
 0x131   :  { %178 = vsyncpa [#allocation5], 1 }

// kernel: transformer_forward.34
= control target key start
LH: loop header
LB: loop body
LE: loop exit
PB: predicated region body
PF: predicated region fallthrough
CT: control target
= control target key end

     0   :  { %11 = vsyncpa [#allocation4], 0  ;;  %s644_s0 = inlined_call_operand.hbm [shape: bf16[16,32], index: 0, kind: input, shape index: {}]   ;;  %s645_s1 = inlined_call_operand.hbm [shape: bf16[32,32], index: 1, kind: input, shape index: {}]   ;;  %s646_s2 = inlined_call_operand.hbm [shape: f32[1,32], index: 2, kind: input, shape index: {}]   ;;  %s647_s3 = inlined_call_operand.hbm [shape: bf16[16,32], index: 3, kind: input, shape index: {}]   ;;  %s648_s4 = inlined_call_operand.hbm [shape: f32[1,32], index: 4, kind: input, shape index: {}]   ;;  %s649_s5 = inlined_call_operand.hbm [shape: f32[1,32], index: 5, kind: input, shape index: {}]   ;;  %s650_s6 = inlined_call_operand.hbm [shape: bf16[16,32], index: 6, kind: output, shape index: {}]  }
   0x1   :  { %12 = vsyncpa [#allocation7], 0 }
   0x2   :  { %13 = vsyncpa [#allocation10], 0 }
   0x3   :  { %14 = vsyncpa [#allocation13], 0 }
   0x4   :  { %15 = vsyncpa [#allocation5], 0  ;;  %s486_s21 = smov [#allocation6]   ;;  %s487_s23 = smov [#allocation9]  }
   0x5   :  { %s33_s22 = sshll.u32 %s486_s21, 4  ;;  %s55_s24 = sshll.u32 %s487_s23, 4  ;;  %s34_s22 = int_to_ptr.vmem [resolvable:$true] %s33_s22  ;;  %s532_s24 = int_to_ptr.vmem [resolvable:$true] %s55_s24 }
   0x6   :  { %s322_s27 = scalar_lea.hbm %s645_s1, 256 }
   0x7   :  { %p323_p0 = scmp.ne.s32.totalorder %s645_s1, %s322_s27  ;;  %p326_p1 = scmp.lt.u32.totalorder %s322_s27, %s645_s1 }
   0x9   :  { %p328_p2 = pnand %p326_p1, %p323_p0 }
   0xb   :  { %331 = shalt.err (!%p328_p2)
}
   0xc   :  { %s332_s8 = scalar_lea.vmem %s34_s22, 256  ;;  %p337_p4 = scmp.lt.s32.totalorder %s34_s22, %s34_s22 }
   0xd   :  { %p333_p3 = scmp.ne.s32.totalorder %s34_s22, %s332_s8  ;;  %p338_p5 = scmp.lt.s32.totalorder %s332_s8, %s332_s8 }
   0xf   :  { %p339_p6 = por %p338_p5, %p337_p4 }
  0x11   :  { %p340_p7 = pnand %p339_p6, %p333_p3 }
  0x13   :  { %343 = shalt.err (!%p340_p7)
}
  0x14   :  { %s488_s9 = smov 64   ;;  %s489_s10 = smov 4  }
  0x15   :  { %39 = dma.hbm_to_vmem [thread:$0]  %s645_s1, 256, %s34_s22, [#allocation7], %s488_s9, %s488_s9, %s489_s10  }
  0x16   :  { %s344_s15 = scalar_lea.hbm %s647_s3, 128 }
  0x17   :  { %p345_p8 = scmp.ne.s32.totalorder %s647_s3, %s344_s15  ;;  %p348_p9 = scmp.lt.u32.totalorder %s344_s15, %s647_s3 }
  0x19   :  { %p350_p10 = pnand %p348_p9, %p345_p8 }
  0x1b   :  { %353 = shalt.err (!%p350_p10)
}
  0x1c   :  { %s354_s20 = scalar_lea.vmem %s532_s24, 128  ;;  %p359_p12 = scmp.lt.s32.totalorder %s532_s24, %s532_s24 }
  0x1d   :  { %p355_p11 = scmp.ne.s32.totalorder %s532_s24, %s354_s20  ;;  %p360_p13 = scmp.lt.s32.totalorder %s354_s20, %s354_s20 }
  0x1f   :  { %p361_p0 = por %p360_p13, %p359_p12 }
  0x21   :  { %p362_p1 = pnand %p361_p0, %p355_p11 }
  0x23   :  { %365 = shalt.err (!%p362_p1)
}
  0x24   :  { %61 = dma.hbm_to_vmem [thread:$0]  %s647_s3, 128, %s532_s24, [#allocation10], %s488_s9, %s488_s9, %s489_s10  }
  0x25   :  { %s490_s22 = smov [#allocation3]   ;;  %s491_s25 = smov [#allocation8]  }
  0x26   :  { %s21_s23 = sshll.u32 %s490_s22, 4  ;;  %s46_s26 = sshll.u32 %s491_s25, 4  ;;  %s22_s23 = int_to_ptr.vmem [resolvable:$true] %s21_s23  ;;  %s47_s26 = int_to_ptr.vmem [resolvable:$true] %s46_s26 }
  0x27   :  { %s366_s29 = scalar_lea.hbm %s644_s0, 128 }
  0x28   :  { %p367_p2 = scmp.ne.s32.totalorder %s644_s0, %s366_s29  ;;  %p370_p3 = scmp.lt.u32.totalorder %s366_s29, %s644_s0 }
  0x2a   :  { %p372_p4 = pnand %p370_p3, %p367_p2 }
  0x2c   :  { %375 = shalt.err (!%p372_p4)
}
  0x2d   :  { %s376_s3 = scalar_lea.vmem %s22_s23, 128  ;;  %p381_p6 = scmp.lt.s32.totalorder %s22_s23, %s22_s23 }
  0x2e   :  { %p377_p5 = scmp.ne.s32.totalorder %s22_s23, %s376_s3  ;;  %p382_p7 = scmp.lt.s32.totalorder %s376_s3, %s376_s3 }
  0x30   :  { %p383_p8 = por %p382_p7, %p381_p6 }
  0x32   :  { %p384_p9 = pnand %p383_p8, %p377_p5 }
  0x34   :  { %387 = shalt.err (!%p384_p9)
}
  0x35   :  { %27 = dma.hbm_to_vmem [thread:$0]  %s644_s0, 128, %s22_s23, [#allocation4], %s488_s9, %s488_s9, %s489_s10  }
  0x36   :  { %s388_s15 = scalar_lea.hbm %s646_s2, 16 }
  0x37   :  { %p389_p10 = scmp.ne.s32.totalorder %s646_s2, %s388_s15  ;;  %p392_p11 = scmp.lt.u32.totalorder %s388_s15, %s646_s2 }
  0x39   :  { %p394_p12 = pnand %p392_p11, %p389_p10 }
  0x3b   :  { %397 = shalt.err (!%p394_p12)
}
  0x3c   :  { %s398_s20 = scalar_lea.vmem %s47_s26, 16  ;;  %s402_s1 = scalar_lea.vmem %s47_s26, 32 }
  0x3d   :  { %p399_p13 = scmp.ne.s32.totalorder %s47_s26, %s398_s20  ;;  %p403_p0 = scmp.lt.s32.totalorder %s47_s26, %s47_s26 }
  0x3e   :  { %p404_p1 = scmp.lt.s32.totalorder %s402_s1, %s398_s20 }
  0x40   :  { %p405_p2 = por %p404_p1, %p403_p0 }
  0x42   :  { %p406_p3 = pnand %p405_p2, %p399_p13 }
  0x44   :  { %409 = shalt.err (!%p406_p3)
}
  0x45   :  { %49 = dma.hbm_to_vmem [thread:$0]  %s646_s2, 16, %s47_s26, [#allocation7]  }
  0x46   :  { %s492_s22 = smov [#allocation11]   ;;  %s493_s25 = smov [#allocation12]  }
  0x47   :  { %s68_s23 = sshll.u32 %s492_s22, 4  ;;  %s78_s27 = sshll.u32 %s493_s25, 4  ;;  %s69_s23 = int_to_ptr.vmem [resolvable:$true] %s68_s23  ;;  %s79_s27 = int_to_ptr.vmem [resolvable:$true] %s78_s27 }
  0x48   :  { %s410_s30 = scalar_lea.hbm %s648_s4, 16 }
  0x49   :  { %p411_p4 = scmp.ne.s32.totalorder %s648_s4, %s410_s30  ;;  %p414_p5 = scmp.lt.u32.totalorder %s410_s30, %s648_s4 }
  0x4b   :  { %p416_p6 = pnand %p414_p5, %p411_p4 }
  0x4d   :  { %419 = shalt.err (!%p416_p6)
}
  0x4e   :  { %s420_s2 = scalar_lea.vmem %s69_s23, 16  ;;  %s424_s26 = scalar_lea.vmem %s69_s23, 32 }
  0x4f   :  { %p421_p7 = scmp.ne.s32.totalorder %s69_s23, %s420_s2  ;;  %p425_p8 = scmp.lt.s32.totalorder %s69_s23, %s69_s23 }
  0x50   :  { %p426_p9 = scmp.lt.s32.totalorder %s424_s26, %s420_s2 }
  0x52   :  { %p427_p10 = por %p426_p9, %p425_p8 }
  0x54   :  { %p428_p11 = pnand %p427_p10, %p421_p7 }
  0x56   :  { %431 = shalt.err (!%p428_p11)
}
  0x57   :  { %71 = dma.hbm_to_vmem [thread:$0]  %s648_s4, 16, %s69_s23, [#allocation10]  }
  0x58   :  { %s432_s15 = scalar_lea.hbm %s649_s5, 16 }
  0x59   :  { %p433_p12 = scmp.ne.s32.totalorder %s649_s5, %s432_s15  ;;  %p436_p13 = scmp.lt.u32.totalorder %s432_s15, %s649_s5 }
  0x5b   :  { %p438_p0 = pnand %p436_p13, %p433_p12 }
  0x5d   :  { %441 = shalt.err (!%p438_p0)
}
  0x5e   :  { %s442_s20 = scalar_lea.vmem %s79_s27, 16  ;;  %s446_s1 = scalar_lea.vmem %s79_s27, 32 }
  0x5f   :  { %p443_p1 = scmp.ne.s32.totalorder %s79_s27, %s442_s20  ;;  %p447_p2 = scmp.lt.s32.totalorder %s79_s27, %s79_s27 }
  0x60   :  { %p448_p3 = scmp.lt.s32.totalorder %s446_s1, %s442_s20 }
  0x62   :  { %p449_p4 = por %p448_p3, %p447_p2 }
  0x64   :  { %p450_p5 = pnand %p449_p4, %p443_p1 }
  0x66   :  { %453 = shalt.err (!%p450_p5)
}
  0x67   :  { %81 = dma.hbm_to_vmem [thread:$0]  %s649_s5, 16, %s79_s27, [#allocation13]  }
  0x68   :  { %476 = dma.done.wait [#allocation4], 128  }
  0x69   :  { %477 = vsyncadd [#allocation4], 4294967168 }
  0x6a   :  { %478 = dma.done.wait [#allocation7], 272  }
  0x6b   :  { %479 = vsyncadd [#allocation7], 4294967024 }
  0x6c   :  { %480 = dma.done.wait [#allocation10], 144  }
  0x6d   :  { %481 = vsyncadd [#allocation10], 4294967152 }
  0x6e   :  { %482 = dma.done.wait [#allocation13], 16  }
  0x6f   :  { %483 = vsyncadd [#allocation13], 4294967280  ;;  %vm105_vm0 = vcmask 261120   ;;  %v494_v0 = vmov 0.0   ;;  %vm495_vm1 = vmmov 0   ;;  %v315_v1 = vld [vmem:[#allocation6] sm:$0xff]  }
  0x70   :  { %106 = vst.msk [vmem:[#allocation2] sm:$0xff] %vm105_vm0, %v494_v0  ;;  %107 = vst.msk [vmem:[#allocation2 + $0x8] sm:$0xff] %vm105_vm0, %v494_v0  ;;  %296 = vmatprep.subr.bf16.mxu0 %v494_v0  ;;  %300 = vmatprep.mubr.msk.bf16.mxu0 %vm495_vm1, %v494_v0  ;;  %v316_v2 = vld [vmem:[#allocation6 + $0x8] sm:$0xff]   ;;  %v317_v3 = vld [vmem:[#allocation3] sm:$0xff]   ;;  %vm255_vm2 = vcmask 257024   ;;  %s496_s5 = smov [#allocation14]  }
  0x71   :  { %297 = vmatpush3.bf16.msra.mxu0 %v315_v1  ;;  %v290_v12 = vld [vmem:[#allocation9] sm:$0xff]   ;;  %v282_v13 = vld [vmem:[#allocation8] ss:$0 sm:$0xff]  ;;  %v283_v41 = vld [vmem:[#allocation11] ss:$0 sm:$0xff]  ;;  %s263_s21 = sshll.u32 %s496_s5, 4  ;;  %s264_s21 = int_to_ptr.vmem [resolvable:$true] %s263_s21 }
  0x72   :  { %298 = vmatprep.subr.bf16.mxu0 %v494_v0  ;;  %v291_v14 = vunpack.c.l.bf16 %v290_v12  ;;  %v292_v17 = vunpack.c.h.bf16 %v290_v12  ;;  %v284_v43 = vld [vmem:[#allocation12] ss:$0 sm:$0xff]  ;;  %s454_s22 = scalar_lea.vmem %s264_s21, 128  ;;  %p459_p7 = scmp.lt.s32.totalorder %s264_s21, %s264_s21 }
  0x73   :  { %p455_p6 = scmp.ne.s32.totalorder %s264_s21, %s454_s22  ;;  %p460_p8 = scmp.lt.s32.totalorder %s454_s22, %s454_s22 }
  0x75   :  { %299 = vmatpush3.bf16.msra.mxu0 %v316_v2  ;;  %p461_p9 = por %p460_p8, %p459_p7 }
  0x77   :  { %v108_v4 = vld [vmem:[#allocation2] sm:$0xff]  ;;  %v109_v6 = vld [vmem:[#allocation2 + $0x8] sm:$0xff]  ;;  %p462_p10 = pnand %p461_p9, %p455_p6 }
  0x78   :  { %301 = vmatmul.mubr.msk.bf16.vlgmr.msra.gmra.mrb[0].mxu0 %vm105_vm0, %v317_v3 }
 0x14b   :  { %v171_v5 = vpop.f32.mrb[0].mxu0 }
 0x14c   :  { %v178_v7 = vadd.f32 %v171_v5, %v108_v4  ;;  %v302_v8 = vpop.f32.mrb[1].mxu0 }
 0x14d   :  { %v174_v9 = vpop.f32.mrb[2].mxu0 }
 0x14e   :  { %180 = vst.msk [vmem:[#allocation2] sm:$0xff] %vm105_vm0, %v178_v7  ;;  %v179_v10 = vadd.f32 %v174_v9, %v109_v6  ;;  %v303_v11 = vpop.f32.mrb[3].mxu0 }
 0x150   :  { %181 = vst.msk [vmem:[#allocation2 + $0x8] sm:$0xff] %vm105_vm0, %v179_v10 }
 0x155   :  { %v185_v15 = vld [vmem:[#allocation2] sm:$0xff] }
 0x156   :  { %v194_v16 = vadd.f32 %v282_v13, %v185_v15 }
 0x157   :  { %v186_v18 = vld [vmem:[#allocation2 + $0x8] sm:$0xff] }
 0x158   :  { %v200_v19 = vadd.f32 %v291_v14, %v194_v16  ;;  %v195_v20 = vadd.f32 %v282_v13, %v186_v18 }
 0x15a   :  { %v202_v21 = vsel %vm105_vm0, %v200_v19, 0.0  ;;  %v201_v22 = vadd.f32 %v292_v17, %v195_v20 }
 0x15b   :  { %203 = vadd.xlane.f32.xlu0 %v202_v21 }
 0x15c   :  { %v205_v23 = vsel %vm105_vm0, %v201_v22, 0.0 }
 0x15f   :  { %206 = vadd.xlane.f32.xlu0 %v205_v23 }
 0x1e8   :  { %v204_v24 = vpop.xlane.xlu0 %203 }
 0x1e9   :  { %v209_v25 = vmul.f32 0.03125, %v204_v24 }
 0x1eb   :  { %v211_v26 = vsub.f32 %v200_v19, %v209_v25 }
 0x1ec   :  { %v207_v27 = vpop.xlane.xlu0 %206 }
 0x1ed   :  { %v210_v28 = vmul.f32 0.03125, %v207_v27  ;;  %v213_v29 = vmul.f32 %v211_v26, %v211_v26 }
 0x1ef   :  { %v212_v30 = vsub.f32 %v201_v22, %v210_v28  ;;  %v215_v31 = vsel %vm105_vm0, %v213_v29, 0.0 }
 0x1f0   :  { %216 = vadd.xlane.f32.xlu1 %v215_v31 }
 0x1f1   :  { %v214_v32 = vmul.f32 %v212_v30, %v212_v30 }
 0x1f3   :  { %v218_v33 = vsel %vm105_vm0, %v214_v32, 0.0 }
 0x1f4   :  { %219 = vadd.xlane.f32.xlu1 %v218_v33 }
 0x27d   :  { %v217_v34 = vpop.xlane.xlu1 %216 }
 0x27e   :  { %v221_v35 = vmul.f32 0.03125, %v217_v34 }
 0x280   :  { %v223_v36 = vadd.f32 1e-05, %v221_v35 }
 0x281   :  { %v220_v37 = vpop.xlane.xlu1 %219 }
 0x282   :  { %318 = vrsqrt.f32 %v223_v36  ;;  %v222_v38 = vmul.f32 0.03125, %v220_v37 }
 0x284   :  { %v224_v39 = vadd.f32 1e-05, %v222_v38 }
 0x286   :  { %320 = vrsqrt.f32 %v224_v39 }
 0x28c   :  { %v319_v40 = vpop.eup %318 }
 0x28d   :  { %v227_v42 = vmul.f32 %v319_v40, %v211_v26 }
 0x28f   :  { %v236_v44 = vmul.f32 %v283_v41, %v227_v42 }
 0x290   :  { %v321_v45 = vpop.eup %320 }
 0x291   :  { %v228_v46 = vmul.f32 %v321_v45, %v212_v30  ;;  %v245_v47 = vadd.f32 %v284_v43, %v236_v44 }
 0x293   :  { %v237_v48 = vmul.f32 %v283_v41, %v228_v46  ;;  %v287_v49 = vpack.c.bf16 %v245_v47, %v245_v47 }
 0x295   :  { %v246_v50 = vadd.f32 %v284_v43, %v237_v48  ;;  %256 = vst.msk [vmem:[#allocation14] sm:$0xf] %vm255_vm2, %v287_v49 }
 0x297   :  { %v288_v51 = vpack.c.bf16 %v246_v50, %v246_v50 }
 0x299   :  { %257 = vst.msk [vmem:[#allocation14 + $0x4] sm:$0xf] %vm255_vm2, %v288_v51 }
 0x29a   :  { %465 = shalt.err (!%p462_p10)
}
 0x29b   :  { %s466_s27 = scalar_lea.hbm %s650_s6, 128 }
 0x29c   :  { %p467_p11 = scmp.ne.s32.totalorder %s650_s6, %s466_s27  ;;  %p470_p12 = scmp.lt.u32.totalorder %s466_s27, %s650_s6 }
 0x29e   :  { %p472_p13 = pnand %p470_p12, %p467_p11 }
 0x2a0   :  { %475 = shalt.err (!%p472_p13)
}
 0x2a1   :  { %269 = dma.vmem_to_hbm [thread:$0]  %s264_s21, 128, %s650_s6, [#allocation5], %s488_s9, %s488_s9, %s489_s10  }
 0x2a2   :  { %484 = dma.done.wait [#allocation5], 128  }
 0x2a3   :  { %485 = vsyncadd [#allocation5], 4294967168 }
 0x2a4   :  { %273 = vsyncpa [#allocation4], 1 }
 0x2a5   :  { %274 = vsyncpa [#allocation7], 1 }
 0x2a6   :  { %275 = vsyncpa [#allocation10], 1 }
 0x2a7   :  { %276 = vsyncpa [#allocation13], 1 }
 0x2a8   :  { %277 = vsyncpa [#allocation5], 1 }

// kernel: transformer_forward.25
= control target key start
LH: loop header
LB: loop body
LE: loop exit
PB: predicated region body
PF: predicated region fallthrough
CT: control target
= control target key end

     0   :  { %s1285_s0 = inlined_call_operand.hbm [shape: bf16[2,4,8,8], index: 0, kind: input, shape index: {}]   ;;  %s1286_s1 = inlined_call_operand.hbm [shape: bf16[2,4,8,8], index: 1, kind: input, shape index: {}]   ;;  %s1287_s2 = inlined_call_operand.hbm [shape: bf16[2,4,8,8], index: 2, kind: input, shape index: {}]   ;;  %s1288_s3 = inlined_call_operand.hbm [shape: bf16[2,4,8,8], index: 3, kind: output, shape index: {}]  }
   0x1   :  { %1298 = sst [smem:[#allocation21_spill]] %s1286_s1 }
   0x2   :  { %8 = vsyncpa [#allocation6], 0 }
   0x3   :  { %10 = vsyncpa [#allocation6 + $0x1], 0 }
   0x4   :  { %11 = vsyncpa [#allocation9], 0 }
   0x5   :  { %13 = vsyncpa [#allocation9 + $0x1], 0 }
   0x6   :  { %14 = vsyncpa [#allocation7], 0 }
   0x7   :  { %16 = vsyncpa [#allocation7 + $0x1], 0  ;;  %s988_s12 = smov 0   ;;  %s990_s13 = smov 0  }
   0x8   :  { %s992_s14 = smov 0   ;;  %s994_s15 = smov 0  }
   0x9   :  { %s996_s16 = smov 0   ;;  %s998_s17 = smov 0  }
   0xa   :  { %s1000_s18 = smov 0   ;;  %s1002_s19 = smov 0  }
   0xb LB: > { %1299 = sst [smem:[#allocation15_spill]] %s950_s17  ;;  %s1029_s20 = sadd.s32 4294967295, %s958_s19   ;;  %s958_s19 = sphi %s1002_s19, %s22_s19   ;;  %s954_s18 = sphi %s1000_s18, %s1326_s18   ;;  %s950_s17 = sphi %s998_s17, %s1325_s17   ;;  %s946_s16 = sphi %s996_s16, %s1324_s16   ;;  %s942_s15 = sphi %s994_s15, %s1323_s15   ;;  %s938_s14 = sphi %s992_s14, %s1329_s14   ;;  %s934_s13 = sphi %s990_s13, %s1328_s13   ;;  %s930_s12 = sphi %s988_s12, %s1327_s12  }
   0xc   : > { %1300 = sst [smem:[#allocation16_spill]] %s954_s18  ;;  %s626_s21 = sadd.s32 4294967294, %s958_s19  }
   0xd   : > { %s44_s22 = sadd.s32 1, %s950_s17  ;;  %s48_s23 = sadd.s32 1, %s954_s18 }
   0xe   : > { %p46_p0 = scmp.ge.s32.totalorder %s44_s22, 4  ;;  %s59_s24 = sadd.s32 1, %s938_s14 }
   0xf   : > { %p66_p1 = scmp.ne.s32.totalorder %s938_s14, %s934_s13  ;;  %p67_p2 = scmp.eq.s32.totalorder %s958_s19, 0 }
  0x10   : > { %s1331_s22 = smov (%p46_p0, %s44_s22), 0  ;;  %s1333_s23 = smov (!%p46_p0, %s48_s23), %s954_s18 }
  0x11   : > { %1301 = sst [smem:[#allocation17_spill]] %s1331_s22  ;;  %s53_s25 = ssub.s32 %s950_s17, %s1331_s22 }
  0x12   : > { %p1043_p3 = por %p67_p2, %p66_p1  ;;  %p50_p4 = scmp.ge.s32.totalorder %s1333_s23, 2 }
  0x13   : > { %p72_p5 = scmp.ne.s32.totalorder %s934_s13, %s930_s12  ;;  %p73_p6 = scmp.eq.s32.totalorder %s1029_s20, 0 }
  0x14   : > { %p160_p7 = scmp.eq.s32.totalorder %s1029_s20, 7  ;;  %s1335_s23 = smov (%p50_p4, %s1333_s23), 0 }
  0x15   : > { %1303 = sst [smem:[#allocation18_spill]] %s1335_s23  ;;  %p1053_p8 = por %p73_p6, %p72_p5 }
  0x16   : > { %p1057_p9 = por %p160_p7, %p66_p1  ;;  %s52_s29 = ssub.s32 %s954_s18, %s1335_s23 }
  0x17   : > { %s1304_s27 = scalar_select %p1053_p8, 1, 0 }
  0x18   : > { %s1305_s28 = scalar_select %p1057_p9, 1, 0 }
  0x19   : > { %p166_p10 = scmp.eq.s32.totalorder %s626_s21, 7  ;;  %s54_s30 = sor.u32 %s53_s25, %s52_s29 }
  0x1a   : > { %p57_p11 = scmp.eq.s32.totalorder %s54_s30, 0  ;;  %p688_p13 = scmp.lt.s32.totalorder %s958_s19, 8 }
  0x1b   : > { %p1063_p12 = por %p166_p10, %p72_p5  ;;  %s1289_s5 = sand.u32 1, %s938_s14  }
  0x1c   : > { %s1070_s6 = scalar_select %p57_p11, %s938_s14, %s59_s24  }
  0x1d   : > { %s1306_s4 = scalar_select %p1063_p12, 1, 0 }
  0x1e   : > { %1308 = sst [smem:[#allocation20_spill]] %s1070_s6  ;;  %s1074_s7 = sshll.u32 %s1289_s5, 2 }
  0x1f   : > { %1307 = sst [smem:[#allocation19_spill]] %s1306_s4  ;;  %s630_s8 = sshll.u32 %s954_s18, 2 }
  0x20   : > { %s196_s9 = sadd.s32 %s950_s17, %s630_s8  ;;  %p1080_p0 = pnand %p688_p13, %p1043_p3 }
  0x21   : > { %s1084_s11 = sshll.u32 %s196_s9, 6  ;;  %s207_s21 = sand.u32 1, %s958_s19  }
  0x22   : > { %s1309_s10 = scalar_select %p1080_p0, 1, 0 }
  0x23   : > { %s1310_s1 = sld [smem:[#allocation21_spill]]  ;;  %s211_s30 = scalar_lea.vmem [#allocation8], %s1074_s7 }
  0x24   : > { %s221_s26 = sshll.u32 %s211_s30, 4  ;;  %s1098_s8 = scalar_lea.sflag [#allocation9], %s207_s21  ;;  %s1095_s26 = int_to_ptr.vmem [resolvable:$true] %s221_s26 }
  0x25   : > { %p1104_p4 = pneg %p1080_p0 }
  0x29   : > { %s1091_s24 = scalar_lea.hbm %s1310_s1, %s1084_s11  ;;  %s771_s30 = scalar_lea.hbm %s1310_s1, 512 }
  0x2a   : > { %s766_s9 = scalar_lea.hbm %s1091_s24, 64  ;;  %p772_p7 = scmp.lt.u32.totalorder %s1091_s24, %s1310_s1 }
  0x2b   : > { %p767_p3 = scmp.ne.s32.totalorder %s1091_s24, %s766_s9  ;;  %p773_p10 = scmp.lt.u32.totalorder %s771_s30, %s766_s9 }
  0x2c   : > { %p775_p13 = scmp.lt.u32.totalorder %s766_s9, %s1091_s24 }
  0x2d   : > { %p769_p5 = pnand %p1104_p4, %p767_p3  ;;  %p774_p11 = por %p773_p10, %p772_p7 }
  0x2f   : > { %p770_p6 = pneg %p769_p5  ;;  %p776_p1 = por %p775_p13, %p774_p11 }
  0x31   : > { %p777_p2 = pnand %p776_p1, %p770_p6 }
  0x33   : > { %780 = shalt.err (!%p777_p2)
}
  0x34   : > { %s781_s21 = scalar_lea.vmem %s1095_s26, 64  ;;  %s960_s25 = smov [#allocation8]  }
  0x35   : > { %p782_p3 = scmp.ne.s32.totalorder %s1095_s26, %s781_s21  ;;  %s786_s29 = sshll.u32 %s960_s25, 4  ;;  %s787_s29 = int_to_ptr.vmem [resolvable:$false] %s786_s29 }
  0x36   : > { %s788_s22 = scalar_lea.vmem %s787_s29, 128  ;;  %p789_p9 = scmp.lt.s32.totalorder %s1095_s26, %s787_s29 }
  0x37   : > { %p784_p5 = pnand %p782_p3, %p1104_p4  ;;  %p790_p8 = scmp.lt.s32.totalorder %s788_s22, %s781_s21 }
  0x39   : > { %p785_p12 = pneg %p784_p5  ;;  %p791_p7 = por %p790_p8, %p789_p9 }
  0x3b   : > { %p792_p10 = pnand %p791_p7, %p785_p12 }
  0x3d   : > { %795 = shalt.err (!%p792_p10)
}
  0x3e   : > { %680 = dma.hbm_to_vmem [thread:$0]  (!%p1080_p0), %s1091_s24, 64, %s1095_s26, %s1098_s8  }
  0x3f   : > { %p1312_p1 = scmp.lt.s32.totalorder %s958_s19, 9  ;;  %p1313_p2 = scmp.ge.s32.totalorder %s958_s19, 1 }
  0x40   : > { %s1140_s21 = scalar_lea.hbm %s1285_s0, %s1084_s11  ;;  %s190_s25 = scalar_lea.vmem [#allocation5], %s1074_s7 }
  0x41   : > { %p1132_p6 = pnand %p1313_p2, %p1312_p1  ;;  %s200_s29 = sshll.u32 %s190_s25, 4  ;;  %s1143_s29 = int_to_ptr.vmem [resolvable:$true] %s200_s29 }
  0x42   : > { %s1149_s22 = scalar_lea.hbm %s1287_s2, %s1084_s11  ;;  %s1315_s1 = sand.u32 1, %s938_s14  }
  0x43   : > { %s1314_s23 = scalar_select %p1132_p6, 1, 0 }
  0x44   : > { %s187_s18 = scalar_lea.sflag [#allocation6], %s1315_s1  ;;  %s796_s17 = scalar_lea.hbm %s1140_s21, 64 }
  0x45   : > { %p797_p8 = scmp.ne.s32.totalorder %s1140_s21, %s796_s17  ;;  %s801_s6 = scalar_lea.hbm %s1285_s0, 512 }
  0x46   : > { %p802_p11 = scmp.lt.u32.totalorder %s1140_s21, %s1285_s0  ;;  %p803_p13 = scmp.lt.u32.totalorder %s801_s6, %s796_s17 }
  0x47   : > { %p799_p9 = pnand %p797_p8, %p1104_p4  ;;  %p805_p5 = scmp.lt.u32.totalorder %s796_s17, %s1140_s21 }
  0x48   : > { %p804_p3 = por %p803_p13, %p802_p11 }
  0x49   : > { %p800_p12 = pneg %p799_p9 }
  0x4a   : > { %p806_p7 = por %p805_p5, %p804_p3 }
  0x4c   : > { %p807_p10 = pnand %p806_p7, %p800_p12 }
  0x4e   : > { %810 = shalt.err (!%p807_p10)
}
  0x4f   : > { %s811_s1 = scalar_lea.vmem %s1143_s29, 64  ;;  %s961_s11 = smov [#allocation5]  }
  0x50   : > { %p812_p1 = scmp.ne.s32.totalorder %s1143_s29, %s811_s1  ;;  %s816_s24 = sshll.u32 %s961_s11, 4  ;;  %s817_s24 = int_to_ptr.vmem [resolvable:$false] %s816_s24 }
  0x51   : > { %s818_s4 = scalar_lea.vmem %s817_s24, 128  ;;  %p819_p9 = scmp.lt.s32.totalorder %s1143_s29, %s817_s24 }
  0x52   : > { %p814_p2 = pnand %p812_p1, %p1104_p4  ;;  %p820_p6 = scmp.lt.s32.totalorder %s818_s4, %s811_s1 }
  0x54   : > { %p815_p8 = pneg %p814_p2  ;;  %p821_p11 = por %p820_p6, %p819_p9 }
  0x56   : > { %p822_p13 = pnand %p821_p11, %p815_p8 }
  0x58   : > { %825 = shalt.err (!%p822_p13)
}
  0x59   : > { %677 = dma.hbm_to_vmem [thread:$0]  (!%p1080_p0), %s1140_s21, 64, %s1143_s29, %s187_s18  }
  0x5a   : > { %s232_s17 = scalar_lea.vmem [#allocation10], %s1074_s7  ;;  %s826_s26 = scalar_lea.hbm %s1149_s22, 64 }
  0x5b   : > { %s242_s6 = sshll.u32 %s232_s17, 4  ;;  %p827_p12 = scmp.ne.s32.totalorder %s1149_s22, %s826_s26  ;;  %s243_s6 = int_to_ptr.vmem [resolvable:$true] %s242_s6 }
  0x5c   : > { %s831_s25 = scalar_lea.hbm %s1287_s2, 512  ;;  %p832_p5 = scmp.lt.u32.totalorder %s1149_s22, %s1287_s2 }
  0x5d   : > { %p829_p6 = pnand %p827_p12, %p1104_p4  ;;  %p833_p7 = scmp.lt.u32.totalorder %s831_s25, %s826_s26 }
  0x5e   : > { %p835_p1 = scmp.lt.u32.totalorder %s826_s26, %s1149_s22 }
  0x5f   : > { %p830_p3 = pneg %p829_p6  ;;  %p834_p10 = por %p833_p7, %p832_p5 }
  0x61   : > { %p836_p2 = por %p835_p1, %p834_p10 }
  0x63   : > { %p837_p8 = pnand %p836_p2, %p830_p3 }
  0x65   : > { %840 = shalt.err (!%p837_p8)
}
  0x66   : > { %s841_s18 = scalar_lea.vmem %s243_s6, 64  ;;  %s962_s7 = smov [#allocation10]  }
  0x67   : > { %p842_p9 = scmp.ne.s32.totalorder %s243_s6, %s841_s18  ;;  %s846_s21 = sshll.u32 %s962_s7, 4  ;;  %s847_s21 = int_to_ptr.vmem [resolvable:$false] %s846_s21 }
  0x68   : > { %s848_s29 = scalar_lea.vmem %s847_s21, 128  ;;  %p849_p12 = scmp.lt.s32.totalorder %s243_s6, %s847_s21 }
  0x69   : > { %p844_p11 = pnand %p842_p9, %p1104_p4  ;;  %p850_p6 = scmp.lt.s32.totalorder %s848_s29, %s841_s18 }
  0x6b   : > { %p845_p13 = pneg %p844_p11  ;;  %p851_p0 = por %p850_p6, %p849_p12 }
  0x6d   : > { %p852_p5 = pnand %p851_p0, %p845_p13 }
  0x6f   : > { %855 = shalt.err (!%p852_p5)
}
  0x70   : > { %p1316_p7 = scmp.ne.s32.totalorder %s1309_s10, 0  ;;  %p1317_p3 = scmp.ne.s32.totalorder %s1314_s23, 0 }
  0x71   : > { %s1196_s5 = sand.u32 (!%p1317_p3), 1, %s934_s13   ;;  %p1318_p0 = scmp.ne.s32.totalorder (!%p1317_p3), %s1304_s27, 0 }
  0x72   : > { %683 = dma.hbm_to_vmem [thread:$0]  (!%p1316_p7), %s1149_s22, 64, %s243_s6, %s1098_s8  }
  0x73   : > { %251 = sbr.rel (%p1317_p3) target bundleno = 948 (0x3b4), region = 32  ;;  %s1199_s24 = sshll.u32 (!%p1317_p3), %s1196_s5, 2 }
  0x74   : > { %s254_s4 = scalar_lea.sflag (!%p1317_p3), [#allocation6], %s1196_s5  ;;  %s257_s17 = scalar_lea.vmem (!%p1317_p3), [#allocation5], %s1199_s24 }
  0x7a   : > { %917 = dma.done.wait (%p1318_p0), %s254_s4, 64  }
  0x7b   : > { %919 = vsyncadd (%p1318_p0), %s254_s4, 4294967232  ;;  %s262_s10 = sand.u32 1, %s1029_s20   ;;  %s266_s23 = scalar_lea.vmem [#allocation8], %s1199_s24 }
  0x7c   : > { %s263_s8 = scalar_lea.sflag [#allocation9], %s262_s10 }
  0x7d   : > { %921 = dma.done.wait (%p1318_p0), %s263_s8, 128  }
  0x7e   : > { %923 = vsyncadd (%p1318_p0), %s263_s8, 4294967168  ;;  %vm316_vm0 = vcmask 64512   ;;  %v963_v0 = vmov 0.0   ;;  %vm964_vm1 = vmmov 0   ;;  %v319_v1 = vld [vmem:[%s266_s23] sm:$0xf] }
  0x7f   : > { %654 = vmatprep.subr.bf16.mxu0 %v963_v0  ;;  %317 = vst.msk [vmem:[#allocation4] sm:$0xff] %vm316_vm0, %v963_v0  ;;  %656 = vmatprep.mubr.msk.bf16.mxu0 %vm964_vm1, %v963_v0  ;;  %v325_v2 = vsel %vm316_vm0, %v319_v1, 0  ;;  %v318_v3 = vld [vmem:[%s257_s17] sm:$0xf]  ;;  %vm313_vm2 = vcmask 7168   ;;  %v966_v11 = vmov 0  }
  0x80   : > { %660 = vmatprep.subr.bf16.mxu1 %v963_v0  ;;  %662 = vmatprep.mubr.msk.bf16.mxu1 %vm964_vm1, %v963_v0  ;;  %v965_v4 = vmov -1e+30   ;;  %315 = vst.msk [vmem:[#allocation3] sm:$0xff] %vm313_vm2, %v963_v0  ;;  %vm404_vm3 = vcmask 1043456   ;;  %s275_s20 = scalar_lea.vmem [#allocation10], %s1199_s24  ;;  %s646_s27 = sshll.u32 %s946_s16, 2 }
  0x81   : > { %655 = vmatpush3.bf16.xpose.msra.mxu0 %v325_v2  ;;  %314 = vst.msk [vmem:[#allocation2] sm:$0xff] %vm313_vm2, %v965_v4  ;;  %758 = vset.pattern.permute.xlu0 %v966_v11  ;;  %v400_v16 = vld [vmem:[%s275_s20] sm:$0xf]  ;;  %s479_s22 = sadd.s32 %s942_s15, %s646_s27  ;;  %s307_s26 = scalar_lea.vmem [#allocation11], %s1199_s24  ;;  %vm464_vm4 = vcmask 60416  }
  0x82   : > { %759 = vset.pattern.permute.xlu1 %v966_v11  ;;  %v406_v17 = vsel %vm404_vm3, %v400_v16, 0  ;;  %s647_s6 = sshll.u32 %s479_s22, 6  ;;  %s483_s9 = sshll.u32 %s307_s26, 4  ;;  %s1233_s9 = int_to_ptr.vmem [resolvable:$true] %s483_s9 }
  0x83   : > { %661 = vmatpush3.bf16.msra.mxu1 %v406_v17  ;;  %s1231_s1 = scalar_lea.hbm %s1288_s3, %s647_s6  ;;  %s467_s15 = scalar_lea.sflag [#allocation7], %s1196_s5 }
  0x84   : > { %s856_s16 = scalar_lea.vmem %s1233_s9, 64  ;;  %p1319_p10 = scmp.ne.s32.totalorder %s1305_s28, 0 }
  0x85   : > { %p857_p4 = scmp.ne.s32.totalorder %s1233_s9, %s856_s16  ;;  %s967_s11 = smov [#allocation11]  }
  0x86   : > { %v392_v32 = vld [vmem:[#allocation4] sm:$0xff]  ;;  %s860_s18 = sshll.u32 %s967_s11, 4  ;;  %s861_s18 = int_to_ptr.vmem [resolvable:$false] %s860_s18 }
  0x87   : > { %v384_v26 = vld [vmem:[#allocation3] sm:$0xff]  ;;  %p858_p1 = pnand %p857_p4, %p1319_p10  ;;  %s862_s7 = scalar_lea.vmem %s861_s18, 128 }
  0x88   : > { %657 = vmatmul.mubr.msk.bf16.vlgmr.msra.gmra.mrb[0].mxu0 %vm316_vm0, %v318_v3  ;;  %v368_v12 = vld [vmem:[#allocation2] sm:$0xff]  ;;  %p863_p8 = scmp.lt.s32.totalorder %s1233_s9, %s861_s18  ;;  %p864_p9 = scmp.lt.s32.totalorder %s862_s7, %s856_s16 }
  0x89   : > { %p859_p2 = pneg %p858_p1 }
  0x8a   : > { %p865_p11 = por %p864_p9, %p863_p8 }
  0x8c   : > { %p866_p13 = pnand %p865_p11, %p859_p2 }
 0x15b   : > { %v361_v5 = vpop.f32.mrb[0].mxu0 }
 0x15c   : > { %v367_v6 = vmul.f32 0.35355338, %v361_v5  ;;  %v658_v7 = vpop.f32.mrb[1].mxu0 }
 0x15d   : > { %v364_v8 = vpop.f32.mrb[2].mxu0 }
 0x15e   : > { %v659_v9 = vpop.f32.mrb[3].mxu0  ;;  %v369_v10 = vsel %vm316_vm0, %v367_v6, -inf }
 0x15f   : > { %370 = vmax.xlane.f32.xlu0 %v369_v10 }
 0x1ec   : > { %v371_v13 = vpop.xlane.xlu0 %370 }
 0x1ed   : > { %v372_v14 = vmax.f32 %v368_v12, %v371_v13 }
 0x1ef   : > { %v373_v15 = vsub.f32 %v368_v12, %v372_v14  ;;  %450 = vst.msk [vmem:[#allocation2] sm:$0xff] %vm313_vm2, %v372_v14  ;;  %378 = vperm.xlu0 %758, %v372_v14  }
 0x1f1   : > { %v374_v24 = vmul.f32 1.442695, %v373_v15 }
 0x26e   : > { %v379_v18 = vpop.permute.xlu0 %378 }
 0x26f   : > { %v381_v19 = vsub.f32 %v367_v6, %v379_v18 }
 0x271   : > { %v382_v20 = vmul.f32 1.442695, %v381_v19 }
 0x273   : > { %760 = vpow2.f32 %v382_v20 }
 0x274   : > { %762 = vpow2.f32 %v374_v24 }
 0x27d   : > { %v761_v21 = vpop.eup %760 }
 0x27e   : > { %v386_v22 = vsel %vm316_vm0, %v761_v21, 0.0  ;;  %v399_v23 = vpack.c.bf16 %v761_v21, %v761_v21  ;;  %v763_v25 = vpop.eup %762 }
 0x27f   : > { %387 = vadd.xlane.f32.xlu1 %v386_v22  ;;  %v385_v27 = vmul.f32 %v763_v25, %v384_v26 }
 0x280   : > { %663 = vmatmul.mubr.msk.bf16.vlgmr.msra.gmra.mrb[0].mxu1 %vm316_vm0, %v399_v23 }
 0x290   : > { %395 = vperm.xlu1 %759, %v763_v25  }
 0x30c   : > { %v388_v28 = vpop.xlane.xlu1 %387 }
 0x30d   : > { %v389_v29 = vadd.f32 %v388_v28, %v385_v27 }
 0x30f   : > { %391 = vst.msk [vmem:[#allocation3] sm:$0xff] %vm313_vm2, %v389_v29 }
 0x310   : > { %v396_v33 = vpop.permute.xlu1 %395 }
 0x311   : > { %v398_v34 = vmul.f32 %v396_v33, %v392_v32 }
 0x316   : > { %v455_v30 = vld [vmem:[#allocation3] sm:$0xff] }
 0x317   : > { %764 = vrcp.f32 %v455_v30 }
 0x321   : > { %v765_v31 = vpop.eup %764 }
 0x322   : > { %459 = vperm.xlu1 %759, %v765_v31  }
 0x353   : > { %v442_v35 = vpop.f32.mrb[0].mxu1 }
 0x354   : > { %v448_v36 = vadd.f32 %v442_v35, %v398_v34  ;;  %v664_v37 = vpop.f32.mrb[1].mxu1 }
 0x355   : > { %v445_v38 = vpop.f32.mrb[2].mxu1 }
 0x356   : > { %449 = vst.msk [vmem:[#allocation4] sm:$0xff] %vm316_vm0, %v448_v36  ;;  %v665_v39 = vpop.f32.mrb[3].mxu1 }
 0x35d   : > { %v454_v40 = vld [vmem:[#allocation4] sm:$0xff] }
 0x3a1   : > { %v460_v41 = vpop.permute.xlu1 %459 }
 0x3a2   : > { %v462_v42 = vmul.f32 %v460_v41, %v454_v40 }
 0x3a4   : > { %v463_v43 = vpack.c.bf16 %v462_v42, %v462_v42 }
 0x3a6   : > { %465 = vst.msk [vmem:[%s307_s26] sm:$0xf] %vm464_vm4, %v463_v43 }
 0x3a7   : > { %869 = shalt.err (!%p866_p13)
}
 0x3a8   : > { %s870_s21 = scalar_lea.hbm %s1231_s1, 64  ;;  %s874_s24 = scalar_lea.hbm %s1288_s3, 512 }
 0x3a9   : > { %p871_p12 = scmp.ne.s32.totalorder %s1231_s1, %s870_s21  ;;  %p875_p7 = scmp.lt.u32.totalorder %s1231_s1, %s1288_s3 }
 0x3aa   : > { %p876_p3 = scmp.lt.u32.totalorder %s874_s24, %s870_s21  ;;  %p878_p4 = scmp.lt.u32.totalorder %s870_s21, %s1231_s1 }
 0x3ab   : > { %p872_p6 = pnand %p871_p12, %p1319_p10 }
 0x3ac   : > { %p877_p0 = por %p876_p3, %p875_p7 }
 0x3ad   : > { %p873_p5 = pneg %p872_p6 }
 0x3ae   : > { %p879_p1 = por %p878_p4, %p877_p0 }
 0x3b0   : > { %p880_p2 = pnand %p879_p1, %p873_p5 }
 0x3b2   : > { %883 = shalt.err (!%p880_p2)
}
 0x3b3   : > { %672 = dma.vmem_to_hbm [thread:$0]  (%p1319_p10), %s1233_s9, 64, %s1231_s1, %s467_s15  }
 0x3b4 PF: > { %s1320_s10 = sld [smem:[#allocation19_spill]]  ;;  %p689_p8 = scmp.ge.s32.totalorder %s958_s19, 2 }
 0x3b5   : > { %s495_s8 = sand.u32 1, %s930_s12  }
 0x3b6   : > { %s496_s23 = scalar_lea.sflag [#allocation7], %s495_s8 }
 0x3ba   : > { %p1321_p9 = scmp.ne.s32.totalorder %s1320_s10, 0 }
 0x3bc   : > { %p685_p11 = pnand %p689_p8, %p1321_p9 }
 0x3be   : > { %925 = dma.done.wait (!%p685_p11), %s496_s23, 64  }
 0x3bf   : > { %927 = vsyncadd (!%p685_p11), %s496_s23, 4294967232  ;;  %s22_s19 = sadd.s32 1, %s958_s19   ;;  %s1322_s28 = sld [smem:[#allocation20_spill]] }
 0x3c0   : > { %p19_p13 = scmp.ge.s32.totalorder %s22_s19, 10   ;;  %s1323_s15 = sld [smem:[#allocation15_spill]] }
 0x3c1   : > { %s1324_s16 = sld [smem:[#allocation16_spill]]  ;;  %s1325_s17 = sld [smem:[#allocation17_spill]] }
 0x3c2   : > { %s1326_s18 = sld [smem:[#allocation18_spill]]  ;;  %s1327_s12 = smov %s934_s13 }
 0x3c3   : > { %s1328_s13 = smov %s938_s14  ;;  %21 = sbr.rel (!%p19_p13) target bundleno = 11 (0xb), region = 109 }
 0x3c5   : > { %s1329_s14 = smov %s1322_s28 }
 0x3ca   :  { %501 = vsyncpa [#allocation6], 1 }
 0x3cb   :  { %503 = vsyncpa [#allocation6 + $0x1], 1 }
 0x3cc   :  { %504 = vsyncpa [#allocation9], 1 }
 0x3cd   :  { %506 = vsyncpa [#allocation9 + $0x1], 1 }
 0x3ce   :  { %507 = vsyncpa [#allocation7], 1 }
 0x3cf   :  { %509 = vsyncpa [#allocation7 + $0x1], 1 }

// kernel: transformer_forward.36
= control target key start
LH: loop header
LB: loop body
LE: loop exit
PB: predicated region body
PF: predicated region fallthrough
CT: control target
= control target key end

     0   :  { %8 = vsyncpa [#allocation4], 0  ;;  %s401_s0 = inlined_call_operand.hbm [shape: bf16[16,32], index: 0, kind: input, shape index: {}]   ;;  %s402_s1 = inlined_call_operand.hbm [shape: bf16[32,64], index: 1, kind: input, shape index: {}]   ;;  %s403_s2 = inlined_call_operand.hbm [shape: f32[1,64], index: 2, kind: input, shape index: {}]   ;;  %s404_s3 = inlined_call_operand.hbm [shape: bf16[16,64], index: 3, kind: output, shape index: {}]  }
   0x1   :  { %9 = vsyncpa [#allocation7], 0 }
   0x2   :  { %10 = vsyncpa [#allocation5], 0  ;;  %s305_s12 = smov [#allocation6]   ;;  %s306_s14 = smov [#allocation3]  }
   0x3   :  { %s28_s13 = sshll.u32 %s305_s12, 4  ;;  %s16_s15 = sshll.u32 %s306_s14, 4  ;;  %s29_s13 = int_to_ptr.vmem [resolvable:$true] %s28_s13  ;;  %s333_s15 = int_to_ptr.vmem [resolvable:$true] %s16_s15 }
   0x4   :  { %s211_s18 = scalar_lea.hbm %s402_s1, 256 }
   0x5   :  { %p212_p0 = scmp.ne.s32.totalorder %s402_s1, %s211_s18  ;;  %p215_p1 = scmp.lt.u32.totalorder %s211_s18, %s402_s1 }
   0x7   :  { %p217_p2 = pnand %p215_p1, %p212_p0 }
   0x9   :  { %220 = shalt.err (!%p217_p2)
}
   0xa   :  { %s221_s23 = scalar_lea.vmem %s29_s13, 256  ;;  %p226_p4 = scmp.lt.s32.totalorder %s29_s13, %s29_s13 }
   0xb   :  { %p222_p3 = scmp.ne.s32.totalorder %s29_s13, %s221_s23  ;;  %p227_p5 = scmp.lt.s32.totalorder %s221_s23, %s221_s23 }
   0xd   :  { %p228_p6 = por %p227_p5, %p226_p4 }
   0xf   :  { %p229_p7 = pnand %p228_p6, %p222_p3 }
  0x11   :  { %232 = shalt.err (!%p229_p7)
}
  0x12   :  { %s307_s24 = smov 64   ;;  %s308_s25 = smov 4  }
  0x13   :  { %34 = dma.hbm_to_vmem [thread:$0]  %s402_s1, 256, %s29_s13, [#allocation7], %s307_s24, %s307_s24, %s308_s25  }
  0x14   :  { %s233_s30 = scalar_lea.hbm %s401_s0, 128 }
  0x15   :  { %p234_p8 = scmp.ne.s32.totalorder %s401_s0, %s233_s30  ;;  %p237_p9 = scmp.lt.u32.totalorder %s233_s30, %s401_s0 }
  0x17   :  { %p239_p10 = pnand %p237_p9, %p234_p8 }
  0x19   :  { %242 = shalt.err (!%p239_p10)
}
  0x1a   :  { %s243_s8 = scalar_lea.vmem %s333_s15, 128  ;;  %p248_p12 = scmp.lt.s32.totalorder %s333_s15, %s333_s15 }
  0x1b   :  { %p244_p11 = scmp.ne.s32.totalorder %s333_s15, %s243_s8  ;;  %p249_p13 = scmp.lt.s32.totalorder %s243_s8, %s243_s8 }
  0x1d   :  { %p250_p0 = por %p249_p13, %p248_p12 }
  0x1f   :  { %p251_p1 = pnand %p250_p0, %p244_p11 }
  0x21   :  { %254 = shalt.err (!%p251_p1)
}
  0x22   :  { %22 = dma.hbm_to_vmem [thread:$0]  %s401_s0, 128, %s333_s15, [#allocation4], %s307_s24, %s307_s24, %s308_s25  }
  0x23   :  { %s309_s10 = smov [#allocation8]   ;;  %s255_s14 = scalar_lea.hbm %s403_s2, 16 }
  0x24   :  { %s41_s11 = sshll.u32 %s309_s10, 4  ;;  %p256_p2 = scmp.ne.s32.totalorder %s403_s2, %s255_s14  ;;  %s42_s11 = int_to_ptr.vmem [resolvable:$true] %s41_s11 }
  0x25   :  { %p259_p3 = scmp.lt.u32.totalorder %s255_s14, %s403_s2 }
  0x27   :  { %p261_p4 = pnand %p259_p3, %p256_p2 }
  0x29   :  { %264 = shalt.err (!%p261_p4)
}
  0x2a   :  { %s265_s20 = scalar_lea.vmem %s42_s11, 16  ;;  %s269_s0 = scalar_lea.vmem %s42_s11, 32 }
  0x2b   :  { %p266_p5 = scmp.ne.s32.totalorder %s42_s11, %s265_s20  ;;  %p270_p6 = scmp.lt.s32.totalorder %s42_s11, %s42_s11 }
  0x2c   :  { %p271_p7 = scmp.lt.s32.totalorder %s269_s0, %s265_s20 }
  0x2e   :  { %p272_p8 = por %p271_p7, %p270_p6 }
  0x30   :  { %p273_p9 = pnand %p272_p8, %p266_p5 }
  0x32   :  { %276 = shalt.err (!%p273_p9)
}
  0x33   :  { %44 = dma.hbm_to_vmem [thread:$0]  %s403_s2, 16, %s42_s11, [#allocation7]  }
  0x34   :  { %299 = dma.done.wait [#allocation4], 128  }
  0x35   :  { %300 = vsyncadd [#allocation4], 4294967168 }
  0x36   :  { %301 = dma.done.wait [#allocation7], 272  }
  0x37   :  { %302 = vsyncadd [#allocation7], 4294967024  ;;  %vm59_vm0 = vcmask 523264   ;;  %v310_v0 = vmov 0.0   ;;  %vm311_vm1 = vmmov 0   ;;  %v208_v1 = vld [vmem:[#allocation6] sm:$0xff]  }
  0x38   :  { %60 = vst.msk [vmem:[#allocation2] sm:$0xff] %vm59_vm0, %v310_v0  ;;  %61 = vst.msk [vmem:[#allocation2 + $0x8] sm:$0xff] %vm59_vm0, %v310_v0  ;;  %192 = vmatprep.subr.bf16.mxu0 %v310_v0  ;;  %196 = vmatprep.mubr.msk.bf16.mxu0 %vm311_vm1, %v310_v0  ;;  %v209_v2 = vld [vmem:[#allocation6 + $0x8] sm:$0xff]   ;;  %v210_v3 = vld [vmem:[#allocation3] sm:$0xff]   ;;  %vm87_vm2 = vcmask 261120   ;;  %vm159_vm3 = vcmask 519168  }
  0x39   :  { %193 = vmatpush3.bf16.msra.mxu0 %v208_v1  ;;  %v184_v12 = vld [vmem:[#allocation8] ss:$0 sm:$0xff]  ;;  %s312_s2 = smov [#allocation9]  }
  0x3a   :  { %194 = vmatprep.subr.bf16.mxu0 %v310_v0  ;;  %s167_s22 = sshll.u32 %s312_s2, 4  ;;  %s168_s22 = int_to_ptr.vmem [resolvable:$true] %s167_s22 }
  0x3b   :  { %s277_s23 = scalar_lea.vmem %s168_s22, 128  ;;  %p282_p11 = scmp.lt.s32.totalorder %s168_s22, %s168_s22 }
  0x3c   :  { %p278_p10 = scmp.ne.s32.totalorder %s168_s22, %s277_s23  ;;  %p283_p12 = scmp.lt.s32.totalorder %s277_s23, %s277_s23 }
  0x3d   :  { %195 = vmatpush3.bf16.msra.mxu0 %v209_v2 }
  0x3e   :  { %p284_p13 = por %p283_p12, %p282_p11 }
  0x3f   :  { %v62_v4 = vld [vmem:[#allocation2] sm:$0xff]  ;;  %v63_v6 = vld [vmem:[#allocation2 + $0x8] sm:$0xff] }
  0x40   :  { %197 = vmatmul.mubr.msk.bf16.vlgmr.msra.gmra.mrb[0].mxu0 %vm87_vm2, %v210_v3  ;;  %p285_p0 = pnand %p284_p13, %p278_p10 }
 0x113   :  { %v125_v5 = vpop.f32.mrb[0].mxu0 }
 0x114   :  { %v132_v7 = vadd.f32 %v125_v5, %v62_v4  ;;  %v198_v8 = vpop.f32.mrb[1].mxu0 }
 0x115   :  { %v128_v9 = vpop.f32.mrb[2].mxu0 }
 0x116   :  { %135 = vst.msk [vmem:[#allocation2] sm:$0xff] %vm59_vm0, %v132_v7  ;;  %v133_v10 = vadd.f32 %v128_v9, %v63_v6  ;;  %v199_v11 = vpop.f32.mrb[3].mxu0 }
 0x118   :  { %136 = vst.msk [vmem:[#allocation2 + $0x8] sm:$0xff] %vm59_vm0, %v133_v10 }
 0x11d   :  { %v140_v13 = vld [vmem:[#allocation2] sm:$0xff] }
 0x11e   :  { %v149_v14 = vadd.f32 %v184_v12, %v140_v13 }
 0x11f   :  { %v141_v15 = vld [vmem:[#allocation2 + $0x8] sm:$0xff] }
 0x120   :  { %v150_v16 = vadd.f32 %v184_v12, %v141_v15  ;;  %v187_v17 = vpack.c.bf16 %v149_v14, %v149_v14 }
 0x122   :  { %v188_v18 = vpack.c.bf16 %v150_v16, %v150_v16  ;;  %160 = vst.msk [vmem:[#allocation9] sm:$0xf] %vm159_vm3, %v187_v17 }
 0x124   :  { %161 = vst.msk [vmem:[#allocation9 + $0x4] sm:$0xf] %vm159_vm3, %v188_v18 }
 0x125   :  { %288 = shalt.err (!%p285_p0)
}
 0x126   :  { %s289_s28 = scalar_lea.hbm %s404_s3, 128 }
 0x127   :  { %p290_p1 = scmp.ne.s32.totalorder %s404_s3, %s289_s28  ;;  %p293_p2 = scmp.lt.u32.totalorder %s289_s28, %s404_s3 }
 0x129   :  { %p295_p3 = pnand %p293_p2, %p290_p1 }
 0x12b   :  { %298 = shalt.err (!%p295_p3)
}
 0x12c   :  { %173 = dma.vmem_to_hbm [thread:$0]  %s168_s22, 128, %s404_s3, [#allocation5], %s307_s24, %s307_s24, %s308_s25  }
 0x12d   :  { %303 = dma.done.wait [#allocation5], 128  }
 0x12e   :  { %304 = vsyncadd [#allocation5], 4294967168 }
 0x12f   :  { %177 = vsyncpa [#allocation4], 1 }
 0x130   :  { %178 = vsyncpa [#allocation7], 1 }
 0x131   :  { %179 = vsyncpa [#allocation5], 1 }

// kernel: transformer_forward.27
= control target key start
LH: loop header
LB: loop body
LE: loop exit
PB: predicated region body
PF: predicated region fallthrough
CT: control target
= control target key end

     0   :  { %12 = vsyncpa [#allocation4], 0  ;;  %s820_s0 = inlined_call_operand.hbm [shape: bf16[16,32], index: 0, kind: input, shape index: {}]   ;;  %s821_s1 = inlined_call_operand.hbm [shape: bf16[32,64], index: 1, kind: input, shape index: {}]   ;;  %s822_s2 = inlined_call_operand.hbm [shape: f32[1,64], index: 2, kind: input, shape index: {}]   ;;  %s823_s3 = inlined_call_operand.hbm [shape: bf16[64,32], index: 3, kind: input, shape index: {}]   ;;  %s824_s4 = inlined_call_operand.hbm [shape: f32[1,32], index: 4, kind: input, shape index: {}]   ;;  %s825_s5 = inlined_call_operand.hbm [shape: f32[1,32], index: 5, kind: input, shape index: {}]   ;;  %s826_s6 = inlined_call_operand.hbm [shape: f32[1,32], index: 6, kind: input, shape index: {}]   ;;  %s827_s7 = inlined_call_operand.hbm [shape: bf16[16,32], index: 7, kind: output, shape index: {}]  }
   0x1   :  { %13 = vsyncpa [#allocation7], 0 }
   0x2   :  { %14 = vsyncpa [#allocation10], 0 }
   0x3   :  { %15 = vsyncpa [#allocation13], 0 }
   0x4   :  { %16 = vsyncpa [#allocation5], 0  ;;  %s637_s24 = smov [#allocation6]   ;;  %s638_s26 = smov [#allocation9]  }
   0x5   :  { %s34_s25 = sshll.u32 %s637_s24, 4  ;;  %s56_s27 = sshll.u32 %s638_s26, 4  ;;  %s35_s25 = int_to_ptr.vmem [resolvable:$true] %s34_s25  ;;  %s689_s27 = int_to_ptr.vmem [resolvable:$true] %s56_s27 }
   0x6   :  { %s451_s30 = scalar_lea.hbm %s821_s1, 256 }
   0x7   :  { %p452_p0 = scmp.ne.s32.totalorder %s821_s1, %s451_s30  ;;  %p455_p1 = scmp.lt.u32.totalorder %s451_s30, %s821_s1 }
   0x9   :  { %p457_p2 = pnand %p455_p1, %p452_p0 }
   0xb   :  { %460 = shalt.err (!%p457_p2)
}
   0xc   :  { %s461_s12 = scalar_lea.vmem %s35_s25, 256  ;;  %p466_p4 = scmp.lt.s32.totalorder %s35_s25, %s35_s25 }
   0xd   :  { %p462_p3 = scmp.ne.s32.totalorder %s35_s25, %s461_s12  ;;  %p467_p5 = scmp.lt.s32.totalorder %s461_s12, %s461_s12 }
   0xf   :  { %p468_p6 = por %p467_p5, %p466_p4 }
  0x11   :  { %p469_p7 = pnand %p468_p6, %p462_p3 }
  0x13   :  { %472 = shalt.err (!%p469_p7)
}
  0x14   :  { %s639_s13 = smov 64   ;;  %s640_s14 = smov 4  }
  0x15   :  { %40 = dma.hbm_to_vmem [thread:$0]  %s821_s1, 256, %s35_s25, [#allocation7], %s639_s13, %s639_s13, %s640_s14  }
  0x16   :  { %s473_s19 = scalar_lea.hbm %s823_s3, 512 }
  0x17   :  { %p474_p8 = scmp.ne.s32.totalorder %s823_s3, %s473_s19  ;;  %p477_p9 = scmp.lt.u32.totalorder %s473_s19, %s823_s3 }
  0x19   :  { %p479_p10 = pnand %p477_p9, %p474_p8 }
  0x1b   :  { %482 = shalt.err (!%p479_p10)
}
  0x1c   :  { %s483_s24 = scalar_lea.vmem %s689_s27, 512  ;;  %p488_p12 = scmp.lt.s32.totalorder %s689_s27, %s689_s27 }
  0x1d   :  { %p484_p11 = scmp.ne.s32.totalorder %s689_s27, %s483_s24  ;;  %p489_p13 = scmp.lt.s32.totalorder %s483_s24, %s483_s24 }
  0x1f   :  { %p490_p0 = por %p489_p13, %p488_p12 }
  0x21   :  { %p491_p1 = pnand %p490_p0, %p484_p11 }
  0x23   :  { %494 = shalt.err (!%p491_p1)
}
  0x24   :  { %62 = dma.hbm_to_vmem [thread:$0]  %s823_s3, 512, %s689_s27, [#allocation10], %s639_s13, %s639_s13, %s640_s14  }
  0x25   :  { %s641_s26 = smov [#allocation12]   ;;  %s642_s29 = smov [#allocation3]  }
  0x26   :  { %s79_s28 = sshll.u32 %s641_s26, 4  ;;  %s22_s30 = sshll.u32 %s642_s29, 4  ;;  %s80_s28 = int_to_ptr.vmem [resolvable:$true] %s79_s28  ;;  %s726_s30 = int_to_ptr.vmem [resolvable:$true] %s22_s30 }
  0x27   :  { %s495_s10 = scalar_lea.hbm %s825_s5, 16 }
  0x28   :  { %p496_p2 = scmp.ne.s32.totalorder %s825_s5, %s495_s10  ;;  %p499_p3 = scmp.lt.u32.totalorder %s495_s10, %s825_s5 }
  0x2a   :  { %p501_p4 = pnand %p499_p3, %p496_p2 }
  0x2c   :  { %504 = shalt.err (!%p501_p4)
}
  0x2d   :  { %s505_s3 = scalar_lea.vmem %s80_s28, 16  ;;  %s509_s27 = scalar_lea.vmem %s80_s28, 32 }
  0x2e   :  { %p506_p5 = scmp.ne.s32.totalorder %s80_s28, %s505_s3  ;;  %p510_p6 = scmp.lt.s32.totalorder %s80_s28, %s80_s28 }
  0x2f   :  { %p511_p7 = scmp.lt.s32.totalorder %s509_s27, %s505_s3 }
  0x31   :  { %p512_p8 = por %p511_p7, %p510_p6 }
  0x33   :  { %p513_p9 = pnand %p512_p8, %p506_p5 }
  0x35   :  { %516 = shalt.err (!%p513_p9)
}
  0x36   :  { %82 = dma.hbm_to_vmem [thread:$0]  %s825_s5, 16, %s80_s28, [#allocation13]  }
  0x37   :  { %s517_s21 = scalar_lea.hbm %s820_s0, 128 }
  0x38   :  { %p518_p10 = scmp.ne.s32.totalorder %s820_s0, %s517_s21  ;;  %p521_p11 = scmp.lt.u32.totalorder %s517_s21, %s820_s0 }
  0x3a   :  { %p523_p12 = pnand %p521_p11, %p518_p10 }
  0x3c   :  { %526 = shalt.err (!%p523_p12)
}
  0x3d   :  { %s527_s25 = scalar_lea.vmem %s726_s30, 128  ;;  %p532_p0 = scmp.lt.s32.totalorder %s726_s30, %s726_s30 }
  0x3e   :  { %p528_p13 = scmp.ne.s32.totalorder %s726_s30, %s527_s25  ;;  %p533_p1 = scmp.lt.s32.totalorder %s527_s25, %s527_s25 }
  0x40   :  { %p534_p2 = por %p533_p1, %p532_p0 }
  0x42   :  { %p535_p3 = pnand %p534_p2, %p528_p13 }
  0x44   :  { %538 = shalt.err (!%p535_p3)
}
  0x45   :  { %28 = dma.hbm_to_vmem [thread:$0]  %s820_s0, 128, %s726_s30, [#allocation4], %s639_s13, %s639_s13, %s640_s14  }
  0x46   :  { %s643_s28 = smov [#allocation8]   ;;  %s644_s8 = smov [#allocation11]  }
  0x47   :  { %s47_s29 = sshll.u32 %s643_s28, 4  ;;  %s69_s9 = sshll.u32 %s644_s8, 4  ;;  %s48_s29 = int_to_ptr.vmem [resolvable:$true] %s47_s29  ;;  %s70_s9 = int_to_ptr.vmem [resolvable:$true] %s69_s9 }
  0x48   :  { %s539_s12 = scalar_lea.hbm %s822_s2, 16 }
  0x49   :  { %p540_p4 = scmp.ne.s32.totalorder %s822_s2, %s539_s12  ;;  %p543_p5 = scmp.lt.u32.totalorder %s539_s12, %s822_s2 }
  0x4b   :  { %p545_p6 = pnand %p543_p5, %p540_p4 }
  0x4d   :  { %548 = shalt.err (!%p545_p6)
}
  0x4e   :  { %s549_s0 = scalar_lea.vmem %s48_s29, 16  ;;  %s553_s30 = scalar_lea.vmem %s48_s29, 32 }
  0x4f   :  { %p550_p7 = scmp.ne.s32.totalorder %s48_s29, %s549_s0  ;;  %p554_p8 = scmp.lt.s32.totalorder %s48_s29, %s48_s29 }
  0x50   :  { %p555_p9 = scmp.lt.s32.totalorder %s553_s30, %s549_s0 }
  0x52   :  { %p556_p10 = por %p555_p9, %p554_p8 }
  0x54   :  { %p557_p11 = pnand %p556_p10, %p550_p7 }
  0x56   :  { %560 = shalt.err (!%p557_p11)
}
  0x57   :  { %50 = dma.hbm_to_vmem [thread:$0]  %s822_s2, 16, %s48_s29, [#allocation7]  }
  0x58   :  { %s561_s21 = scalar_lea.hbm %s824_s4, 16 }
  0x59   :  { %p562_p12 = scmp.ne.s32.totalorder %s824_s4, %s561_s21  ;;  %p565_p13 = scmp.lt.u32.totalorder %s561_s21, %s824_s4 }
  0x5b   :  { %p567_p0 = pnand %p565_p13, %p562_p12 }
  0x5d   :  { %570 = shalt.err (!%p567_p0)
}
  0x5e   :  { %s571_s25 = scalar_lea.vmem %s70_s9, 16  ;;  %s575_s5 = scalar_lea.vmem %s70_s9, 32 }
  0x5f   :  { %p572_p1 = scmp.ne.s32.totalorder %s70_s9, %s571_s25  ;;  %p576_p2 = scmp.lt.s32.totalorder %s70_s9, %s70_s9 }
  0x60   :  { %p577_p3 = scmp.lt.s32.totalorder %s575_s5, %s571_s25 }
  0x62   :  { %p578_p4 = por %p577_p3, %p576_p2 }
  0x64   :  { %p579_p5 = pnand %p578_p4, %p572_p1 }
  0x66   :  { %582 = shalt.err (!%p579_p5)
}
  0x67   :  { %72 = dma.hbm_to_vmem [thread:$0]  %s824_s4, 16, %s70_s9, [#allocation10]  }
  0x68   :  { %s645_s28 = smov [#allocation14]   ;;  %s583_s11 = scalar_lea.hbm %s826_s6, 16 }
  0x69   :  { %s89_s29 = sshll.u32 %s645_s28, 4  ;;  %p584_p6 = scmp.ne.s32.totalorder %s826_s6, %s583_s11  ;;  %s90_s29 = int_to_ptr.vmem [resolvable:$true] %s89_s29 }
  0x6a   :  { %p587_p7 = scmp.lt.u32.totalorder %s583_s11, %s826_s6 }
  0x6c   :  { %p589_p8 = pnand %p587_p7, %p584_p6 }
  0x6e   :  { %592 = shalt.err (!%p589_p8)
}
  0x6f   :  { %s593_s27 = scalar_lea.vmem %s90_s29, 16  ;;  %s597_s4 = scalar_lea.vmem %s90_s29, 32 }
  0x70   :  { %p594_p9 = scmp.ne.s32.totalorder %s90_s29, %s593_s27  ;;  %p598_p10 = scmp.lt.s32.totalorder %s90_s29, %s90_s29 }
  0x71   :  { %p599_p11 = scmp.lt.s32.totalorder %s597_s4, %s593_s27 }
  0x73   :  { %p600_p12 = por %p599_p11, %p598_p10 }
  0x75   :  { %p601_p13 = pnand %p600_p12, %p594_p9 }
  0x77   :  { %604 = shalt.err (!%p601_p13)
}
  0x78   :  { %92 = dma.hbm_to_vmem [thread:$0]  %s826_s6, 16, %s90_s29, [#allocation13]  }
  0x79   :  { %627 = dma.done.wait [#allocation4], 128  }
  0x7a   :  { %628 = vsyncadd [#allocation4], 4294967168 }
  0x7b   :  { %629 = dma.done.wait [#allocation7], 272  }
  0x7c   :  { %630 = vsyncadd [#allocation7], 4294967024 }
  0x7d   :  { %631 = dma.done.wait [#allocation10], 528  }
  0x7e   :  { %632 = vsyncadd [#allocation10], 4294966768 }
  0x7f   :  { %633 = dma.done.wait [#allocation13], 32  }
  0x80   :  { %634 = vsyncadd [#allocation13], 4294967264  ;;  %vm119_vm0 = vcmask 261120   ;;  %v646_v0 = vmov 0.0   ;;  %vm647_vm1 = vmmov 0   ;;  %v440_v1 = vld [vmem:[#allocation6] sm:$0xff]  }
  0x81   :  { %408 = vmatprep.subr.bf16.mxu0 %v646_v0  ;;  %412 = vmatprep.mubr.msk.bf16.mxu0 %vm647_vm1, %v646_v0  ;;  %120 = vst.msk [vmem:[#allocation2] sm:$0xff] %vm119_vm0, %v646_v0  ;;  %121 = vst.msk [vmem:[#allocation2 + $0x8] sm:$0xff] %vm119_vm0, %v646_v0  ;;  %v441_v2 = vld [vmem:[#allocation6 + $0x8] sm:$0xff]   ;;  %v443_v3 = vld [vmem:[#allocation9] sm:$0xff]   ;;  %vm234_vm2 = vcmask 523264   ;;  %vm356_vm3 = vcmask 257024  }
  0x82   :  { %416 = vmatprep.subr.bf16.mxu1 %v646_v0  ;;  %424 = vmatprep.mubr.msk.bf16.mxu1 %vm647_vm1, %v646_v0  ;;  %v442_v4 = vld [vmem:[#allocation3] sm:$0xff]   ;;  %v445_v6 = vld [vmem:[#allocation9 + $0x10] sm:$0xff]   ;;  %v446_v7 = vld [vmem:[#allocation9 + $0x18] sm:$0xff]   ;;  %s648_s6 = smov [#allocation15]  }
  0x83   :  { %409 = vmatpush3.bf16.msra.mxu0 %v440_v1  ;;  %417 = vmatpush3.bf16.msra.mxu1 %v443_v3  ;;  %v444_v5 = vld [vmem:[#allocation9 + $0x8] sm:$0xff]   ;;  %v379_v8 = vld [vmem:[#allocation8] ss:$0 sm:$0xff]  ;;  %v389_v27 = vld [vmem:[#allocation11] ss:$0 sm:$0xff]  ;;  %s364_s30 = sshll.u32 %s648_s6, 4  ;;  %s365_s30 = int_to_ptr.vmem [resolvable:$true] %s364_s30 }
  0x84   :  { %410 = vmatprep.subr.bf16.mxu0 %v646_v0  ;;  %418 = vmatprep.subr.bf16.mxu1 %v646_v0  ;;  %v397_v26 = vld [vmem:[#allocation3] sm:$0xff]   ;;  %v390_v55 = vld [vmem:[#allocation12] ss:$0 sm:$0xff]  ;;  %v391_v57 = vld [vmem:[#allocation14] ss:$0 sm:$0xff]  ;;  %s605_s17 = scalar_lea.vmem %s365_s30, 128  ;;  %p610_p1 = scmp.lt.s32.totalorder %s365_s30, %s365_s30 }
  0x85   :  { %v398_v28 = vunpack.c.l.bf16 %v397_v26  ;;  %v399_v31 = vunpack.c.h.bf16 %v397_v26  ;;  %p606_p0 = scmp.ne.s32.totalorder %s365_s30, %s605_s17  ;;  %p611_p2 = scmp.lt.s32.totalorder %s605_s17, %s605_s17 }
  0x87   :  { %411 = vmatpush3.bf16.msra.mxu0 %v441_v2  ;;  %419 = vmatpush3.bf16.msra.mxu1 %v444_v5  ;;  %p612_p3 = por %p611_p2, %p610_p1 }
  0x88   :  { %420 = vmatprep.subr.bf16.mxu1 %v646_v0  ;;  %v199_v18 = vld [vmem:[#allocation2] sm:$0xff]  ;;  %v200_v20 = vld [vmem:[#allocation2 + $0x8] sm:$0xff] }
  0x89   :  { %p613_p4 = pnand %p612_p3, %p606_p0 }
  0x8a   :  { %413 = vmatmul.mubr.msk.bf16.vlgmr.msra.gmra.mrb[0].mxu0 %vm119_vm0, %v442_v4 }
  0x8b   :  { %421 = vmatpush3.bf16.msra.mxu1 %v445_v6 }
  0x8c   :  { %422 = vmatprep.subr.bf16.mxu1 %v646_v0 }
  0x8f   :  { %423 = vmatpush3.bf16.msra.mxu1 %v446_v7 }
 0x15d   :  { %v190_v9 = vpop.f32.mrb[0].mxu0 }
 0x15e   :  { %v191_v10 = vadd.f32 %v379_v8, %v190_v9  ;;  %v414_v11 = vpop.f32.mrb[1].mxu0 }
 0x15f   :  { %v193_v12 = vpop.f32.mrb[2].mxu0 }
 0x160   :  { %v194_v13 = vadd.f32 %v379_v8, %v193_v12  ;;  %v415_v14 = vpop.f32.mrb[3].mxu0  ;;  %v197_v15 = vmax.f32 %v191_v10, 0.0 }
 0x162   :  { %v198_v16 = vmax.f32 %v194_v13, 0.0 }
 0x164   :  { %v201_v17 = vpack.c.bf16 %v198_v16, %v197_v15 }
 0x166   :  { %425 = vmatmul.mubr.msk.bf16.vlgmr.msra.gmra.mrb[0].mxu1 %vm234_vm2, %v201_v17 }
 0x239   :  { %v272_v19 = vpop.f32.mrb[0].mxu1 }
 0x23a   :  { %v279_v21 = vadd.f32 %v272_v19, %v199_v18  ;;  %v426_v22 = vpop.f32.mrb[1].mxu1 }
 0x23b   :  { %v275_v23 = vpop.f32.mrb[2].mxu1 }
 0x23c   :  { %281 = vst.msk [vmem:[#allocation2] sm:$0xff] %vm119_vm0, %v279_v21  ;;  %v280_v24 = vadd.f32 %v275_v23, %v200_v20  ;;  %v427_v25 = vpop.f32.mrb[3].mxu1 }
 0x23e   :  { %282 = vst.msk [vmem:[#allocation2 + $0x8] sm:$0xff] %vm119_vm0, %v280_v24 }
 0x243   :  { %v286_v29 = vld [vmem:[#allocation2] sm:$0xff] }
 0x244   :  { %v295_v30 = vadd.f32 %v389_v27, %v286_v29 }
 0x245   :  { %v287_v32 = vld [vmem:[#allocation2 + $0x8] sm:$0xff] }
 0x246   :  { %v301_v33 = vadd.f32 %v398_v28, %v295_v30  ;;  %v296_v34 = vadd.f32 %v389_v27, %v287_v32 }
 0x248   :  { %v303_v35 = vsel %vm119_vm0, %v301_v33, 0.0  ;;  %v302_v36 = vadd.f32 %v399_v31, %v296_v34 }
 0x249   :  { %304 = vadd.xlane.f32.xlu0 %v303_v35 }
 0x24a   :  { %v306_v37 = vsel %vm119_vm0, %v302_v36, 0.0 }
 0x24d   :  { %307 = vadd.xlane.f32.xlu0 %v306_v37 }
 0x2d6   :  { %v305_v38 = vpop.xlane.xlu0 %304 }
 0x2d7   :  { %v310_v39 = vmul.f32 0.03125, %v305_v38 }
 0x2d9   :  { %v312_v40 = vsub.f32 %v301_v33, %v310_v39 }
 0x2da   :  { %v308_v41 = vpop.xlane.xlu0 %307 }
 0x2db   :  { %v311_v42 = vmul.f32 0.03125, %v308_v41  ;;  %v314_v43 = vmul.f32 %v312_v40, %v312_v40 }
 0x2dd   :  { %v313_v44 = vsub.f32 %v302_v36, %v311_v42  ;;  %v316_v45 = vsel %vm119_vm0, %v314_v43, 0.0 }
 0x2de   :  { %317 = vadd.xlane.f32.xlu1 %v316_v45 }
 0x2df   :  { %v315_v46 = vmul.f32 %v313_v44, %v313_v44 }
 0x2e1   :  { %v319_v47 = vsel %vm119_vm0, %v315_v46, 0.0 }
 0x2e2   :  { %320 = vadd.xlane.f32.xlu1 %v319_v47 }
 0x36b   :  { %v318_v48 = vpop.xlane.xlu1 %317 }
 0x36c   :  { %v322_v49 = vmul.f32 0.03125, %v318_v48 }
 0x36e   :  { %v324_v50 = vadd.f32 1e-05, %v322_v49 }
 0x36f   :  { %v321_v51 = vpop.xlane.xlu1 %320 }
 0x370   :  { %447 = vrsqrt.f32 %v324_v50  ;;  %v323_v52 = vmul.f32 0.03125, %v321_v51 }
 0x372   :  { %v325_v53 = vadd.f32 1e-05, %v323_v52 }
 0x374   :  { %449 = vrsqrt.f32 %v325_v53 }
 0x37a   :  { %v448_v54 = vpop.eup %447 }
 0x37b   :  { %v328_v56 = vmul.f32 %v448_v54, %v312_v40 }
 0x37d   :  { %v337_v58 = vmul.f32 %v390_v55, %v328_v56 }
 0x37e   :  { %v450_v59 = vpop.eup %449 }
 0x37f   :  { %v329_v60 = vmul.f32 %v450_v59, %v313_v44  ;;  %v346_v61 = vadd.f32 %v391_v57, %v337_v58 }
 0x381   :  { %v338_v62 = vmul.f32 %v390_v55, %v329_v60  ;;  %v394_v63 = vpack.c.bf16 %v346_v61, %v346_v61 }
 0x383   :  { %v347_v0 = vadd.f32 %v391_v57, %v338_v62  ;;  %357 = vst.msk [vmem:[#allocation15] sm:$0xf] %vm356_vm3, %v394_v63 }
 0x385   :  { %v395_v1 = vpack.c.bf16 %v347_v0, %v347_v0 }
 0x387   :  { %358 = vst.msk [vmem:[#allocation15 + $0x4] sm:$0xf] %vm356_vm3, %v395_v1 }
 0x388   :  { %616 = shalt.err (!%p613_p4)
}
 0x389   :  { %s617_s20 = scalar_lea.hbm %s827_s7, 128 }
 0x38a   :  { %p618_p5 = scmp.ne.s32.totalorder %s827_s7, %s617_s20  ;;  %p621_p6 = scmp.lt.u32.totalorder %s617_s20, %s827_s7 }
 0x38c   :  { %p623_p7 = pnand %p621_p6, %p618_p5 }
 0x38e   :  { %626 = shalt.err (!%p623_p7)
}
 0x38f   :  { %370 = dma.vmem_to_hbm [thread:$0]  %s365_s30, 128, %s827_s7, [#allocation5], %s639_s13, %s639_s13, %s640_s14  }
 0x390   :  { %635 = dma.done.wait [#allocation5], 128  }
 0x391   :  { %636 = vsyncadd [#allocation5], 4294967168 }
 0x392   :  { %374 = vsyncpa [#allocation4], 1 }
 0x393   :  { %375 = vsyncpa [#allocation7], 1 }
 0x394   :  { %376 = vsyncpa [#allocation10], 1 }
 0x395   :  { %377 = vsyncpa [#allocation13], 1 }
 0x396   :  { %378 = vsyncpa [#allocation5], 1 }

</bundles_post_ra>
